<compile_context>
chip_gen: v5e
topology: v5e:2x2
jax: 0.10.0
libtpu: 0.0.40
codegen_flags: <defaults>
</compile_context>

<pallas_src>
import math

import jax
import jax.numpy as jnp
from jax.experimental import pallas as pl
from jax.experimental.pallas import tpu as pltpu

# ------------------------- configuration (small synthetic sizes) -------------------------
C_S = 64           # single representation channels
C_Z = 32           # pair representation channels
C_IPA = 8          # IPA hidden channels per head
C_RESNET = 32      # angle resnet hidden channels
NO_HEADS = 4
NO_QK_POINTS = 4
NO_V_POINTS = 8
NO_BLOCKS = 2
NO_TRANSITION_LAYERS = 1
NO_RESNET_BLOCKS = 2
NO_ANGLES = 7
TRANS_SCALE = 10.0
EPS = 1e-12
INF = 1e5
LN_EPS = 1e-5
N_RES = 8

TILE_Q = 128                      # query rows per grid step (falls back to N when N < 128)
Z_ROWS = 4096                     # flattened-pair rows per prologue grid step
OUT_PACK = 128                    # lane-dense packed output width (s | bb | angles | pad)
Z_DTYPE = jnp.float32             # TODO(synk): bf16 on v7x per review (halves z VMEM/HBM)

VMEM = pl.BlockSpec(memory_space=pltpu.MemorySpace.VMEM)


# --------------------------------- in-kernel helpers --------------------------------------
def _ln(x, g, b):
    mu = jnp.mean(x, axis=-1, keepdims=True)
    xc = x - mu
    var = jnp.mean(xc * xc, axis=-1, keepdims=True)
    return xc * jax.lax.rsqrt(var + LN_EPS) * g + b


def _dot(x, w, b=None, relu_in=False):
    if relu_in:
        x = jnp.maximum(x, 0.0)
    y = jnp.dot(x, w, preferred_element_type=jnp.float32)
    return y if b is None else y + b


def _dot_nt(a, b):
    """a @ b.T (contract last dims of both) without materializing a transpose."""
    return jax.lax.dot_general(a, b, (((1,), (1,)), ((), ())),
                               preferred_element_type=jnp.float32)


def _apply_frame(px, py, pz, r, t):
    """Row-wise rigid apply: global = R @ local + t (r = 9 [R,1] cols, t = 3 [R,1] cols)."""
    return (r[0] * px + r[1] * py + r[2] * pz + t[0],
            r[3] * px + r[4] * py + r[5] * pz + t[1],
            r[6] * px + r[7] * py + r[8] * pz + t[2])


def _invert_frame(gx, gy, gz, r, t):
    """Row-wise rigid invert-apply: local = R^T @ (global - t)."""
    dx, dy, dz = gx - t[0], gy - t[1], gz - t[2]
    return (r[0] * dx + r[3] * dy + r[6] * dz,
            r[1] * dx + r[4] * dy + r[7] * dz,
            r[2] * dx + r[5] * dy + r[8] * dz)


# ------------------------------------ Pallas kernels ---------------------------------------
def _s_prologue_kernel(s_ref, g_ref, b_ref, w_ref, bi_ref, s_init_ref, s0_ref):
    """LayerNorm(s) and linear_in(s)."""
    sn = _ln(s_ref[...], g_ref[...], b_ref[...])
    s_init_ref[...] = sn
    s0_ref[...] = _dot(sn, w_ref[...], bi_ref[...])


def _z_prologue_kernel(zf_ref, g_ref, b_ref, wb_ref, bb_ref, zn_ref, bias_ref):
    """Row-block of LayerNorm(z) and the pair-bias linear_b(z) (sqrt(1/3) folded into wb/bb)."""
    zn = _ln(zf_ref[...], g_ref[...], b_ref[...])
    zn_ref[...] = zn.astype(zn_ref.dtype)
    bias_ref[...] = _dot(zn, wb_ref[...], bb_ref[...])


def _ipa_block_kernel(*refs):
    """One structure-module block for a query-row tile.

    refs = (s_full, s_initial_tile, z3_tile, bias_tile[H,Tq,N], rot9_full, trans_full,
            *flat_params, packed_out_tile)
    """
    s_ref, si_ref, z_ref, bz_ref, rot_ref, tr_ref = refs[0:6]
    out_ref = refs[-1]
    prm = refs[6:-1]
    ctr = [0]

    def nxt():
        v = prm[ctr[0]][...]
        ctr[0] += 1
        return v

    H, C, Pq, Pv = NO_HEADS, C_IPA, NO_QK_POINTS, NO_V_POINTS
    Pqv = Pq + Pv
    tq = si_ref.shape[0]
    n = s_ref.shape[0]
    row0 = pl.multiple_of(pl.program_id(0) * tq, 8)

    s_all = s_ref[...]                                  # [N, C_S]  (keys / values)
    s_q = s_ref[pl.ds(row0, tq), :]                     # [Tq, C_S] (queries / residual)

    # hoisted rotation / translation lane-broadcast columns (used once each)
    rot_all = rot_ref[...]
    tr_all = tr_ref[...]
    rot_q = rot_ref[pl.ds(row0, tq), :]
    tr_q = tr_ref[pl.ds(row0, tq), :]
    r_all = [rot_all[:, i:i + 1] for i in range(9)]
    t_all = [tr_all[:, i:i + 1] for i in range(3)]
    r_q = [rot_q[:, i:i + 1] for i in range(9)]
    t_q = [tr_q[:, i:i + 1] for i in range(3)]

    # ---- fused projections: q-side on the query tile, kv-side on all rows (2 matmuls) ----
    wqs, bqs, wkv, bkv, qpt_scale, coeff_row = nxt(), nxt(), nxt(), nxt(), nxt(), nxt()
    projq = _dot(s_q, wqs, bqs)                         # [Tq, H*C + 3*H*Pq]
    projkv = _dot(s_all, wkv, bkv)                      # [N, 2*H*C + 3*H*Pqv]

    nqp = H * Pq
    nkp = H * Pqv
    OQ = H * C
    OKV = 2 * H * C
    # one frame-apply per side on the concatenated coordinate slabs
    gqx, gqy, gqz = _apply_frame(projq[:, OQ:OQ + nqp],
                                 projq[:, OQ + nqp:OQ + 2 * nqp],
                                 projq[:, OQ + 2 * nqp:OQ + 3 * nqp], r_q, t_q)      # [Tq, H*Pq]
    gkx, gky, gkz = _apply_frame(projkv[:, OKV:OKV + nkp],
                                 projkv[:, OKV + nkp:OKV + 2 * nkp],
                                 projkv[:, OKV + 2 * nkp:OKV + 3 * nkp], r_all, t_all)  # [N, H*Pqv]

    # fold -2*coeff_h (point-attention weight) into the q-point columns -> fused QK matmul
    gqx_s, gqy_s, gqz_s = gqx * qpt_scale, gqy * qpt_scale, gqz * qpt_scale

    ones_q = jnp.ones((tq, 1), jnp.float32)
    a_list, o_list, ox_list, oy_list, oz_list = [], [], [], [], []
    for h in range(H):
        q_h = projq[:, h * C:(h + 1) * C]
        k_h = projkv[:, 2 * C * h:2 * C * h + C]
        v_h = projkv[:, 2 * C * h + C:2 * C * (h + 1)]
        qb, kb = h * Pq, h * Pqv
        kpx, kpy, kpz = gkx[:, kb:kb + Pq], gky[:, kb:kb + Pq], gkz[:, kb:kb + Pq]
        sqk_h = jnp.sum(kpx * kpx + kpy * kpy + kpz * kpz, axis=1, keepdims=True)      # [N, 1]

        # fused QK + point cross term + sq_k term: one K = C + 3*Pq + 1 matmul
        # (sq_q dropped -- row-constant, cancels under the softmax)
        q_cat = jnp.concatenate([q_h, gqx_s[:, qb:qb + Pq], gqy_s[:, qb:qb + Pq],
                                 gqz_s[:, qb:qb + Pq], ones_q], axis=1)                # [Tq, 21]
        k_cat = jnp.concatenate([k_h, kpx, kpy, kpz,
                                 sqk_h * coeff_row[:, h:h + 1]], axis=1)               # [N, 21]
        logits = _dot_nt(q_cat, k_cat) + bz_ref[h]       # pair bias + mask pre-folded

        # softmax (reciprocal on the EUP slot)
        m = jnp.max(logits, axis=-1, keepdims=True)
        p = jnp.exp(logits - m)
        a_h = p * pl.reciprocal(jnp.sum(p, axis=-1, keepdims=True), approx=True)       # [Tq, N]
        a_list.append(a_h)

        # fused scalar-value + point-value aggregation: one K = N matmul per head
        ov_in = jnp.concatenate([v_h, gkx[:, kb + Pq:kb + Pqv],
                                 gky[:, kb + Pq:kb + Pqv], gkz[:, kb + Pq:kb + Pqv]], axis=1)
        ov_h = jnp.dot(a_h, ov_in, preferred_element_type=jnp.float32)                 # [Tq, C+3Pv]
        o_list.append(ov_h[:, :C])
        ox_list.append(ov_h[:, C:C + Pv])
        oy_list.append(ov_h[:, C + Pv:C + 2 * Pv])
        oz_list.append(ov_h[:, C + 2 * Pv:C + 3 * Pv])

    # ---- pair aggregation on the MXU: [i,h,j] x [i,j,c] -> [i,h,c] (single batched dot) ----
    a3 = jnp.stack(a_list, axis=1)                                                     # [Tq, H, N]
    z3 = z_ref[...]
    opair = jax.lax.dot_general(a3.astype(z3.dtype), z3,
                                (((2,), (1,)), ((0,), (0,))),
                                preferred_element_type=jnp.float32)                    # [Tq, H, C_Z]
    opair_flat = opair.reshape(tq, H * C_Z)

    # ---- invert-apply + point norms on the concatenated slabs, then ONE linear_out matmul ----
    o_all = jnp.concatenate(o_list, axis=1)                                            # [Tq, H*C]
    gx_o = jnp.concatenate(ox_list, axis=1)                                            # [Tq, H*Pv]
    gy_o = jnp.concatenate(oy_list, axis=1)
    gz_o = jnp.concatenate(oz_list, axis=1)
    lx, ly, lz = _invert_frame(gx_o, gy_o, gz_o, r_q, t_q)
    nrm = jnp.sqrt(lx * lx + ly * ly + lz * lz + EPS)

    slab = jnp.concatenate([o_all, lx, ly, lz, nrm, opair_flat], axis=1)               # [Tq, 288]
    wout, bout = nxt(), nxt()
    acc = s_q + bout + jnp.dot(slab, wout, preferred_element_type=jnp.float32)         # residual

    # ---- LayerNorm(ipa), transition, backbone update, angle resnet ----
    s1 = _ln(acc, nxt(), nxt())
    for _ in range(NO_TRANSITION_LAYERS):
        t1 = _dot(s1, nxt(), nxt())
        t1 = _dot(t1, nxt(), nxt(), relu_in=True)
        t1 = _dot(t1, nxt(), nxt(), relu_in=True)
        s1 = s1 + t1
    s2 = _ln(s1, nxt(), nxt())

    bb = _dot(s2, nxt(), nxt())                                                        # [Tq, 6]

    ai = _dot(si_ref[...], nxt(), nxt(), relu_in=True)
    av = _dot(s2, nxt(), nxt(), relu_in=True) + ai
    for _ in range(NO_RESNET_BLOCKS):
        b1 = _dot(av, nxt(), nxt(), relu_in=True)
        b2 = _dot(b1, nxt(), nxt(), relu_in=True)
        av = av + b2
    ang = _dot(av, nxt(), nxt(), relu_in=True)                                         # [Tq, 14]

    # lane-dense packed output: [s2 | bb | angles | zero pad] -> [Tq, 128]
    pad = jnp.zeros((tq, OUT_PACK - (C_S + 6 + 2 * NO_ANGLES)), jnp.float32)
    out_ref[...] = jnp.concatenate([s2, bb, ang, pad], axis=1)


# ------------------------------------ kernel wrappers --------------------------------------
def _full2(shape):
    return pl.BlockSpec(shape, lambda i: (0, 0))


def s_prologue(s, g, b, w_in, b_in):
    n = s.shape[0]
    return pl.pallas_call(
        _s_prologue_kernel,
        out_shape=(jax.ShapeDtypeStruct((n, C_S), jnp.float32),
                   jax.ShapeDtypeStruct((n, C_S), jnp.float32)),
        in_specs=[VMEM] * 5,
        out_specs=(VMEM, VMEM),
    )(s, g, b, w_in, b_in)


def z_prologue(zf, g, b, w_pb, b_pb):
    nn = zf.shape[0]
    rows = nn if nn <= Z_ROWS or nn % Z_ROWS != 0 else Z_ROWS
    grid = (nn // rows,)
    return pl.pallas_call(
        _z_prologue_kernel,
        out_shape=(jax.ShapeDtypeStruct((nn, C_Z), Z_DTYPE),
                   jax.ShapeDtypeStruct((nn, NO_HEADS), jnp.float32)),
        grid=grid,
        in_specs=[pl.BlockSpec((rows, C_Z), lambda r: (r, 0)),
                  _full2(g.shape), _full2(b.shape), _full2(w_pb.shape), _full2(b_pb.shape)],
        out_specs=(pl.BlockSpec((rows, C_Z), lambda r: (r, 0)),
                   pl.BlockSpec((rows, NO_HEADS), lambda r: (r, 0))),
        compiler_params=pltpu.CompilerParams(dimension_semantics=("parallel",)),
    )(zf, g, b, w_pb, b_pb)


def ipa_block(s, s_init, z3, bz, rot9, trans, kparams):
    n = s.shape[0]
    tq = TILE_Q if n % TILE_Q == 0 else n
    grid = (n // tq,)
    in_specs = [
        _full2(s.shape),                                        # s (full: keys / values)
        pl.BlockSpec((tq, C_S), lambda i: (i, 0)),              # s_initial (query tile)
        pl.BlockSpec((tq, n, C_Z), lambda i: (i, 0, 0)),        # z3 (query tile)
        pl.BlockSpec((NO_HEADS, tq, n), lambda i: (0, i, 0)),   # pair bias + mask (query tile)
        _full2(rot9.shape),                                     # rotations (full)
        _full2(trans.shape),                                    # translations (full)
    ] + [_full2(p.shape) for p in kparams]                      # weights: resident across steps
    return pl.pallas_call(
        _ipa_block_kernel,
        out_shape=jax.ShapeDtypeStruct((n, OUT_PACK), jnp.float32),
        grid=grid,
        in_specs=in_specs,
        out_specs=pl.BlockSpec((tq, OUT_PACK), lambda i: (i, 0)),
        compiler_params=pltpu.CompilerParams(dimension_semantics=("parallel",)),
    )(s, s_init, z3, bz, rot9, trans, *kparams)


# ------------------------------ rigid transform glue (JAX) ---------------------------------
def quat_to_rot(q):
    w, x, y, z = q[..., 0], q[..., 1], q[..., 2], q[..., 3]
    r0 = jnp.stack([w * w + x * x - y * y - z * z, 2 * (x * y - w * z), 2 * (x * z + w * y)], -1)
    r1 = jnp.stack([2 * (x * y + w * z), w * w - x * x + y * y - z * z, 2 * (y * z - w * x)], -1)
    r2 = jnp.stack([2 * (x * z - w * y), 2 * (y * z + w * x), w * w - x * x - y * y + z * z], -1)
    return jnp.stack([r0, r1, r2], axis=-2)


def compose(r1, t1, r2, t2):
    r = jnp.einsum("nij,njk->nik", r1, r2)
    t = jnp.einsum("nij,nj->ni", r1, t2) + t1
    return r, t


def to_4x4(rots, trans):
    n = rots.shape[0]
    m = jnp.zeros((n, 4, 4), jnp.float32)
    m = m.at[:, :3, :3].set(rots)
    m = m.at[:, :3, 3].set(trans)
    m = m.at[:, 3, 3].set(1.0)
    return m


# ---------------------------- parameter fusion / preprocessing -----------------------------
def _prepare_params(params):
    """Fuse projections, fold scale factors and head weights, pre-reshape biases."""
    # TODO(synk): real OpenFold checkpoints store point projections xyz-interleaved; porting
    # pretrained weights needs a column permutation here (internally consistent with init_params).
    ipa = params["ipa"]
    H, Pq = NO_HEADS, NO_QK_POINTS
    scale_qk = math.sqrt(1.0 / (3 * C_IPA))
    scale_b = math.sqrt(1.0 / 3)

    def b2(p):
        return p["b"].reshape(1, -1)

    wqs = jnp.concatenate([ipa["linear_q"]["w"] * scale_qk, ipa["linear_q_points"]["w"]], axis=1)
    bqs = jnp.concatenate([ipa["linear_q"]["b"] * scale_qk,
                           ipa["linear_q_points"]["b"]], axis=0).reshape(1, -1)
    wkv = jnp.concatenate([ipa["linear_kv"]["w"], ipa["linear_kv_points"]["w"]], axis=1)
    bkv = jnp.concatenate([ipa["linear_kv"]["b"], ipa["linear_kv_points"]["b"]], axis=0).reshape(1, -1)
    w_pb = ipa["linear_b"]["w"] * scale_b
    b_pb = (ipa["linear_b"]["b"] * scale_b).reshape(1, -1)
    coeff = (-0.5 * math.sqrt(1.0 / (3 * (Pq * 9.0 / 2)))
             * jax.nn.softplus(ipa["head_weights"])).astype(jnp.float32)
    coeff_row = coeff.reshape(1, H)
    qpt_scale = jnp.repeat(-2.0 * coeff, Pq).reshape(1, H * Pq)

    kp = [wqs, bqs, wkv, bkv, qpt_scale, coeff_row,
          ipa["linear_out"]["w"], b2(ipa["linear_out"]),
          params["layer_norm_ipa"]["g"].reshape(1, -1), params["layer_norm_ipa"]["b"].reshape(1, -1)]
    for lp in params["transition"]["layers"]:
        kp += [lp["linear_1"]["w"], b2(lp["linear_1"]),
               lp["linear_2"]["w"], b2(lp["linear_2"]),
               lp["linear_3"]["w"], b2(lp["linear_3"])]
    tln = params["transition"]["layer_norm"]
    kp += [tln["g"].reshape(1, -1), tln["b"].reshape(1, -1)]
    kp += [params["bb_update"]["linear"]["w"], b2(params["bb_update"]["linear"])]
    ar = params["angle_resnet"]
    kp += [ar["linear_initial"]["w"], b2(ar["linear_initial"]),
           ar["linear_in"]["w"], b2(ar["linear_in"])]
    for lp in ar["layers"]:
        kp += [lp["linear_1"]["w"], b2(lp["linear_1"]),
               lp["linear_2"]["w"], b2(lp["linear_2"])]
    kp += [ar["linear_out"]["w"], b2(ar["linear_out"])]
    return w_pb, b_pb, kp


# --------------------------------- StructureModule forward ---------------------------------
def structure_module_forward(params, s, z, mask=None):
    n = s.shape[0]
    if mask is None:
        mask = jnp.ones((n,), jnp.float32)

    w_pb, b_pb, kparams = _prepare_params(params)

    s_init, s_cur = s_prologue(
        s, params["layer_norm_s"]["g"].reshape(1, -1), params["layer_norm_s"]["b"].reshape(1, -1),
        params["linear_in"]["w"], params["linear_in"]["b"].reshape(1, -1))
    zn_flat, bias_flat = z_prologue(
        z.reshape(n * n, C_Z),
        params["layer_norm_z"]["g"].reshape(1, -1), params["layer_norm_z"]["b"].reshape(1, -1),
        w_pb, b_pb)
    z3 = zn_flat.reshape(n, n, C_Z)
    mbias = INF * (mask[:, None] * mask[None, :] - 1.0)
    bz = jnp.transpose(bias_flat.reshape(n, n, NO_HEADS), (2, 0, 1)) + mbias[None, :, :]  # [H,N,N]

    rots = jnp.broadcast_to(jnp.eye(3, dtype=jnp.float32), (n, 3, 3))
    trans = jnp.zeros((n, 3), jnp.float32)

    outputs = []
    outputs_bb = []
    for i in range(NO_BLOCKS):
        packed = ipa_block(s_cur, s_init, z3, bz, rots.reshape(n, 9), trans, kparams)
        s_cur = packed[:, :C_S]
        bb_params = packed[:, C_S:C_S + 6]
        unnorm_flat = packed[:, C_S + 6:C_S + 6 + 2 * NO_ANGLES]

        # backbone update -> rigid compose (small per-residue algebra, JAX glue)
        quats, d_trans = bb_params[:, :3], bb_params[:, 3:]
        qn = jnp.sqrt(jnp.sum(quats ** 2, axis=-1, keepdims=True) + 1.0)
        quats = jnp.concatenate([jnp.ones((n, 1), jnp.float32), quats], axis=-1) / qn
        rots, trans = compose(rots, trans, quat_to_rot(quats), d_trans)

        unnorm = unnorm_flat.reshape(n, NO_ANGLES, 2)
        denom = jnp.sqrt(jnp.maximum(jnp.sum(unnorm ** 2, axis=-1, keepdims=True), EPS))
        angles = unnorm / denom

        frames_4x4 = to_4x4(rots, trans * TRANS_SCALE)
        # TODO(synk): torsion_angles_to_frames / frames_and_literature_positions_to_atom14_pos
        # need the AlphaFold residue-constant tables (external data); 'sidechain_frames' and
        # 'positions' outputs are omitted.
        preds = {"frames": frames_4x4, "unnormalized_angles": unnorm, "angles": angles}
        outputs.append(preds)
        outputs_bb.append(frames_4x4)

        if i < NO_BLOCKS - 1:
            rots = jax.lax.stop_gradient(rots)

    out = {k: jnp.stack([o[k] for o in outputs], axis=0) for k in outputs[0]}
    out["single"] = s_cur
    return outputs_bb, trans, out


# -------------------------------- deterministic parameters ---------------------------------
def init_params(key):
    keys = iter(jax.random.split(key, 128))

    def lin(fan_in, fan_out):
        k1, k2 = jax.random.split(next(keys))
        return {"w": jax.random.normal(k1, (fan_in, fan_out), jnp.float32) / math.sqrt(fan_in),
                "b": 0.02 * jax.random.normal(k2, (fan_out,), jnp.float32)}

    def ln(c):
        return {"g": jnp.ones((c,), jnp.float32), "b": jnp.zeros((c,), jnp.float32)}

    H, C, Pq, Pv = NO_HEADS, C_IPA, NO_QK_POINTS, NO_V_POINTS
    ipa = {
        "linear_q": lin(C_S, H * C),
        "linear_kv": lin(C_S, 2 * H * C),
        "linear_q_points": lin(C_S, H * Pq * 3),
        "linear_kv_points": lin(C_S, H * (Pq + Pv) * 3),
        "linear_b": lin(C_Z, H),
        "head_weights": 0.5413 * jnp.ones((H,), jnp.float32),   # softplus^-1(1)
        "linear_out": lin(H * (C_Z + C + Pv * 4), C_S),
    }
    transition = {
        "layers": [{"linear_1": lin(C_S, C_S), "linear_2": lin(C_S, C_S), "linear_3": lin(C_S, C_S)}
                   for _ in range(NO_TRANSITION_LAYERS)],
        "layer_norm": ln(C_S),
    }
    angle_resnet = {
        "linear_in": lin(C_S, C_RESNET),
        "linear_initial": lin(C_S, C_RESNET),
        "layers": [{"linear_1": lin(C_RESNET, C_RESNET), "linear_2": lin(C_RESNET, C_RESNET)}
                   for _ in range(NO_RESNET_BLOCKS)],
        "linear_out": lin(C_RESNET, NO_ANGLES * 2),
    }
    return {
        "layer_norm_s": ln(C_S),
        "layer_norm_z": ln(C_Z),
        "linear_in": lin(C_S, C_S),
        "ipa": ipa,
        "layer_norm_ipa": ln(C_S),
        "transition": transition,
        "bb_update": {"linear": lin(C_S, 6)},
        "angle_resnet": angle_resnet,
    }


if __name__ == "__main__":
    key = jax.random.PRNGKey(0)
    kp, ks, kz = jax.random.split(key, 3)
    params = init_params(kp)

    s = jax.random.normal(ks, (N_RES, C_S), jnp.float32)
    z = jax.random.normal(kz, (N_RES, N_RES, C_Z), jnp.float32)
    mask = jnp.ones((N_RES,), jnp.float32)

    fwd = jax.jit(structure_module_forward)
    outputs_bb, final_trans, out = fwd(params, s, z, mask)

    jax.block_until_ready(out["single"])
    jax.block_until_ready(final_trans)
    for x in outputs_bb:
        jax.block_until_ready(x)

    print("KERNEL_OK")
</pallas_src>

<mosaic_0001>
module attributes {stable_mosaic.version = 11 : i64} {
  func.func @_z_prologue_kernel(%arg0: i32, %arg1: memref<64x32xf32, #tpu.memory_space<vmem>>, %arg2: memref<1x32xf32, #tpu.memory_space<vmem>>, %arg3: memref<1x32xf32, #tpu.memory_space<vmem>>, %arg4: memref<32x4xf32, #tpu.memory_space<vmem>>, %arg5: memref<1x4xf32, #tpu.memory_space<vmem>>, %arg6: memref<64x32xf32, #tpu.memory_space<vmem>>, %arg7: memref<64x4xf32, #tpu.memory_space<vmem>>) attributes {dimension_semantics = [#tpu.dimension_semantics<parallel>], iteration_bounds = array<i64: 1>, scalar_prefetch = 0 : i64, scratch_operands = 0 : i64, tpu.core_type = #tpu.core_type<tc>, window_params = [{transform_indices = @transform_0, window_bounds = array<i64: 64, 32>}, {pipeline_mode = #tpu.pipeline_mode<synchronous>, transform_indices = @transform_1, window_bounds = array<i64: 1, 32>}, {pipeline_mode = #tpu.pipeline_mode<synchronous>, transform_indices = @transform_2, window_bounds = array<i64: 1, 32>}, {pipeline_mode = #tpu.pipeline_mode<synchronous>, transform_indices = @transform_3, window_bounds = array<i64: 32, 4>}, {pipeline_mode = #tpu.pipeline_mode<synchronous>, transform_indices = @transform_4, window_bounds = array<i64: 1, 4>}, {transform_indices = @transform_5, window_bounds = array<i64: 64, 32>}, {transform_indices = @transform_6, window_bounds = array<i64: 64, 4>}]} {
    %c0 = arith.constant 0 : index
    %c0_0 = arith.constant 0 : index
    %0 = vector.load %arg1[%c0, %c0_0] : memref<64x32xf32, #tpu.memory_space<vmem>>, vector<64x32xf32>
    %c0_1 = arith.constant 0 : index
    %c0_2 = arith.constant 0 : index
    %1 = vector.load %arg2[%c0_1, %c0_2] : memref<1x32xf32, #tpu.memory_space<vmem>>, vector<1x32xf32>
    %c0_3 = arith.constant 0 : index
    %c0_4 = arith.constant 0 : index
    %2 = vector.load %arg3[%c0_3, %c0_4] : memref<1x32xf32, #tpu.memory_space<vmem>>, vector<1x32xf32>
    %cst = arith.constant dense<0.000000e+00> : vector<64xf32>
    %3 = vector.multi_reduction <add>, %0, %cst [1] : vector<64x32xf32> to vector<64xf32>
    %4 = vector.shape_cast %3 : vector<64xf32> to vector<64x1xf32>
    %cst_5 = arith.constant 3.200000e+01 : f32
    %5 = vector.broadcast %cst_5 : f32 to vector<64x1xf32>
    %6 = arith.divf %4, %5 : vector<64x1xf32>
    %7 = vector.broadcast %6 : vector<64x1xf32> to vector<64x32xf32>
    %8 = arith.subf %0, %7 : vector<64x32xf32>
    %9 = arith.mulf %8, %8 : vector<64x32xf32>
    %cst_6 = arith.constant dense<0.000000e+00> : vector<64xf32>
    %10 = vector.multi_reduction <add>, %9, %cst_6 [1] : vector<64x32xf32> to vector<64xf32>
    %11 = vector.shape_cast %10 : vector<64xf32> to vector<64x1xf32>
    %cst_7 = arith.constant 3.200000e+01 : f32
    %12 = vector.broadcast %cst_7 : f32 to vector<64x1xf32>
    %13 = arith.divf %11, %12 : vector<64x1xf32>
    %cst_8 = arith.constant 9.99999974E-6 : f32
    %14 = vector.broadcast %cst_8 : f32 to vector<64x1xf32>
    %15 = arith.addf %13, %14 : vector<64x1xf32>
    %16 = math.rsqrt %15 : vector<64x1xf32>
    %17 = vector.broadcast %16 : vector<64x1xf32> to vector<64x32xf32>
    %18 = arith.mulf %8, %17 : vector<64x32xf32>
    %19 = vector.broadcast %1 : vector<1x32xf32> to vector<64x32xf32>
    %20 = arith.mulf %18, %19 : vector<64x32xf32>
    %21 = vector.broadcast %2 : vector<1x32xf32> to vector<64x32xf32>
    %22 = arith.addf %20, %21 : vector<64x32xf32>
    %c0_9 = arith.constant 0 : index
    %c0_10 = arith.constant 0 : index
    %23 = vector.load %arg6[%c0_9, %c0_10] : memref<64x32xf32, #tpu.memory_space<vmem>>, vector<64x32xf32>
    tpu.vector_store %arg6[%c0_9, %c0_10], %22 {strides = array<i32>} : memref<64x32xf32, #tpu.memory_space<vmem>>, vector<64x32xf32>,
    %c0_11 = arith.constant 0 : index
    %c0_12 = arith.constant 0 : index
    %24 = vector.load %arg4[%c0_11, %c0_12] : memref<32x4xf32, #tpu.memory_space<vmem>>, vector<32x4xf32>
    %c0_13 = arith.constant 0 : index
    %c0_14 = arith.constant 0 : index
    %25 = vector.load %arg5[%c0_13, %c0_14] : memref<1x4xf32, #tpu.memory_space<vmem>>, vector<1x4xf32>
    %cst_15 = arith.constant dense<0.000000e+00> : vector<64x4xf32>
    %26 = tpu.matmul %22, %24, %cst_15 {dimension_numbers = #tpu.dot_dimension_numbers<[1], [0], [0], [1], [0, 0, 1, 1], [], []>} : vector<64x32xf32>, vector<32x4xf32>, vector<64x4xf32> -> vector<64x4xf32>
    %27 = vector.broadcast %25 : vector<1x4xf32> to vector<64x4xf32>
    %28 = arith.addf %26, %27 : vector<64x4xf32>
    %c0_16 = arith.constant 0 : index
    %c0_17 = arith.constant 0 : index
    %29 = vector.load %arg7[%c0_16, %c0_17] : memref<64x4xf32, #tpu.memory_space<vmem>>, vector<64x4xf32>
    tpu.vector_store %arg7[%c0_16, %c0_17], %28 {strides = array<i32>} : memref<64x4xf32, #tpu.memory_space<vmem>>, vector<64x4xf32>,
    return
  }
  func.func @transform_0(%arg0: i32) -> (i32, i32) {
    %c0_i32 = arith.constant 0 : i32
    %c0_i32_0 = arith.constant 0 : i32
    return %arg0, %c0_i32 : i32, i32
  }
  func.func @transform_1(%arg0: i32) -> (i32, i32) {
    %c0_i32 = arith.constant 0 : i32
    %c0_i32_0 = arith.constant 0 : i32
    %c0_i32_1 = arith.constant 0 : i32
    return %c0_i32, %c0_i32_0 : i32, i32
  }
  func.func @transform_2(%arg0: i32) -> (i32, i32) {
    %c0_i32 = arith.constant 0 : i32
    %c0_i32_0 = arith.constant 0 : i32
    %c0_i32_1 = arith.constant 0 : i32
    return %c0_i32, %c0_i32_0 : i32, i32
  }
  func.func @transform_3(%arg0: i32) -> (i32, i32) {
    %c0_i32 = arith.constant 0 : i32
    %c0_i32_0 = arith.constant 0 : i32
    %c0_i32_1 = arith.constant 0 : i32
    return %c0_i32, %c0_i32_0 : i32, i32
  }
  func.func @transform_4(%arg0: i32) -> (i32, i32) {
    %c0_i32 = arith.constant 0 : i32
    %c0_i32_0 = arith.constant 0 : i32
    %c0_i32_1 = arith.constant 0 : i32
    return %c0_i32, %c0_i32_0 : i32, i32
  }
  func.func @transform_5(%arg0: i32) -> (i32, i32) {
    %c0_i32 = arith.constant 0 : i32
    %c0_i32_0 = arith.constant 0 : i32
    return %arg0, %c0_i32 : i32, i32
  }
  func.func @transform_6(%arg0: i32) -> (i32, i32) {
    %c0_i32 = arith.constant 0 : i32
    %c0_i32_0 = arith.constant 0 : i32
    return %arg0, %c0_i32 : i32, i32
  }
}

module attributes {stable_mosaic.version = 11 : i64} {
  func.func @_s_prologue_kernel(%arg0: memref<8x64xf32, #tpu.memory_space<vmem>>, %arg1: memref<1x64xf32, #tpu.memory_space<vmem>>, %arg2: memref<1x64xf32, #tpu.memory_space<vmem>>, %arg3: memref<64x64xf32, #tpu.memory_space<vmem>>, %arg4: memref<1x64xf32, #tpu.memory_space<vmem>>, %arg5: memref<8x64xf32, #tpu.memory_space<vmem>>, %arg6: memref<8x64xf32, #tpu.memory_space<vmem>>) attributes {dimension_semantics = [], scalar_prefetch = 0 : i64, scratch_operands = 0 : i64, tpu.core_type = #tpu.core_type<tc>} {
    %c0 = arith.constant 0 : index
    %c0_0 = arith.constant 0 : index
    %0 = vector.load %arg0[%c0, %c0_0] : memref<8x64xf32, #tpu.memory_space<vmem>>, vector<8x64xf32>
    %c0_1 = arith.constant 0 : index
    %c0_2 = arith.constant 0 : index
    %1 = vector.load %arg1[%c0_1, %c0_2] : memref<1x64xf32, #tpu.memory_space<vmem>>, vector<1x64xf32>
    %c0_3 = arith.constant 0 : index
    %c0_4 = arith.constant 0 : index
    %2 = vector.load %arg2[%c0_3, %c0_4] : memref<1x64xf32, #tpu.memory_space<vmem>>, vector<1x64xf32>
    %cst = arith.constant dense<0.000000e+00> : vector<8xf32>
    %3 = vector.multi_reduction <add>, %0, %cst [1] : vector<8x64xf32> to vector<8xf32>
    %4 = vector.shape_cast %3 : vector<8xf32> to vector<8x1xf32>
    %cst_5 = arith.constant 6.400000e+01 : f32
    %5 = vector.broadcast %cst_5 : f32 to vector<8x1xf32>
    %6 = arith.divf %4, %5 : vector<8x1xf32>
    %7 = vector.broadcast %6 : vector<8x1xf32> to vector<8x64xf32>
    %8 = arith.subf %0, %7 : vector<8x64xf32>
    %9 = arith.mulf %8, %8 : vector<8x64xf32>
    %cst_6 = arith.constant dense<0.000000e+00> : vector<8xf32>
    %10 = vector.multi_reduction <add>, %9, %cst_6 [1] : vector<8x64xf32> to vector<8xf32>
    %11 = vector.shape_cast %10 : vector<8xf32> to vector<8x1xf32>
    %cst_7 = arith.constant 6.400000e+01 : f32
    %12 = vector.broadcast %cst_7 : f32 to vector<8x1xf32>
    %13 = arith.divf %11, %12 : vector<8x1xf32>
    %cst_8 = arith.constant 9.99999974E-6 : f32
    %14 = vector.broadcast %cst_8 : f32 to vector<8x1xf32>
    %15 = arith.addf %13, %14 : vector<8x1xf32>
    %16 = math.rsqrt %15 : vector<8x1xf32>
    %17 = vector.broadcast %16 : vector<8x1xf32> to vector<8x64xf32>
    %18 = arith.mulf %8, %17 : vector<8x64xf32>
    %19 = vector.broadcast %1 : vector<1x64xf32> to vector<8x64xf32>
    %20 = arith.mulf %18, %19 : vector<8x64xf32>
    %21 = vector.broadcast %2 : vector<1x64xf32> to vector<8x64xf32>
    %22 = arith.addf %20, %21 : vector<8x64xf32>
    %c0_9 = arith.constant 0 : index
    %c0_10 = arith.constant 0 : index
    %23 = vector.load %arg5[%c0_9, %c0_10] : memref<8x64xf32, #tpu.memory_space<vmem>>, vector<8x64xf32>
    tpu.vector_store %arg5[%c0_9, %c0_10], %22 {strides = array<i32>} : memref<8x64xf32, #tpu.memory_space<vmem>>, vector<8x64xf32>,
    %c0_11 = arith.constant 0 : index
    %c0_12 = arith.constant 0 : index
    %24 = vector.load %arg3[%c0_11, %c0_12] : memref<64x64xf32, #tpu.memory_space<vmem>>, vector<64x64xf32>
    %c0_13 = arith.constant 0 : index
    %c0_14 = arith.constant 0 : index
    %25 = vector.load %arg4[%c0_13, %c0_14] : memref<1x64xf32, #tpu.memory_space<vmem>>, vector<1x64xf32>
    %cst_15 = arith.constant dense<0.000000e+00> : vector<8x64xf32>
    %26 = tpu.matmul %22, %24, %cst_15 {dimension_numbers = #tpu.dot_dimension_numbers<[1], [0], [0], [1], [0, 0, 1, 1], [], []>} : vector<8x64xf32>, vector<64x64xf32>, vector<8x64xf32> -> vector<8x64xf32>
    %27 = vector.broadcast %25 : vector<1x64xf32> to vector<8x64xf32>
    %28 = arith.addf %26, %27 : vector<8x64xf32>
    %c0_16 = arith.constant 0 : index
    %c0_17 = arith.constant 0 : index
    %29 = vector.load %arg6[%c0_16, %c0_17] : memref<8x64xf32, #tpu.memory_space<vmem>>, vector<8x64xf32>
    tpu.vector_store %arg6[%c0_16, %c0_17], %28 {strides = array<i32>} : memref<8x64xf32, #tpu.memory_space<vmem>>, vector<8x64xf32>,
    return
  }
}

module attributes {stable_mosaic.version = 11 : i64} {
  func.func @_ipa_block_kernel(%arg0: i32, %arg1: memref<8x64xf32, #tpu.memory_space<vmem>>, %arg2: memref<8x64xf32, #tpu.memory_space<vmem>>, %arg3: memref<8x8x32xf32, #tpu.memory_space<vmem>>, %arg4: memref<4x8x8xf32, #tpu.memory_space<vmem>>, %arg5: memref<8x9xf32, #tpu.memory_space<vmem>>, %arg6: memref<8x3xf32, #tpu.memory_space<vmem>>, %arg7: memref<64x80xf32, #tpu.memory_space<vmem>>, %arg8: memref<1x80xf32, #tpu.memory_space<vmem>>, %arg9: memref<64x208xf32, #tpu.memory_space<vmem>>, %arg10: memref<1x208xf32, #tpu.memory_space<vmem>>, %arg11: memref<1x16xf32, #tpu.memory_space<vmem>>, %arg12: memref<1x4xf32, #tpu.memory_space<vmem>>, %arg13: memref<288x64xf32, #tpu.memory_space<vmem>>, %arg14: memref<1x64xf32, #tpu.memory_space<vmem>>, %arg15: memref<1x64xf32, #tpu.memory_space<vmem>>, %arg16: memref<1x64xf32, #tpu.memory_space<vmem>>, %arg17: memref<64x64xf32, #tpu.memory_space<vmem>>, %arg18: memref<1x64xf32, #tpu.memory_space<vmem>>, %arg19: memref<64x64xf32, #tpu.memory_space<vmem>>, %arg20: memref<1x64xf32, #tpu.memory_space<vmem>>, %arg21: memref<64x64xf32, #tpu.memory_space<vmem>>, %arg22: memref<1x64xf32, #tpu.memory_space<vmem>>, %arg23: memref<1x64xf32, #tpu.memory_space<vmem>>, %arg24: memref<1x64xf32, #tpu.memory_space<vmem>>, %arg25: memref<64x6xf32, #tpu.memory_space<vmem>>, %arg26: memref<1x6xf32, #tpu.memory_space<vmem>>, %arg27: memref<64x32xf32, #tpu.memory_space<vmem>>, %arg28: memref<1x32xf32, #tpu.memory_space<vmem>>, %arg29: memref<64x32xf32, #tpu.memory_space<vmem>>, %arg30: memref<1x32xf32, #tpu.memory_space<vmem>>, %arg31: memref<32x32xf32, #tpu.memory_space<vmem>>, %arg32: memref<1x32xf32, #tpu.memory_space<vmem>>, %arg33: memref<32x32xf32, #tpu.memory_space<vmem>>, %arg34: memref<1x32xf32, #tpu.memory_space<vmem>>, %arg35: memref<32x32xf32, #tpu.memory_space<vmem>>, %arg36: memref<1x32xf32, #tpu.memory_space<vmem>>, %arg37: memref<32x32xf32, #tpu.memory_space<vmem>>, %arg38: memref<1x32xf32, #tpu.memory_space<vmem>>, %arg39: memref<32x14xf32, #tpu.memory_space<vmem>>, %arg40: memref<1x14xf32, #tpu.memory_space<vmem>>, %arg41: memref<8x128xf32, #tpu.memory_space<vmem>>) attributes {dimension_semantics = [#tpu.dimension_semantics<parallel>], iteration_bounds = array<i64: 1>, scalar_prefetch = 0 : i64, scratch_operands = 0 : i64, tpu.core_type = #tpu.core_type<tc>, window_params = [{pipeline_mode = #tpu.pipeline_mode<synchronous>, transform_indices = @transform_0, window_bounds = array<i64: 8, 64>}, {transform_indices = @transform_1, window_bounds = array<i64: 8, 64>}, {transform_indices = @transform_2, window_bounds = array<i64: 8, 8, 32>}, {transform_indices = @transform_3, window_bounds = array<i64: 4, 8, 8>}, {pipeline_mode = #tpu.pipeline_mode<synchronous>, transform_indices = @transform_4, window_bounds = array<i64: 8, 9>}, {pipeline_mode = #tpu.pipeline_mode<synchronous>, transform_indices = @transform_5, window_bounds = array<i64: 8, 3>}, {pipeline_mode = #tpu.pipeline_mode<synchronous>, transform_indices = @transform_6, window_bounds = array<i64: 64, 80>}, {pipeline_mode = #tpu.pipeline_mode<synchronous>, transform_indices = @transform_7, window_bounds = array<i64: 1, 80>}, {pipeline_mode = #tpu.pipeline_mode<synchronous>, transform_indices = @transform_8, window_bounds = array<i64: 64, 208>}, {pipeline_mode = #tpu.pipeline_mode<synchronous>, transform_indices = @transform_9, window_bounds = array<i64: 1, 208>}, {pipeline_mode = #tpu.pipeline_mode<synchronous>, transform_indices = @transform_10, window_bounds = array<i64: 1, 16>}, {pipeline_mode = #tpu.pipeline_mode<synchronous>, transform_indices = @transform_11, window_bounds = array<i64: 1, 4>}, {pipeline_mode = #tpu.pipeline_mode<synchronous>, transform_indices = @transform_12, window_bounds = array<i64: 288, 64>}, {pipeline_mode = #tpu.pipeline_mode<synchronous>, transform_indices = @transform_13, window_bounds = array<i64: 1, 64>}, {pipeline_mode = #tpu.pipeline_mode<synchronous>, transform_indices = @transform_14, window_bounds = array<i64: 1, 64>}, {pipeline_mode = #tpu.pipeline_mode<synchronous>, transform_indices = @transform_15, window_bounds = array<i64: 1, 64>}, {pipeline_mode = #tpu.pipeline_mode<synchronous>, transform_indices = @transform_16, window_bounds = array<i64: 64, 64>}, {pipeline_mode = #tpu.pipeline_mode<synchronous>, transform_indices = @transform_17, window_bounds = array<i64: 1, 64>}, {pipeline_mode = #tpu.pipeline_mode<synchronous>, transform_indices = @transform_18, window_bounds = array<i64: 64, 64>}, {pipeline_mode = #tpu.pipeline_mode<synchronous>, transform_indices = @transform_19, window_bounds = array<i64: 1, 64>}, {pipeline_mode = #tpu.pipeline_mode<synchronous>, transform_indices = @transform_20, window_bounds = array<i64: 64, 64>}, {pipeline_mode = #tpu.pipeline_mode<synchronous>, transform_indices = @transform_21, window_bounds = array<i64: 1, 64>}, {pipeline_mode = #tpu.pipeline_mode<synchronous>, transform_indices = @transform_22, window_bounds = array<i64: 1, 64>}, {pipeline_mode = #tpu.pipeline_mode<synchronous>, transform_indices = @transform_23, window_bounds = array<i64: 1, 64>}, {pipeline_mode = #tpu.pipeline_mode<synchronous>, transform_indices = @transform_24, window_bounds = array<i64: 64, 6>}, {pipeline_mode = #tpu.pipeline_mode<synchronous>, transform_indices = @transform_25, window_bounds = array<i64: 1, 6>}, {pipeline_mode = #tpu.pipeline_mode<synchronous>, transform_indices = @transform_26, window_bounds = array<i64: 64, 32>}, {pipeline_mode = #tpu.pipeline_mode<synchronous>, transform_indices = @transform_27, window_bounds = array<i64: 1, 32>}, {pipeline_mode = #tpu.pipeline_mode<synchronous>, transform_indices = @transform_28, window_bounds = array<i64: 64, 32>}, {pipeline_mode = #tpu.pipeline_mode<synchronous>, transform_indices = @transform_29, window_bounds = array<i64: 1, 32>}, {pipeline_mode = #tpu.pipeline_mode<synchronous>, transform_indices = @transform_30, window_bounds = array<i64: 32, 32>}, {pipeline_mode = #tpu.pipeline_mode<synchronous>, transform_indices = @transform_31, window_bounds = array<i64: 1, 32>}, {pipeline_mode = #tpu.pipeline_mode<synchronous>, transform_indices = @transform_32, window_bounds = array<i64: 32, 32>}, {pipeline_mode = #tpu.pipeline_mode<synchronous>, transform_indices = @transform_33, window_bounds = array<i64: 1, 32>}, {pipeline_mode = #tpu.pipeline_mode<synchronous>, transform_indices = @transform_34, window_bounds = array<i64: 32, 32>}, {pipeline_mode = #tpu.pipeline_mode<synchronous>, transform_indices = @transform_35, window_bounds = array<i64: 1, 32>}, {pipeline_mode = #tpu.pipeline_mode<synchronous>, transform_indices = @transform_36, window_bounds = array<i64: 32, 32>}, {pipeline_mode = #tpu.pipeline_mode<synchronous>, transform_indices = @transform_37, window_bounds = array<i64: 1, 32>}, {pipeline_mode = #tpu.pipeline_mode<synchronous>, transform_indices = @transform_38, window_bounds = array<i64: 32, 14>}, {pipeline_mode = #tpu.pipeline_mode<synchronous>, transform_indices = @transform_39, window_bounds = array<i64: 1, 14>}, {transform_indices = @transform_40, window_bounds = array<i64: 8, 128>}]} {
    %c8_i32 = arith.constant 8 : i32
    %0 = arith.muli %arg0, %c8_i32 : i32
    %1 = tpu.assume_multiple %0, 8 : i32
    %c0 = arith.constant 0 : index
    %c0_0 = arith.constant 0 : index
    %2 = vector.load %arg1[%c0, %c0_0] : memref<8x64xf32, #tpu.memory_space<vmem>>, vector<8x64xf32>
    %3 = arith.index_cast %1 : i32 to index
    %c0_1 = arith.constant 0 : index
    %4 = vector.load %arg1[%3, %c0_1] : memref<8x64xf32, #tpu.memory_space<vmem>>, vector<8x64xf32>
    %c0_2 = arith.constant 0 : index
    %c0_3 = arith.constant 0 : index
    %5 = vector.load %arg5[%c0_2, %c0_3] : memref<8x9xf32, #tpu.memory_space<vmem>>, vector<8x9xf32>
    %c0_4 = arith.constant 0 : index
    %c0_5 = arith.constant 0 : index
    %6 = vector.load %arg6[%c0_4, %c0_5] : memref<8x3xf32, #tpu.memory_space<vmem>>, vector<8x3xf32>
    %7 = arith.index_cast %1 : i32 to index
    %c0_6 = arith.constant 0 : index
    %8 = vector.load %arg5[%7, %c0_6] : memref<8x9xf32, #tpu.memory_space<vmem>>, vector<8x9xf32>
    %9 = arith.index_cast %1 : i32 to index
    %c0_7 = arith.constant 0 : index
    %10 = vector.load %arg6[%9, %c0_7] : memref<8x3xf32, #tpu.memory_space<vmem>>, vector<8x3xf32>
    %11 = vector.extract_strided_slice %5 {offsets = [0, 0], sizes = [8, 1], strides = [1, 1]} : vector<8x9xf32> to vector<8x1xf32>
    %12 = vector.extract_strided_slice %5 {offsets = [0, 1], sizes = [8, 1], strides = [1, 1]} : vector<8x9xf32> to vector<8x1xf32>
    %13 = vector.extract_strided_slice %5 {offsets = [0, 2], sizes = [8, 1], strides = [1, 1]} : vector<8x9xf32> to vector<8x1xf32>
    %14 = vector.extract_strided_slice %5 {offsets = [0, 3], sizes = [8, 1], strides = [1, 1]} : vector<8x9xf32> to vector<8x1xf32>
    %15 = vector.extract_strided_slice %5 {offsets = [0, 4], sizes = [8, 1], strides = [1, 1]} : vector<8x9xf32> to vector<8x1xf32>
    %16 = vector.extract_strided_slice %5 {offsets = [0, 5], sizes = [8, 1], strides = [1, 1]} : vector<8x9xf32> to vector<8x1xf32>
    %17 = vector.extract_strided_slice %5 {offsets = [0, 6], sizes = [8, 1], strides = [1, 1]} : vector<8x9xf32> to vector<8x1xf32>
    %18 = vector.extract_strided_slice %5 {offsets = [0, 7], sizes = [8, 1], strides = [1, 1]} : vector<8x9xf32> to vector<8x1xf32>
    %19 = vector.extract_strided_slice %5 {offsets = [0, 8], sizes = [8, 1], strides = [1, 1]} : vector<8x9xf32> to vector<8x1xf32>
    %20 = vector.extract_strided_slice %6 {offsets = [0, 0], sizes = [8, 1], strides = [1, 1]} : vector<8x3xf32> to vector<8x1xf32>
    %21 = vector.extract_strided_slice %6 {offsets = [0, 1], sizes = [8, 1], strides = [1, 1]} : vector<8x3xf32> to vector<8x1xf32>
    %22 = vector.extract_strided_slice %6 {offsets = [0, 2], sizes = [8, 1], strides = [1, 1]} : vector<8x3xf32> to vector<8x1xf32>
    %23 = vector.extract_strided_slice %8 {offsets = [0, 0], sizes = [8, 1], strides = [1, 1]} : vector<8x9xf32> to vector<8x1xf32>
    %24 = vector.extract_strided_slice %8 {offsets = [0, 1], sizes = [8, 1], strides = [1, 1]} : vector<8x9xf32> to vector<8x1xf32>
    %25 = vector.extract_strided_slice %8 {offsets = [0, 2], sizes = [8, 1], strides = [1, 1]} : vector<8x9xf32> to vector<8x1xf32>
    %26 = vector.extract_strided_slice %8 {offsets = [0, 3], sizes = [8, 1], strides = [1, 1]} : vector<8x9xf32> to vector<8x1xf32>
    %27 = vector.extract_strided_slice %8 {offsets = [0, 4], sizes = [8, 1], strides = [1, 1]} : vector<8x9xf32> to vector<8x1xf32>
    %28 = vector.extract_strided_slice %8 {offsets = [0, 5], sizes = [8, 1], strides = [1, 1]} : vector<8x9xf32> to vector<8x1xf32>
    %29 = vector.extract_strided_slice %8 {offsets = [0, 6], sizes = [8, 1], strides = [1, 1]} : vector<8x9xf32> to vector<8x1xf32>
    %30 = vector.extract_strided_slice %8 {offsets = [0, 7], sizes = [8, 1], strides = [1, 1]} : vector<8x9xf32> to vector<8x1xf32>
    %31 = vector.extract_strided_slice %8 {offsets = [0, 8], sizes = [8, 1], strides = [1, 1]} : vector<8x9xf32> to vector<8x1xf32>
    %32 = vector.extract_strided_slice %10 {offsets = [0, 0], sizes = [8, 1], strides = [1, 1]} : vector<8x3xf32> to vector<8x1xf32>
    %33 = vector.extract_strided_slice %10 {offsets = [0, 1], sizes = [8, 1], strides = [1, 1]} : vector<8x3xf32> to vector<8x1xf32>
    %34 = vector.extract_strided_slice %10 {offsets = [0, 2], sizes = [8, 1], strides = [1, 1]} : vector<8x3xf32> to vector<8x1xf32>
    %c0_8 = arith.constant 0 : index
    %c0_9 = arith.constant 0 : index
    %35 = vector.load %arg7[%c0_8, %c0_9] : memref<64x80xf32, #tpu.memory_space<vmem>>, vector<64x80xf32>
    %c0_10 = arith.constant 0 : index
    %c0_11 = arith.constant 0 : index
    %36 = vector.load %arg8[%c0_10, %c0_11] : memref<1x80xf32, #tpu.memory_space<vmem>>, vector<1x80xf32>
    %c0_12 = arith.constant 0 : index
    %c0_13 = arith.constant 0 : index
    %37 = vector.load %arg9[%c0_12, %c0_13] : memref<64x208xf32, #tpu.memory_space<vmem>>, vector<64x208xf32>
    %c0_14 = arith.constant 0 : index
    %c0_15 = arith.constant 0 : index
    %38 = vector.load %arg10[%c0_14, %c0_15] : memref<1x208xf32, #tpu.memory_space<vmem>>, vector<1x208xf32>
    %c0_16 = arith.constant 0 : index
    %c0_17 = arith.constant 0 : index
    %39 = vector.load %arg11[%c0_16, %c0_17] : memref<1x16xf32, #tpu.memory_space<vmem>>, vector<1x16xf32>
    %c0_18 = arith.constant 0 : index
    %c0_19 = arith.constant 0 : index
    %40 = vector.load %arg12[%c0_18, %c0_19] : memref<1x4xf32, #tpu.memory_space<vmem>>, vector<1x4xf32>
    %cst = arith.constant dense<0.000000e+00> : vector<8x80xf32>
    %41 = tpu.matmul %4, %35, %cst {dimension_numbers = #tpu.dot_dimension_numbers<[1], [0], [0], [1], [0, 0, 1, 1], [], []>} : vector<8x64xf32>, vector<64x80xf32>, vector<8x80xf32> -> vector<8x80xf32>
    %42 = vector.broadcast %36 : vector<1x80xf32> to vector<8x80xf32>
    %43 = arith.addf %41, %42 : vector<8x80xf32>
    %cst_20 = arith.constant dense<0.000000e+00> : vector<8x208xf32>
    %44 = tpu.matmul %2, %37, %cst_20 {dimension_numbers = #tpu.dot_dimension_numbers<[1], [0], [0], [1], [0, 0, 1, 1], [], []>} : vector<8x64xf32>, vector<64x208xf32>, vector<8x208xf32> -> vector<8x208xf32>
    %45 = vector.broadcast %38 : vector<1x208xf32> to vector<8x208xf32>
    %46 = arith.addf %44, %45 : vector<8x208xf32>
    %47 = vector.extract_strided_slice %43 {offsets = [0, 32], sizes = [8, 16], strides = [1, 1]} : vector<8x80xf32> to vector<8x16xf32>
    %48 = vector.extract_strided_slice %43 {offsets = [0, 48], sizes = [8, 16], strides = [1, 1]} : vector<8x80xf32> to vector<8x16xf32>
    %49 = vector.extract_strided_slice %43 {offsets = [0, 64], sizes = [8, 16], strides = [1, 1]} : vector<8x80xf32> to vector<8x16xf32>
    %50 = vector.broadcast %23 : vector<8x1xf32> to vector<8x16xf32>
    %51 = arith.mulf %50, %47 : vector<8x16xf32>
    %52 = vector.broadcast %24 : vector<8x1xf32> to vector<8x16xf32>
    %53 = arith.mulf %52, %48 : vector<8x16xf32>
    %54 = arith.addf %51, %53 : vector<8x16xf32>
    %55 = vector.broadcast %25 : vector<8x1xf32> to vector<8x16xf32>
    %56 = arith.mulf %55, %49 : vector<8x16xf32>
    %57 = arith.addf %54, %56 : vector<8x16xf32>
    %58 = vector.broadcast %32 : vector<8x1xf32> to vector<8x16xf32>
    %59 = arith.addf %57, %58 : vector<8x16xf32>
    %60 = vector.broadcast %26 : vector<8x1xf32> to vector<8x16xf32>
    %61 = arith.mulf %60, %47 : vector<8x16xf32>
    %62 = vector.broadcast %27 : vector<8x1xf32> to vector<8x16xf32>
    %63 = arith.mulf %62, %48 : vector<8x16xf32>
    %64 = arith.addf %61, %63 : vector<8x16xf32>
    %65 = vector.broadcast %28 : vector<8x1xf32> to vector<8x16xf32>
    %66 = arith.mulf %65, %49 : vector<8x16xf32>
    %67 = arith.addf %64, %66 : vector<8x16xf32>
    %68 = vector.broadcast %33 : vector<8x1xf32> to vector<8x16xf32>
    %69 = arith.addf %67, %68 : vector<8x16xf32>
    %70 = vector.broadcast %29 : vector<8x1xf32> to vector<8x16xf32>
    %71 = arith.mulf %70, %47 : vector<8x16xf32>
    %72 = vector.broadcast %30 : vector<8x1xf32> to vector<8x16xf32>
    %73 = arith.mulf %72, %48 : vector<8x16xf32>
    %74 = arith.addf %71, %73 : vector<8x16xf32>
    %75 = vector.broadcast %31 : vector<8x1xf32> to vector<8x16xf32>
    %76 = arith.mulf %75, %49 : vector<8x16xf32>
    %77 = arith.addf %74, %76 : vector<8x16xf32>
    %78 = vector.broadcast %34 : vector<8x1xf32> to vector<8x16xf32>
    %79 = arith.addf %77, %78 : vector<8x16xf32>
    %80 = vector.extract_strided_slice %46 {offsets = [0, 64], sizes = [8, 48], strides = [1, 1]} : vector<8x208xf32> to vector<8x48xf32>
    %81 = vector.extract_strided_slice %46 {offsets = [0, 112], sizes = [8, 48], strides = [1, 1]} : vector<8x208xf32> to vector<8x48xf32>
    %82 = vector.extract_strided_slice %46 {offsets = [0, 160], sizes = [8, 48], strides = [1, 1]} : vector<8x208xf32> to vector<8x48xf32>
    %83 = vector.broadcast %11 : vector<8x1xf32> to vector<8x48xf32>
    %84 = arith.mulf %83, %80 : vector<8x48xf32>
    %85 = vector.broadcast %12 : vector<8x1xf32> to vector<8x48xf32>
    %86 = arith.mulf %85, %81 : vector<8x48xf32>
    %87 = arith.addf %84, %86 : vector<8x48xf32>
    %88 = vector.broadcast %13 : vector<8x1xf32> to vector<8x48xf32>
    %89 = arith.mulf %88, %82 : vector<8x48xf32>
    %90 = arith.addf %87, %89 : vector<8x48xf32>
    %91 = vector.broadcast %20 : vector<8x1xf32> to vector<8x48xf32>
    %92 = arith.addf %90, %91 : vector<8x48xf32>
    %93 = vector.broadcast %14 : vector<8x1xf32> to vector<8x48xf32>
    %94 = arith.mulf %93, %80 : vector<8x48xf32>
    %95 = vector.broadcast %15 : vector<8x1xf32> to vector<8x48xf32>
    %96 = arith.mulf %95, %81 : vector<8x48xf32>
    %97 = arith.addf %94, %96 : vector<8x48xf32>
    %98 = vector.broadcast %16 : vector<8x1xf32> to vector<8x48xf32>
    %99 = arith.mulf %98, %82 : vector<8x48xf32>
    %100 = arith.addf %97, %99 : vector<8x48xf32>
    %101 = vector.broadcast %21 : vector<8x1xf32> to vector<8x48xf32>
    %102 = arith.addf %100, %101 : vector<8x48xf32>
    %103 = vector.broadcast %17 : vector<8x1xf32> to vector<8x48xf32>
    %104 = arith.mulf %103, %80 : vector<8x48xf32>
    %105 = vector.broadcast %18 : vector<8x1xf32> to vector<8x48xf32>
    %106 = arith.mulf %105, %81 : vector<8x48xf32>
    %107 = arith.addf %104, %106 : vector<8x48xf32>
    %108 = vector.broadcast %19 : vector<8x1xf32> to vector<8x48xf32>
    %109 = arith.mulf %108, %82 : vector<8x48xf32>
    %110 = arith.addf %107, %109 : vector<8x48xf32>
    %111 = vector.broadcast %22 : vector<8x1xf32> to vector<8x48xf32>
    %112 = arith.addf %110, %111 : vector<8x48xf32>
    %113 = vector.broadcast %39 : vector<1x16xf32> to vector<8x16xf32>
    %114 = arith.mulf %59, %113 : vector<8x16xf32>
    %115 = vector.broadcast %39 : vector<1x16xf32> to vector<8x16xf32>
    %116 = arith.mulf %69, %115 : vector<8x16xf32>
    %117 = vector.broadcast %39 : vector<1x16xf32> to vector<8x16xf32>
    %118 = arith.mulf %79, %117 : vector<8x16xf32>
    %cst_21 = arith.constant 1.000000e+00 : f32
    %119 = vector.broadcast %cst_21 : f32 to vector<8x1xf32>
    %120 = vector.extract_strided_slice %43 {offsets = [0, 0], sizes = [8, 8], strides = [1, 1]} : vector<8x80xf32> to vector<8x8xf32>
    %121 = vector.extract_strided_slice %46 {offsets = [0, 0], sizes = [8, 8], strides = [1, 1]} : vector<8x208xf32> to vector<8x8xf32>
    %122 = vector.extract_strided_slice %46 {offsets = [0, 8], sizes = [8, 8], strides = [1, 1]} : vector<8x208xf32> to vector<8x8xf32>
    %123 = vector.extract_strided_slice %92 {offsets = [0, 0], sizes = [8, 4], strides = [1, 1]} : vector<8x48xf32> to vector<8x4xf32>
    %124 = vector.extract_strided_slice %102 {offsets = [0, 0], sizes = [8, 4], strides = [1, 1]} : vector<8x48xf32> to vector<8x4xf32>
    %125 = vector.extract_strided_slice %112 {offsets = [0, 0], sizes = [8, 4], strides = [1, 1]} : vector<8x48xf32> to vector<8x4xf32>
    %126 = arith.mulf %123, %123 : vector<8x4xf32>
    %127 = arith.mulf %124, %124 : vector<8x4xf32>
    %128 = arith.addf %126, %127 : vector<8x4xf32>
    %129 = arith.mulf %125, %125 : vector<8x4xf32>
    %130 = arith.addf %128, %129 : vector<8x4xf32>
    %cst_22 = arith.constant dense<0.000000e+00> : vector<8xf32>
    %131 = vector.multi_reduction <add>, %130, %cst_22 [1] : vector<8x4xf32> to vector<8xf32>
    %132 = vector.shape_cast %131 : vector<8xf32> to vector<8x1xf32>
    %133 = vector.extract_strided_slice %114 {offsets = [0, 0], sizes = [8, 4], strides = [1, 1]} : vector<8x16xf32> to vector<8x4xf32>
    %134 = vector.extract_strided_slice %116 {offsets = [0, 0], sizes = [8, 4], strides = [1, 1]} : vector<8x16xf32> to vector<8x4xf32>
    %135 = vector.extract_strided_slice %118 {offsets = [0, 0], sizes = [8, 4], strides = [1, 1]} : vector<8x16xf32> to vector<8x4xf32>
    %136 = tpu.concatenate %120, %133, %134, %135, %119 in 1 : vector<8x8xf32>, vector<8x4xf32>, vector<8x4xf32>, vector<8x4xf32>, vector<8x1xf32> -> vector<8x21xf32>
    %137 = vector.extract_strided_slice %40 {offsets = [0, 0], sizes = [1, 1], strides = [1, 1]} : vector<1x4xf32> to vector<1x1xf32>
    %138 = vector.broadcast %137 : vector<1x1xf32> to vector<8x1xf32>
    %139 = arith.mulf %132, %138 : vector<8x1xf32>
    %140 = tpu.concatenate %121, %123, %124, %125, %139 in 1 : vector<8x8xf32>, vector<8x4xf32>, vector<8x4xf32>, vector<8x4xf32>, vector<8x1xf32> -> vector<8x21xf32>
    %cst_23 = arith.constant dense<0.000000e+00> : vector<8x8xf32>
    %141 = tpu.matmul %136, %140, %cst_23 {dimension_numbers = #tpu.dot_dimension_numbers<[1], [1], [0], [0], [0, 0, 1, 0], [], []>} : vector<8x21xf32>, vector<8x21xf32>, vector<8x8xf32> -> vector<8x8xf32>
    %c0_24 = arith.constant 0 : index
    %c0_25 = arith.constant 0 : index
    %c0_26 = arith.constant 0 : index
    %142 = vector.load %arg4[%c0_24, %c0_25, %c0_26] : memref<4x8x8xf32, #tpu.memory_space<vmem>>, vector<1x8x8xf32>
    %143 = vector.shape_cast %142 : vector<1x8x8xf32> to vector<8x8xf32>
    %144 = arith.addf %141, %143 : vector<8x8xf32>
    %cst_27 = arith.constant dense<0xFF800000> : vector<8xf32>
    %145 = vector.multi_reduction <maximumf>, %144, %cst_27 [1] : vector<8x8xf32> to vector<8xf32>
    %146 = vector.shape_cast %145 : vector<8xf32> to vector<8x1xf32>
    %147 = vector.broadcast %146 : vector<8x1xf32> to vector<8x8xf32>
    %148 = arith.subf %144, %147 : vector<8x8xf32>
    %149 = math.exp %148 : vector<8x8xf32>
    %cst_28 = arith.constant dense<0.000000e+00> : vector<8xf32>
    %150 = vector.multi_reduction <add>, %149, %cst_28 [1] : vector<8x8xf32> to vector<8xf32>
    %151 = vector.shape_cast %150 : vector<8xf32> to vector<8x1xf32>
    %152 = tpu.reciprocal %151 {approx = true} : vector<8x1xf32> -> vector<8x1xf32>
    %153 = vector.broadcast %152 : vector<8x1xf32> to vector<8x8xf32>
    %154 = arith.mulf %149, %153 : vector<8x8xf32>
    %155 = vector.extract_strided_slice %92 {offsets = [0, 4], sizes = [8, 8], strides = [1, 1]} : vector<8x48xf32> to vector<8x8xf32>
    %156 = vector.extract_strided_slice %102 {offsets = [0, 4], sizes = [8, 8], strides = [1, 1]} : vector<8x48xf32> to vector<8x8xf32>
    %157 = vector.extract_strided_slice %112 {offsets = [0, 4], sizes = [8, 8], strides = [1, 1]} : vector<8x48xf32> to vector<8x8xf32>
    %158 = tpu.concatenate %122, %155, %156, %157 in 1 : vector<8x8xf32>, vector<8x8xf32>, vector<8x8xf32>, vector<8x8xf32> -> vector<8x32xf32>
    %cst_29 = arith.constant dense<0.000000e+00> : vector<8x32xf32>
    %159 = tpu.matmul %154, %158, %cst_29 {dimension_numbers = #tpu.dot_dimension_numbers<[1], [0], [0], [1], [0, 0, 1, 1], [], []>} : vector<8x8xf32>, vector<8x32xf32>, vector<8x32xf32> -> vector<8x32xf32>
    %160 = vector.extract_strided_slice %159 {offsets = [0, 0], sizes = [8, 8], strides = [1, 1]} : vector<8x32xf32> to vector<8x8xf32>
    %161 = vector.extract_strided_slice %159 {offsets = [0, 8], sizes = [8, 8], strides = [1, 1]} : vector<8x32xf32> to vector<8x8xf32>
    %162 = vector.extract_strided_slice %159 {offsets = [0, 16], sizes = [8, 8], strides = [1, 1]} : vector<8x32xf32> to vector<8x8xf32>
    %163 = vector.extract_strided_slice %159 {offsets = [0, 24], sizes = [8, 8], strides = [1, 1]} : vector<8x32xf32> to vector<8x8xf32>
    %164 = vector.extract_strided_slice %43 {offsets = [0, 8], sizes = [8, 8], strides = [1, 1]} : vector<8x80xf32> to vector<8x8xf32>
    %165 = vector.extract_strided_slice %46 {offsets = [0, 16], sizes = [8, 8], strides = [1, 1]} : vector<8x208xf32> to vector<8x8xf32>
    %166 = vector.extract_strided_slice %46 {offsets = [0, 24], sizes = [8, 8], strides = [1, 1]} : vector<8x208xf32> to vector<8x8xf32>
    %167 = vector.extract_strided_slice %92 {offsets = [0, 12], sizes = [8, 4], strides = [1, 1]} : vector<8x48xf32> to vector<8x4xf32>
    %168 = vector.extract_strided_slice %102 {offsets = [0, 12], sizes = [8, 4], strides = [1, 1]} : vector<8x48xf32> to vector<8x4xf32>
    %169 = vector.extract_strided_slice %112 {offsets = [0, 12], sizes = [8, 4], strides = [1, 1]} : vector<8x48xf32> to vector<8x4xf32>
    %170 = arith.mulf %167, %167 : vector<8x4xf32>
    %171 = arith.mulf %168, %168 : vector<8x4xf32>
    %172 = arith.addf %170, %171 : vector<8x4xf32>
    %173 = arith.mulf %169, %169 : vector<8x4xf32>
    %174 = arith.addf %172, %173 : vector<8x4xf32>
    %cst_30 = arith.constant dense<0.000000e+00> : vector<8xf32>
    %175 = vector.multi_reduction <add>, %174, %cst_30 [1] : vector<8x4xf32> to vector<8xf32>
    %176 = vector.shape_cast %175 : vector<8xf32> to vector<8x1xf32>
    %177 = vector.extract_strided_slice %114 {offsets = [0, 4], sizes = [8, 4], strides = [1, 1]} : vector<8x16xf32> to vector<8x4xf32>
    %178 = vector.extract_strided_slice %116 {offsets = [0, 4], sizes = [8, 4], strides = [1, 1]} : vector<8x16xf32> to vector<8x4xf32>
    %179 = vector.extract_strided_slice %118 {offsets = [0, 4], sizes = [8, 4], strides = [1, 1]} : vector<8x16xf32> to vector<8x4xf32>
    %180 = tpu.concatenate %164, %177, %178, %179, %119 in 1 : vector<8x8xf32>, vector<8x4xf32>, vector<8x4xf32>, vector<8x4xf32>, vector<8x1xf32> -> vector<8x21xf32>
    %181 = vector.extract_strided_slice %40 {offsets = [0, 1], sizes = [1, 1], strides = [1, 1]} : vector<1x4xf32> to vector<1x1xf32>
    %182 = vector.broadcast %181 : vector<1x1xf32> to vector<8x1xf32>
    %183 = arith.mulf %176, %182 : vector<8x1xf32>
    %184 = tpu.concatenate %165, %167, %168, %169, %183 in 1 : vector<8x8xf32>, vector<8x4xf32>, vector<8x4xf32>, vector<8x4xf32>, vector<8x1xf32> -> vector<8x21xf32>
    %cst_31 = arith.constant dense<0.000000e+00> : vector<8x8xf32>
    %185 = tpu.matmul %180, %184, %cst_31 {dimension_numbers = #tpu.dot_dimension_numbers<[1], [1], [0], [0], [0, 0, 1, 0], [], []>} : vector<8x21xf32>, vector<8x21xf32>, vector<8x8xf32> -> vector<8x8xf32>
    %c1 = arith.constant 1 : index
    %c0_32 = arith.constant 0 : index
    %c0_33 = arith.constant 0 : index
    %186 = vector.load %arg4[%c1, %c0_32, %c0_33] : memref<4x8x8xf32, #tpu.memory_space<vmem>>, vector<1x8x8xf32>
    %187 = vector.shape_cast %186 : vector<1x8x8xf32> to vector<8x8xf32>
    %188 = arith.addf %185, %187 : vector<8x8xf32>
    %cst_34 = arith.constant dense<0xFF800000> : vector<8xf32>
    %189 = vector.multi_reduction <maximumf>, %188, %cst_34 [1] : vector<8x8xf32> to vector<8xf32>
    %190 = vector.shape_cast %189 : vector<8xf32> to vector<8x1xf32>
    %191 = vector.broadcast %190 : vector<8x1xf32> to vector<8x8xf32>
    %192 = arith.subf %188, %191 : vector<8x8xf32>
    %193 = math.exp %192 : vector<8x8xf32>
    %cst_35 = arith.constant dense<0.000000e+00> : vector<8xf32>
    %194 = vector.multi_reduction <add>, %193, %cst_35 [1] : vector<8x8xf32> to vector<8xf32>
    %195 = vector.shape_cast %194 : vector<8xf32> to vector<8x1xf32>
    %196 = tpu.reciprocal %195 {approx = true} : vector<8x1xf32> -> vector<8x1xf32>
    %197 = vector.broadcast %196 : vector<8x1xf32> to vector<8x8xf32>
    %198 = arith.mulf %193, %197 : vector<8x8xf32>
    %199 = vector.extract_strided_slice %92 {offsets = [0, 16], sizes = [8, 8], strides = [1, 1]} : vector<8x48xf32> to vector<8x8xf32>
    %200 = vector.extract_strided_slice %102 {offsets = [0, 16], sizes = [8, 8], strides = [1, 1]} : vector<8x48xf32> to vector<8x8xf32>
    %201 = vector.extract_strided_slice %112 {offsets = [0, 16], sizes = [8, 8], strides = [1, 1]} : vector<8x48xf32> to vector<8x8xf32>
    %202 = tpu.concatenate %166, %199, %200, %201 in 1 : vector<8x8xf32>, vector<8x8xf32>, vector<8x8xf32>, vector<8x8xf32> -> vector<8x32xf32>
    %cst_36 = arith.constant dense<0.000000e+00> : vector<8x32xf32>
    %203 = tpu.matmul %198, %202, %cst_36 {dimension_numbers = #tpu.dot_dimension_numbers<[1], [0], [0], [1], [0, 0, 1, 1], [], []>} : vector<8x8xf32>, vector<8x32xf32>, vector<8x32xf32> -> vector<8x32xf32>
    %204 = vector.extract_strided_slice %203 {offsets = [0, 0], sizes = [8, 8], strides = [1, 1]} : vector<8x32xf32> to vector<8x8xf32>
    %205 = vector.extract_strided_slice %203 {offsets = [0, 8], sizes = [8, 8], strides = [1, 1]} : vector<8x32xf32> to vector<8x8xf32>
    %206 = vector.extract_strided_slice %203 {offsets = [0, 16], sizes = [8, 8], strides = [1, 1]} : vector<8x32xf32> to vector<8x8xf32>
    %207 = vector.extract_strided_slice %203 {offsets = [0, 24], sizes = [8, 8], strides = [1, 1]} : vector<8x32xf32> to vector<8x8xf32>
    %208 = vector.extract_strided_slice %43 {offsets = [0, 16], sizes = [8, 8], strides = [1, 1]} : vector<8x80xf32> to vector<8x8xf32>
    %209 = vector.extract_strided_slice %46 {offsets = [0, 32], sizes = [8, 8], strides = [1, 1]} : vector<8x208xf32> to vector<8x8xf32>
    %210 = vector.extract_strided_slice %46 {offsets = [0, 40], sizes = [8, 8], strides = [1, 1]} : vector<8x208xf32> to vector<8x8xf32>
    %211 = vector.extract_strided_slice %92 {offsets = [0, 24], sizes = [8, 4], strides = [1, 1]} : vector<8x48xf32> to vector<8x4xf32>
    %212 = vector.extract_strided_slice %102 {offsets = [0, 24], sizes = [8, 4], strides = [1, 1]} : vector<8x48xf32> to vector<8x4xf32>
    %213 = vector.extract_strided_slice %112 {offsets = [0, 24], sizes = [8, 4], strides = [1, 1]} : vector<8x48xf32> to vector<8x4xf32>
    %214 = arith.mulf %211, %211 : vector<8x4xf32>
    %215 = arith.mulf %212, %212 : vector<8x4xf32>
    %216 = arith.addf %214, %215 : vector<8x4xf32>
    %217 = arith.mulf %213, %213 : vector<8x4xf32>
    %218 = arith.addf %216, %217 : vector<8x4xf32>
    %cst_37 = arith.constant dense<0.000000e+00> : vector<8xf32>
    %219 = vector.multi_reduction <add>, %218, %cst_37 [1] : vector<8x4xf32> to vector<8xf32>
    %220 = vector.shape_cast %219 : vector<8xf32> to vector<8x1xf32>
    %221 = vector.extract_strided_slice %114 {offsets = [0, 8], sizes = [8, 4], strides = [1, 1]} : vector<8x16xf32> to vector<8x4xf32>
    %222 = vector.extract_strided_slice %116 {offsets = [0, 8], sizes = [8, 4], strides = [1, 1]} : vector<8x16xf32> to vector<8x4xf32>
    %223 = vector.extract_strided_slice %118 {offsets = [0, 8], sizes = [8, 4], strides = [1, 1]} : vector<8x16xf32> to vector<8x4xf32>
    %224 = tpu.concatenate %208, %221, %222, %223, %119 in 1 : vector<8x8xf32>, vector<8x4xf32>, vector<8x4xf32>, vector<8x4xf32>, vector<8x1xf32> -> vector<8x21xf32>
    %225 = vector.extract_strided_slice %40 {offsets = [0, 2], sizes = [1, 1], strides = [1, 1]} : vector<1x4xf32> to vector<1x1xf32>
    %226 = vector.broadcast %225 : vector<1x1xf32> to vector<8x1xf32>
    %227 = arith.mulf %220, %226 : vector<8x1xf32>
    %228 = tpu.concatenate %209, %211, %212, %213, %227 in 1 : vector<8x8xf32>, vector<8x4xf32>, vector<8x4xf32>, vector<8x4xf32>, vector<8x1xf32> -> vector<8x21xf32>
    %cst_38 = arith.constant dense<0.000000e+00> : vector<8x8xf32>
    %229 = tpu.matmul %224, %228, %cst_38 {dimension_numbers = #tpu.dot_dimension_numbers<[1], [1], [0], [0], [0, 0, 1, 0], [], []>} : vector<8x21xf32>, vector<8x21xf32>, vector<8x8xf32> -> vector<8x8xf32>
    %c2 = arith.constant 2 : index
    %c0_39 = arith.constant 0 : index
    %c0_40 = arith.constant 0 : index
    %230 = vector.load %arg4[%c2, %c0_39, %c0_40] : memref<4x8x8xf32, #tpu.memory_space<vmem>>, vector<1x8x8xf32>
    %231 = vector.shape_cast %230 : vector<1x8x8xf32> to vector<8x8xf32>
    %232 = arith.addf %229, %231 : vector<8x8xf32>
    %cst_41 = arith.constant dense<0xFF800000> : vector<8xf32>
    %233 = vector.multi_reduction <maximumf>, %232, %cst_41 [1] : vector<8x8xf32> to vector<8xf32>
    %234 = vector.shape_cast %233 : vector<8xf32> to vector<8x1xf32>
    %235 = vector.broadcast %234 : vector<8x1xf32> to vector<8x8xf32>
    %236 = arith.subf %232, %235 : vector<8x8xf32>
    %237 = math.exp %236 : vector<8x8xf32>
    %cst_42 = arith.constant dense<0.000000e+00> : vector<8xf32>
    %238 = vector.multi_reduction <add>, %237, %cst_42 [1] : vector<8x8xf32> to vector<8xf32>
    %239 = vector.shape_cast %238 : vector<8xf32> to vector<8x1xf32>
    %240 = tpu.reciprocal %239 {approx = true} : vector<8x1xf32> -> vector<8x1xf32>
    %241 = vector.broadcast %240 : vector<8x1xf32> to vector<8x8xf32>
    %242 = arith.mulf %237, %241 : vector<8x8xf32>
    %243 = vector.extract_strided_slice %92 {offsets = [0, 28], sizes = [8, 8], strides = [1, 1]} : vector<8x48xf32> to vector<8x8xf32>
    %244 = vector.extract_strided_slice %102 {offsets = [0, 28], sizes = [8, 8], strides = [1, 1]} : vector<8x48xf32> to vector<8x8xf32>
    %245 = vector.extract_strided_slice %112 {offsets = [0, 28], sizes = [8, 8], strides = [1, 1]} : vector<8x48xf32> to vector<8x8xf32>
    %246 = tpu.concatenate %210, %243, %244, %245 in 1 : vector<8x8xf32>, vector<8x8xf32>, vector<8x8xf32>, vector<8x8xf32> -> vector<8x32xf32>
    %cst_43 = arith.constant dense<0.000000e+00> : vector<8x32xf32>
    %247 = tpu.matmul %242, %246, %cst_43 {dimension_numbers = #tpu.dot_dimension_numbers<[1], [0], [0], [1], [0, 0, 1, 1], [], []>} : vector<8x8xf32>, vector<8x32xf32>, vector<8x32xf32> -> vector<8x32xf32>
    %248 = vector.extract_strided_slice %247 {offsets = [0, 0], sizes = [8, 8], strides = [1, 1]} : vector<8x32xf32> to vector<8x8xf32>
    %249 = vector.extract_strided_slice %247 {offsets = [0, 8], sizes = [8, 8], strides = [1, 1]} : vector<8x32xf32> to vector<8x8xf32>
    %250 = vector.extract_strided_slice %247 {offsets = [0, 16], sizes = [8, 8], strides = [1, 1]} : vector<8x32xf32> to vector<8x8xf32>
    %251 = vector.extract_strided_slice %247 {offsets = [0, 24], sizes = [8, 8], strides = [1, 1]} : vector<8x32xf32> to vector<8x8xf32>
    %252 = vector.extract_strided_slice %43 {offsets = [0, 24], sizes = [8, 8], strides = [1, 1]} : vector<8x80xf32> to vector<8x8xf32>
    %253 = vector.extract_strided_slice %46 {offsets = [0, 48], sizes = [8, 8], strides = [1, 1]} : vector<8x208xf32> to vector<8x8xf32>
    %254 = vector.extract_strided_slice %46 {offsets = [0, 56], sizes = [8, 8], strides = [1, 1]} : vector<8x208xf32> to vector<8x8xf32>
    %255 = vector.extract_strided_slice %92 {offsets = [0, 36], sizes = [8, 4], strides = [1, 1]} : vector<8x48xf32> to vector<8x4xf32>
    %256 = vector.extract_strided_slice %102 {offsets = [0, 36], sizes = [8, 4], strides = [1, 1]} : vector<8x48xf32> to vector<8x4xf32>
    %257 = vector.extract_strided_slice %112 {offsets = [0, 36], sizes = [8, 4], strides = [1, 1]} : vector<8x48xf32> to vector<8x4xf32>
    %258 = arith.mulf %255, %255 : vector<8x4xf32>
    %259 = arith.mulf %256, %256 : vector<8x4xf32>
    %260 = arith.addf %258, %259 : vector<8x4xf32>
    %261 = arith.mulf %257, %257 : vector<8x4xf32>
    %262 = arith.addf %260, %261 : vector<8x4xf32>
    %cst_44 = arith.constant dense<0.000000e+00> : vector<8xf32>
    %263 = vector.multi_reduction <add>, %262, %cst_44 [1] : vector<8x4xf32> to vector<8xf32>
    %264 = vector.shape_cast %263 : vector<8xf32> to vector<8x1xf32>
    %265 = vector.extract_strided_slice %114 {offsets = [0, 12], sizes = [8, 4], strides = [1, 1]} : vector<8x16xf32> to vector<8x4xf32>
    %266 = vector.extract_strided_slice %116 {offsets = [0, 12], sizes = [8, 4], strides = [1, 1]} : vector<8x16xf32> to vector<8x4xf32>
    %267 = vector.extract_strided_slice %118 {offsets = [0, 12], sizes = [8, 4], strides = [1, 1]} : vector<8x16xf32> to vector<8x4xf32>
    %268 = tpu.concatenate %252, %265, %266, %267, %119 in 1 : vector<8x8xf32>, vector<8x4xf32>, vector<8x4xf32>, vector<8x4xf32>, vector<8x1xf32> -> vector<8x21xf32>
    %269 = vector.extract_strided_slice %40 {offsets = [0, 3], sizes = [1, 1], strides = [1, 1]} : vector<1x4xf32> to vector<1x1xf32>
    %270 = vector.broadcast %269 : vector<1x1xf32> to vector<8x1xf32>
    %271 = arith.mulf %264, %270 : vector<8x1xf32>
    %272 = tpu.concatenate %253, %255, %256, %257, %271 in 1 : vector<8x8xf32>, vector<8x4xf32>, vector<8x4xf32>, vector<8x4xf32>, vector<8x1xf32> -> vector<8x21xf32>
    %cst_45 = arith.constant dense<0.000000e+00> : vector<8x8xf32>
    %273 = tpu.matmul %268, %272, %cst_45 {dimension_numbers = #tpu.dot_dimension_numbers<[1], [1], [0], [0], [0, 0, 1, 0], [], []>} : vector<8x21xf32>, vector<8x21xf32>, vector<8x8xf32> -> vector<8x8xf32>
    %c3 = arith.constant 3 : index
    %c0_46 = arith.constant 0 : index
    %c0_47 = arith.constant 0 : index
    %274 = vector.load %arg4[%c3, %c0_46, %c0_47] : memref<4x8x8xf32, #tpu.memory_space<vmem>>, vector<1x8x8xf32>
    %275 = vector.shape_cast %274 : vector<1x8x8xf32> to vector<8x8xf32>
    %276 = arith.addf %273, %275 : vector<8x8xf32>
    %cst_48 = arith.constant dense<0xFF800000> : vector<8xf32>
    %277 = vector.multi_reduction <maximumf>, %276, %cst_48 [1] : vector<8x8xf32> to vector<8xf32>
    %278 = vector.shape_cast %277 : vector<8xf32> to vector<8x1xf32>
    %279 = vector.broadcast %278 : vector<8x1xf32> to vector<8x8xf32>
    %280 = arith.subf %276, %279 : vector<8x8xf32>
    %281 = math.exp %280 : vector<8x8xf32>
    %cst_49 = arith.constant dense<0.000000e+00> : vector<8xf32>
    %282 = vector.multi_reduction <add>, %281, %cst_49 [1] : vector<8x8xf32> to vector<8xf32>
    %283 = vector.shape_cast %282 : vector<8xf32> to vector<8x1xf32>
    %284 = tpu.reciprocal %283 {approx = true} : vector<8x1xf32> -> vector<8x1xf32>
    %285 = vector.broadcast %284 : vector<8x1xf32> to vector<8x8xf32>
    %286 = arith.mulf %281, %285 : vector<8x8xf32>
    %287 = vector.extract_strided_slice %92 {offsets = [0, 40], sizes = [8, 8], strides = [1, 1]} : vector<8x48xf32> to vector<8x8xf32>
    %288 = vector.extract_strided_slice %102 {offsets = [0, 40], sizes = [8, 8], strides = [1, 1]} : vector<8x48xf32> to vector<8x8xf32>
    %289 = vector.extract_strided_slice %112 {offsets = [0, 40], sizes = [8, 8], strides = [1, 1]} : vector<8x48xf32> to vector<8x8xf32>
    %290 = tpu.concatenate %254, %287, %288, %289 in 1 : vector<8x8xf32>, vector<8x8xf32>, vector<8x8xf32>, vector<8x8xf32> -> vector<8x32xf32>
    %cst_50 = arith.constant dense<0.000000e+00> : vector<8x32xf32>
    %291 = tpu.matmul %286, %290, %cst_50 {dimension_numbers = #tpu.dot_dimension_numbers<[1], [0], [0], [1], [0, 0, 1, 1], [], []>} : vector<8x8xf32>, vector<8x32xf32>, vector<8x32xf32> -> vector<8x32xf32>
    %292 = vector.extract_strided_slice %291 {offsets = [0, 0], sizes = [8, 8], strides = [1, 1]} : vector<8x32xf32> to vector<8x8xf32>
    %293 = vector.extract_strided_slice %291 {offsets = [0, 8], sizes = [8, 8], strides = [1, 1]} : vector<8x32xf32> to vector<8x8xf32>
    %294 = vector.extract_strided_slice %291 {offsets = [0, 16], sizes = [8, 8], strides = [1, 1]} : vector<8x32xf32> to vector<8x8xf32>
    %295 = vector.extract_strided_slice %291 {offsets = [0, 24], sizes = [8, 8], strides = [1, 1]} : vector<8x32xf32> to vector<8x8xf32>
    %296 = vector.shape_cast %154 : vector<8x8xf32> to vector<8x1x8xf32>
    %297 = vector.shape_cast %198 : vector<8x8xf32> to vector<8x1x8xf32>
    %298 = vector.shape_cast %242 : vector<8x8xf32> to vector<8x1x8xf32>
    %299 = vector.shape_cast %286 : vector<8x8xf32> to vector<8x1x8xf32>
    %300 = tpu.concatenate %296, %297, %298, %299 in 1 : vector<8x1x8xf32>, vector<8x1x8xf32>, vector<8x1x8xf32>, vector<8x1x8xf32> -> vector<8x4x8xf32>
    %c0_51 = arith.constant 0 : index
    %c0_52 = arith.constant 0 : index
    %c0_53 = arith.constant 0 : index
    %301 = vector.load %arg3[%c0_51, %c0_52, %c0_53] : memref<8x8x32xf32, #tpu.memory_space<vmem>>, vector<8x8x32xf32>
    %cst_54 = arith.constant dense<0.000000e+00> : vector<8x4x32xf32>
    %302 = tpu.matmul %300, %301, %cst_54 {dimension_numbers = #tpu.dot_dimension_numbers<[2], [1], [1], [2], [0, 0, 0, 1, 1, 2], [0], [0]>} : vector<8x4x8xf32>, vector<8x8x32xf32>, vector<8x4x32xf32> -> vector<8x4x32xf32>
    %303 = vector.shape_cast %302 : vector<8x4x32xf32> to vector<8x128xf32>
    %304 = tpu.concatenate %160, %204, %248, %292 in 1 : vector<8x8xf32>, vector<8x8xf32>, vector<8x8xf32>, vector<8x8xf32> -> vector<8x32xf32>
    %305 = tpu.concatenate %161, %205, %249, %293 in 1 : vector<8x8xf32>, vector<8x8xf32>, vector<8x8xf32>, vector<8x8xf32> -> vector<8x32xf32>
    %306 = tpu.concatenate %162, %206, %250, %294 in 1 : vector<8x8xf32>, vector<8x8xf32>, vector<8x8xf32>, vector<8x8xf32> -> vector<8x32xf32>
    %307 = tpu.concatenate %163, %207, %251, %295 in 1 : vector<8x8xf32>, vector<8x8xf32>, vector<8x8xf32>, vector<8x8xf32> -> vector<8x32xf32>
    %308 = vector.broadcast %32 : vector<8x1xf32> to vector<8x32xf32>
    %309 = arith.subf %305, %308 : vector<8x32xf32>
    %310 = vector.broadcast %33 : vector<8x1xf32> to vector<8x32xf32>
    %311 = arith.subf %306, %310 : vector<8x32xf32>
    %312 = vector.broadcast %34 : vector<8x1xf32> to vector<8x32xf32>
    %313 = arith.subf %307, %312 : vector<8x32xf32>
    %314 = vector.broadcast %23 : vector<8x1xf32> to vector<8x32xf32>
    %315 = arith.mulf %314, %309 : vector<8x32xf32>
    %316 = vector.broadcast %26 : vector<8x1xf32> to vector<8x32xf32>
    %317 = arith.mulf %316, %311 : vector<8x32xf32>
    %318 = arith.addf %315, %317 : vector<8x32xf32>
    %319 = vector.broadcast %29 : vector<8x1xf32> to vector<8x32xf32>
    %320 = arith.mulf %319, %313 : vector<8x32xf32>
    %321 = arith.addf %318, %320 : vector<8x32xf32>
    %322 = vector.broadcast %24 : vector<8x1xf32> to vector<8x32xf32>
    %323 = arith.mulf %322, %309 : vector<8x32xf32>
    %324 = vector.broadcast %27 : vector<8x1xf32> to vector<8x32xf32>
    %325 = arith.mulf %324, %311 : vector<8x32xf32>
    %326 = arith.addf %323, %325 : vector<8x32xf32>
    %327 = vector.broadcast %30 : vector<8x1xf32> to vector<8x32xf32>
    %328 = arith.mulf %327, %313 : vector<8x32xf32>
    %329 = arith.addf %326, %328 : vector<8x32xf32>
    %330 = vector.broadcast %25 : vector<8x1xf32> to vector<8x32xf32>
    %331 = arith.mulf %330, %309 : vector<8x32xf32>
    %332 = vector.broadcast %28 : vector<8x1xf32> to vector<8x32xf32>
    %333 = arith.mulf %332, %311 : vector<8x32xf32>
    %334 = arith.addf %331, %333 : vector<8x32xf32>
    %335 = vector.broadcast %31 : vector<8x1xf32> to vector<8x32xf32>
    %336 = arith.mulf %335, %313 : vector<8x32xf32>
    %337 = arith.addf %334, %336 : vector<8x32xf32>
    %338 = arith.mulf %321, %321 : vector<8x32xf32>
    %339 = arith.mulf %329, %329 : vector<8x32xf32>
    %340 = arith.addf %338, %339 : vector<8x32xf32>
    %341 = arith.mulf %337, %337 : vector<8x32xf32>
    %342 = arith.addf %340, %341 : vector<8x32xf32>
    %cst_55 = arith.constant 9.99999996E-13 : f32
    %343 = vector.broadcast %cst_55 : f32 to vector<8x32xf32>
    %344 = arith.addf %342, %343 : vector<8x32xf32>
    %345 = math.sqrt %344 : vector<8x32xf32>
    %346 = tpu.concatenate %304, %321, %329, %337, %345, %303 in 1 : vector<8x32xf32>, vector<8x32xf32>, vector<8x32xf32>, vector<8x32xf32>, vector<8x32xf32>, vector<8x128xf32> -> vector<8x288xf32>
    %c0_56 = arith.constant 0 : index
    %c0_57 = arith.constant 0 : index
    %347 = vector.load %arg13[%c0_56, %c0_57] : memref<288x64xf32, #tpu.memory_space<vmem>>, vector<288x64xf32>
    %c0_58 = arith.constant 0 : index
    %c0_59 = arith.constant 0 : index
    %348 = vector.load %arg14[%c0_58, %c0_59] : memref<1x64xf32, #tpu.memory_space<vmem>>, vector<1x64xf32>
    %349 = vector.broadcast %348 : vector<1x64xf32> to vector<8x64xf32>
    %350 = arith.addf %4, %349 : vector<8x64xf32>
    %cst_60 = arith.constant dense<0.000000e+00> : vector<8x64xf32>
    %351 = tpu.matmul %346, %347, %cst_60 {dimension_numbers = #tpu.dot_dimension_numbers<[1], [0], [0], [1], [0, 0, 1, 1], [], []>} : vector<8x288xf32>, vector<288x64xf32>, vector<8x64xf32> -> vector<8x64xf32>
    %352 = arith.addf %350, %351 : vector<8x64xf32>
    %c0_61 = arith.constant 0 : index
    %c0_62 = arith.constant 0 : index
    %353 = vector.load %arg15[%c0_61, %c0_62] : memref<1x64xf32, #tpu.memory_space<vmem>>, vector<1x64xf32>
    %c0_63 = arith.constant 0 : index
    %c0_64 = arith.constant 0 : index
    %354 = vector.load %arg16[%c0_63, %c0_64] : memref<1x64xf32, #tpu.memory_space<vmem>>, vector<1x64xf32>
    %cst_65 = arith.constant dense<0.000000e+00> : vector<8xf32>
    %355 = vector.multi_reduction <add>, %352, %cst_65 [1] : vector<8x64xf32> to vector<8xf32>
    %356 = vector.shape_cast %355 : vector<8xf32> to vector<8x1xf32>
    %cst_66 = arith.constant 6.400000e+01 : f32
    %357 = vector.broadcast %cst_66 : f32 to vector<8x1xf32>
    %358 = arith.divf %356, %357 : vector<8x1xf32>
    %359 = vector.broadcast %358 : vector<8x1xf32> to vector<8x64xf32>
    %360 = arith.subf %352, %359 : vector<8x64xf32>
    %361 = arith.mulf %360, %360 : vector<8x64xf32>
    %cst_67 = arith.constant dense<0.000000e+00> : vector<8xf32>
    %362 = vector.multi_reduction <add>, %361, %cst_67 [1] : vector<8x64xf32> to vector<8xf32>
    %363 = vector.shape_cast %362 : vector<8xf32> to vector<8x1xf32>
    %cst_68 = arith.constant 6.400000e+01 : f32
    %364 = vector.broadcast %cst_68 : f32 to vector<8x1xf32>
    %365 = arith.divf %363, %364 : vector<8x1xf32>
    %cst_69 = arith.constant 9.99999974E-6 : f32
    %366 = vector.broadcast %cst_69 : f32 to vector<8x1xf32>
    %367 = arith.addf %365, %366 : vector<8x1xf32>
    %368 = math.rsqrt %367 : vector<8x1xf32>
    %369 = vector.broadcast %368 : vector<8x1xf32> to vector<8x64xf32>
    %370 = arith.mulf %360, %369 : vector<8x64xf32>
    %371 = vector.broadcast %353 : vector<1x64xf32> to vector<8x64xf32>
    %372 = arith.mulf %370, %371 : vector<8x64xf32>
    %373 = vector.broadcast %354 : vector<1x64xf32> to vector<8x64xf32>
    %374 = arith.addf %372, %373 : vector<8x64xf32>
    %c0_70 = arith.constant 0 : index
    %c0_71 = arith.constant 0 : index
    %375 = vector.load %arg17[%c0_70, %c0_71] : memref<64x64xf32, #tpu.memory_space<vmem>>, vector<64x64xf32>
    %c0_72 = arith.constant 0 : index
    %c0_73 = arith.constant 0 : index
    %376 = vector.load %arg18[%c0_72, %c0_73] : memref<1x64xf32, #tpu.memory_space<vmem>>, vector<1x64xf32>
    %cst_74 = arith.constant dense<0.000000e+00> : vector<8x64xf32>
    %377 = tpu.matmul %374, %375, %cst_74 {dimension_numbers = #tpu.dot_dimension_numbers<[1], [0], [0], [1], [0, 0, 1, 1], [], []>} : vector<8x64xf32>, vector<64x64xf32>, vector<8x64xf32> -> vector<8x64xf32>
    %378 = vector.broadcast %376 : vector<1x64xf32> to vector<8x64xf32>
    %379 = arith.addf %377, %378 : vector<8x64xf32>
    %c0_75 = arith.constant 0 : index
    %c0_76 = arith.constant 0 : index
    %380 = vector.load %arg19[%c0_75, %c0_76] : memref<64x64xf32, #tpu.memory_space<vmem>>, vector<64x64xf32>
    %c0_77 = arith.constant 0 : index
    %c0_78 = arith.constant 0 : index
    %381 = vector.load %arg20[%c0_77, %c0_78] : memref<1x64xf32, #tpu.memory_space<vmem>>, vector<1x64xf32>
    %cst_79 = arith.constant 0.000000e+00 : f32
    %382 = vector.broadcast %cst_79 : f32 to vector<8x64xf32>
    %383 = arith.maximumf %379, %382 : vector<8x64xf32>
    %cst_80 = arith.constant dense<0.000000e+00> : vector<8x64xf32>
    %384 = tpu.matmul %383, %380, %cst_80 {dimension_numbers = #tpu.dot_dimension_numbers<[1], [0], [0], [1], [0, 0, 1, 1], [], []>} : vector<8x64xf32>, vector<64x64xf32>, vector<8x64xf32> -> vector<8x64xf32>
    %385 = vector.broadcast %381 : vector<1x64xf32> to vector<8x64xf32>
    %386 = arith.addf %384, %385 : vector<8x64xf32>
    %c0_81 = arith.constant 0 : index
    %c0_82 = arith.constant 0 : index
    %387 = vector.load %arg21[%c0_81, %c0_82] : memref<64x64xf32, #tpu.memory_space<vmem>>, vector<64x64xf32>
    %c0_83 = arith.constant 0 : index
    %c0_84 = arith.constant 0 : index
    %388 = vector.load %arg22[%c0_83, %c0_84] : memref<1x64xf32, #tpu.memory_space<vmem>>, vector<1x64xf32>
    %cst_85 = arith.constant 0.000000e+00 : f32
    %389 = vector.broadcast %cst_85 : f32 to vector<8x64xf32>
    %390 = arith.maximumf %386, %389 : vector<8x64xf32>
    %cst_86 = arith.constant dense<0.000000e+00> : vector<8x64xf32>
    %391 = tpu.matmul %390, %387, %cst_86 {dimension_numbers = #tpu.dot_dimension_numbers<[1], [0], [0], [1], [0, 0, 1, 1], [], []>} : vector<8x64xf32>, vector<64x64xf32>, vector<8x64xf32> -> vector<8x64xf32>
    %392 = vector.broadcast %388 : vector<1x64xf32> to vector<8x64xf32>
    %393 = arith.addf %391, %392 : vector<8x64xf32>
    %394 = arith.addf %374, %393 : vector<8x64xf32>
    %c0_87 = arith.constant 0 : index
    %c0_88 = arith.constant 0 : index
    %395 = vector.load %arg23[%c0_87, %c0_88] : memref<1x64xf32, #tpu.memory_space<vmem>>, vector<1x64xf32>
    %c0_89 = arith.constant 0 : index
    %c0_90 = arith.constant 0 : index
    %396 = vector.load %arg24[%c0_89, %c0_90] : memref<1x64xf32, #tpu.memory_space<vmem>>, vector<1x64xf32>
    %cst_91 = arith.constant dense<0.000000e+00> : vector<8xf32>
    %397 = vector.multi_reduction <add>, %394, %cst_91 [1] : vector<8x64xf32> to vector<8xf32>
    %398 = vector.shape_cast %397 : vector<8xf32> to vector<8x1xf32>
    %cst_92 = arith.constant 6.400000e+01 : f32
    %399 = vector.broadcast %cst_92 : f32 to vector<8x1xf32>
    %400 = arith.divf %398, %399 : vector<8x1xf32>
    %401 = vector.broadcast %400 : vector<8x1xf32> to vector<8x64xf32>
    %402 = arith.subf %394, %401 : vector<8x64xf32>
    %403 = arith.mulf %402, %402 : vector<8x64xf32>
    %cst_93 = arith.constant dense<0.000000e+00> : vector<8xf32>
    %404 = vector.multi_reduction <add>, %403, %cst_93 [1] : vector<8x64xf32> to vector<8xf32>
    %405 = vector.shape_cast %404 : vector<8xf32> to vector<8x1xf32>
    %cst_94 = arith.constant 6.400000e+01 : f32
    %406 = vector.broadcast %cst_94 : f32 to vector<8x1xf32>
    %407 = arith.divf %405, %406 : vector<8x1xf32>
    %cst_95 = arith.constant 9.99999974E-6 : f32
    %408 = vector.broadcast %cst_95 : f32 to vector<8x1xf32>
    %409 = arith.addf %407, %408 : vector<8x1xf32>
    %410 = math.rsqrt %409 : vector<8x1xf32>
    %411 = vector.broadcast %410 : vector<8x1xf32> to vector<8x64xf32>
    %412 = arith.mulf %402, %411 : vector<8x64xf32>
    %413 = vector.broadcast %395 : vector<1x64xf32> to vector<8x64xf32>
    %414 = arith.mulf %412, %413 : vector<8x64xf32>
    %415 = vector.broadcast %396 : vector<1x64xf32> to vector<8x64xf32>
    %416 = arith.addf %414, %415 : vector<8x64xf32>
    %c0_96 = arith.constant 0 : index
    %c0_97 = arith.constant 0 : index
    %417 = vector.load %arg25[%c0_96, %c0_97] : memref<64x6xf32, #tpu.memory_space<vmem>>, vector<64x6xf32>
    %c0_98 = arith.constant 0 : index
    %c0_99 = arith.constant 0 : index
    %418 = vector.load %arg26[%c0_98, %c0_99] : memref<1x6xf32, #tpu.memory_space<vmem>>, vector<1x6xf32>
    %cst_100 = arith.constant dense<0.000000e+00> : vector<8x6xf32>
    %419 = tpu.matmul %416, %417, %cst_100 {dimension_numbers = #tpu.dot_dimension_numbers<[1], [0], [0], [1], [0, 0, 1, 1], [], []>} : vector<8x64xf32>, vector<64x6xf32>, vector<8x6xf32> -> vector<8x6xf32>
    %420 = vector.broadcast %418 : vector<1x6xf32> to vector<8x6xf32>
    %421 = arith.addf %419, %420 : vector<8x6xf32>
    %c0_101 = arith.constant 0 : index
    %c0_102 = arith.constant 0 : index
    %422 = vector.load %arg2[%c0_101, %c0_102] : memref<8x64xf32, #tpu.memory_space<vmem>>, vector<8x64xf32>
    %c0_103 = arith.constant 0 : index
    %c0_104 = arith.constant 0 : index
    %423 = vector.load %arg27[%c0_103, %c0_104] : memref<64x32xf32, #tpu.memory_space<vmem>>, vector<64x32xf32>
    %c0_105 = arith.constant 0 : index
    %c0_106 = arith.constant 0 : index
    %424 = vector.load %arg28[%c0_105, %c0_106] : memref<1x32xf32, #tpu.memory_space<vmem>>, vector<1x32xf32>
    %cst_107 = arith.constant 0.000000e+00 : f32
    %425 = vector.broadcast %cst_107 : f32 to vector<8x64xf32>
    %426 = arith.maximumf %422, %425 : vector<8x64xf32>
    %cst_108 = arith.constant dense<0.000000e+00> : vector<8x32xf32>
    %427 = tpu.matmul %426, %423, %cst_108 {dimension_numbers = #tpu.dot_dimension_numbers<[1], [0], [0], [1], [0, 0, 1, 1], [], []>} : vector<8x64xf32>, vector<64x32xf32>, vector<8x32xf32> -> vector<8x32xf32>
    %428 = vector.broadcast %424 : vector<1x32xf32> to vector<8x32xf32>
    %429 = arith.addf %427, %428 : vector<8x32xf32>
    %c0_109 = arith.constant 0 : index
    %c0_110 = arith.constant 0 : index
    %430 = vector.load %arg29[%c0_109, %c0_110] : memref<64x32xf32, #tpu.memory_space<vmem>>, vector<64x32xf32>
    %c0_111 = arith.constant 0 : index
    %c0_112 = arith.constant 0 : index
    %431 = vector.load %arg30[%c0_111, %c0_112] : memref<1x32xf32, #tpu.memory_space<vmem>>, vector<1x32xf32>
    %cst_113 = arith.constant 0.000000e+00 : f32
    %432 = vector.broadcast %cst_113 : f32 to vector<8x64xf32>
    %433 = arith.maximumf %416, %432 : vector<8x64xf32>
    %cst_114 = arith.constant dense<0.000000e+00> : vector<8x32xf32>
    %434 = tpu.matmul %433, %430, %cst_114 {dimension_numbers = #tpu.dot_dimension_numbers<[1], [0], [0], [1], [0, 0, 1, 1], [], []>} : vector<8x64xf32>, vector<64x32xf32>, vector<8x32xf32> -> vector<8x32xf32>
    %435 = vector.broadcast %431 : vector<1x32xf32> to vector<8x32xf32>
    %436 = arith.addf %434, %435 : vector<8x32xf32>
    %437 = arith.addf %436, %429 : vector<8x32xf32>
    %c0_115 = arith.constant 0 : index
    %c0_116 = arith.constant 0 : index
    %438 = vector.load %arg31[%c0_115, %c0_116] : memref<32x32xf32, #tpu.memory_space<vmem>>, vector<32x32xf32>
    %c0_117 = arith.constant 0 : index
    %c0_118 = arith.constant 0 : index
    %439 = vector.load %arg32[%c0_117, %c0_118] : memref<1x32xf32, #tpu.memory_space<vmem>>, vector<1x32xf32>
    %cst_119 = arith.constant 0.000000e+00 : f32
    %440 = vector.broadcast %cst_119 : f32 to vector<8x32xf32>
    %441 = arith.maximumf %437, %440 : vector<8x32xf32>
    %cst_120 = arith.constant dense<0.000000e+00> : vector<8x32xf32>
    %442 = tpu.matmul %441, %438, %cst_120 {dimension_numbers = #tpu.dot_dimension_numbers<[1], [0], [0], [1], [0, 0, 1, 1], [], []>} : vector<8x32xf32>, vector<32x32xf32>, vector<8x32xf32> -> vector<8x32xf32>
    %443 = vector.broadcast %439 : vector<1x32xf32> to vector<8x32xf32>
    %444 = arith.addf %442, %443 : vector<8x32xf32>
    %c0_121 = arith.constant 0 : index
    %c0_122 = arith.constant 0 : index
    %445 = vector.load %arg33[%c0_121, %c0_122] : memref<32x32xf32, #tpu.memory_space<vmem>>, vector<32x32xf32>
    %c0_123 = arith.constant 0 : index
    %c0_124 = arith.constant 0 : index
    %446 = vector.load %arg34[%c0_123, %c0_124] : memref<1x32xf32, #tpu.memory_space<vmem>>, vector<1x32xf32>
    %cst_125 = arith.constant 0.000000e+00 : f32
    %447 = vector.broadcast %cst_125 : f32 to vector<8x32xf32>
    %448 = arith.maximumf %444, %447 : vector<8x32xf32>
    %cst_126 = arith.constant dense<0.000000e+00> : vector<8x32xf32>
    %449 = tpu.matmul %448, %445, %cst_126 {dimension_numbers = #tpu.dot_dimension_numbers<[1], [0], [0], [1], [0, 0, 1, 1], [], []>} : vector<8x32xf32>, vector<32x32xf32>, vector<8x32xf32> -> vector<8x32xf32>
    %450 = vector.broadcast %446 : vector<1x32xf32> to vector<8x32xf32>
    %451 = arith.addf %449, %450 : vector<8x32xf32>
    %452 = arith.addf %437, %451 : vector<8x32xf32>
    %c0_127 = arith.constant 0 : index
    %c0_128 = arith.constant 0 : index
    %453 = vector.load %arg35[%c0_127, %c0_128] : memref<32x32xf32, #tpu.memory_space<vmem>>, vector<32x32xf32>
    %c0_129 = arith.constant 0 : index
    %c0_130 = arith.constant 0 : index
    %454 = vector.load %arg36[%c0_129, %c0_130] : memref<1x32xf32, #tpu.memory_space<vmem>>, vector<1x32xf32>
    %cst_131 = arith.constant 0.000000e+00 : f32
    %455 = vector.broadcast %cst_131 : f32 to vector<8x32xf32>
    %456 = arith.maximumf %452, %455 : vector<8x32xf32>
    %cst_132 = arith.constant dense<0.000000e+00> : vector<8x32xf32>
    %457 = tpu.matmul %456, %453, %cst_132 {dimension_numbers = #tpu.dot_dimension_numbers<[1], [0], [0], [1], [0, 0, 1, 1], [], []>} : vector<8x32xf32>, vector<32x32xf32>, vector<8x32xf32> -> vector<8x32xf32>
    %458 = vector.broadcast %454 : vector<1x32xf32> to vector<8x32xf32>
    %459 = arith.addf %457, %458 : vector<8x32xf32>
    %c0_133 = arith.constant 0 : index
    %c0_134 = arith.constant 0 : index
    %460 = vector.load %arg37[%c0_133, %c0_134] : memref<32x32xf32, #tpu.memory_space<vmem>>, vector<32x32xf32>
    %c0_135 = arith.constant 0 : index
    %c0_136 = arith.constant 0 : index
    %461 = vector.load %arg38[%c0_135, %c0_136] : memref<1x32xf32, #tpu.memory_space<vmem>>, vector<1x32xf32>
    %cst_137 = arith.constant 0.000000e+00 : f32
    %462 = vector.broadcast %cst_137 : f32 to vector<8x32xf32>
    %463 = arith.maximumf %459, %462 : vector<8x32xf32>
    %cst_138 = arith.constant dense<0.000000e+00> : vector<8x32xf32>
    %464 = tpu.matmul %463, %460, %cst_138 {dimension_numbers = #tpu.dot_dimension_numbers<[1], [0], [0], [1], [0, 0, 1, 1], [], []>} : vector<8x32xf32>, vector<32x32xf32>, vector<8x32xf32> -> vector<8x32xf32>
    %465 = vector.broadcast %461 : vector<1x32xf32> to vector<8x32xf32>
    %466 = arith.addf %464, %465 : vector<8x32xf32>
    %467 = arith.addf %452, %466 : vector<8x32xf32>
    %c0_139 = arith.constant 0 : index
    %c0_140 = arith.constant 0 : index
    %468 = vector.load %arg39[%c0_139, %c0_140] : memref<32x14xf32, #tpu.memory_space<vmem>>, vector<32x14xf32>
    %c0_141 = arith.constant 0 : index
    %c0_142 = arith.constant 0 : index
    %469 = vector.load %arg40[%c0_141, %c0_142] : memref<1x14xf32, #tpu.memory_space<vmem>>, vector<1x14xf32>
    %cst_143 = arith.constant 0.000000e+00 : f32
    %470 = vector.broadcast %cst_143 : f32 to vector<8x32xf32>
    %471 = arith.maximumf %467, %470 : vector<8x32xf32>
    %cst_144 = arith.constant dense<0.000000e+00> : vector<8x14xf32>
    %472 = tpu.matmul %471, %468, %cst_144 {dimension_numbers = #tpu.dot_dimension_numbers<[1], [0], [0], [1], [0, 0, 1, 1], [], []>} : vector<8x32xf32>, vector<32x14xf32>, vector<8x14xf32> -> vector<8x14xf32>
    %473 = vector.broadcast %469 : vector<1x14xf32> to vector<8x14xf32>
    %474 = arith.addf %472, %473 : vector<8x14xf32>
    %cst_145 = arith.constant 0.000000e+00 : f32
    %475 = vector.broadcast %cst_145 : f32 to vector<8x44xf32>
    %476 = tpu.concatenate %416, %421, %474, %475 in 1 : vector<8x64xf32>, vector<8x6xf32>, vector<8x14xf32>, vector<8x44xf32> -> vector<8x128xf32>
    %c0_146 = arith.constant 0 : index
    %c0_147 = arith.constant 0 : index
    %477 = vector.load %arg41[%c0_146, %c0_147] : memref<8x128xf32, #tpu.memory_space<vmem>>, vector<8x128xf32>
    tpu.vector_store %arg41[%c0_146, %c0_147], %476 {strides = array<i32>} : memref<8x128xf32, #tpu.memory_space<vmem>>, vector<8x128xf32>,
    return
  }
  func.func @transform_0(%arg0: i32) -> (i32, i32) {
    %c0_i32 = arith.constant 0 : i32
    %c0_i32_0 = arith.constant 0 : i32
    %c0_i32_1 = arith.constant 0 : i32
    return %c0_i32, %c0_i32_0 : i32, i32
  }
  func.func @transform_1(%arg0: i32) -> (i32, i32) {
    %c0_i32 = arith.constant 0 : i32
    %c0_i32_0 = arith.constant 0 : i32
    return %arg0, %c0_i32 : i32, i32
  }
  func.func @transform_2(%arg0: i32) -> (i32, i32, i32) {
    %c0_i32 = arith.constant 0 : i32
    %c0_i32_0 = arith.constant 0 : i32
    %c0_i32_1 = arith.constant 0 : i32
    return %arg0, %c0_i32, %c0_i32_0 : i32, i32, i32
  }
  func.func @transform_3(%arg0: i32) -> (i32, i32, i32) {
    %c0_i32 = arith.constant 0 : i32
    %c0_i32_0 = arith.constant 0 : i32
    %c0_i32_1 = arith.constant 0 : i32
    return %c0_i32, %arg0, %c0_i32_0 : i32, i32, i32
  }
  func.func @transform_4(%arg0: i32) -> (i32, i32) {
    %c0_i32 = arith.constant 0 : i32
    %c0_i32_0 = arith.constant 0 : i32
    %c0_i32_1 = arith.constant 0 : i32
    return %c0_i32, %c0_i32_0 : i32, i32
  }
  func.func @transform_5(%arg0: i32) -> (i32, i32) {
    %c0_i32 = arith.constant 0 : i32
    %c0_i32_0 = arith.constant 0 : i32
    %c0_i32_1 = arith.constant 0 : i32
    return %c0_i32, %c0_i32_0 : i32, i32
  }
  func.func @transform_6(%arg0: i32) -> (i32, i32) {
    %c0_i32 = arith.constant 0 : i32
    %c0_i32_0 = arith.constant 0 : i32
    %c0_i32_1 = arith.constant 0 : i32
    return %c0_i32, %c0_i32_0 : i32, i32
  }
  func.func @transform_7(%arg0: i32) -> (i32, i32) {
    %c0_i32 = arith.constant 0 : i32
    %c0_i32_0 = arith.constant 0 : i32
    %c0_i32_1 = arith.constant 0 : i32
    return %c0_i32, %c0_i32_0 : i32, i32
  }
  func.func @transform_8(%arg0: i32) -> (i32, i32) {
    %c0_i32 = arith.constant 0 : i32
    %c0_i32_0 = arith.constant 0 : i32
    %c0_i32_1 = arith.constant 0 : i32
    return %c0_i32, %c0_i32_0 : i32, i32
  }
  func.func @transform_9(%arg0: i32) -> (i32, i32) {
    %c0_i32 = arith.constant 0 : i32
    %c0_i32_0 = arith.constant 0 : i32
    %c0_i32_1 = arith.constant 0 : i32
    return %c0_i32, %c0_i32_0 : i32, i32
  }
  func.func @transform_10(%arg0: i32) -> (i32, i32) {
    %c0_i32 = arith.constant 0 : i32
    %c0_i32_0 = arith.constant 0 : i32
    %c0_i32_1 = arith.constant 0 : i32
    return %c0_i32, %c0_i32_0 : i32, i32
  }
  func.func @transform_11(%arg0: i32) -> (i32, i32) {
    %c0_i32 = arith.constant 0 : i32
    %c0_i32_0 = arith.constant 0 : i32
    %c0_i32_1 = arith.constant 0 : i32
    return %c0_i32, %c0_i32_0 : i32, i32
  }
  func.func @transform_12(%arg0: i32) -> (i32, i32) {
    %c0_i32 = arith.constant 0 : i32
    %c0_i32_0 = arith.constant 0 : i32
    %c0_i32_1 = arith.constant 0 : i32
    return %c0_i32, %c0_i32_0 : i32, i32
  }
  func.func @transform_13(%arg0: i32) -> (i32, i32) {
    %c0_i32 = arith.constant 0 : i32
    %c0_i32_0 = arith.constant 0 : i32
    %c0_i32_1 = arith.constant 0 : i32
    return %c0_i32, %c0_i32_0 : i32, i32
  }
  func.func @transform_14(%arg0: i32) -> (i32, i32) {
    %c0_i32 = arith.constant 0 : i32
    %c0_i32_0 = arith.constant 0 : i32
    %c0_i32_1 = arith.constant 0 : i32
    return %c0_i32, %c0_i32_0 : i32, i32
  }
  func.func @transform_15(%arg0: i32) -> (i32, i32) {
    %c0_i32 = arith.constant 0 : i32
    %c0_i32_0 = arith.constant 0 : i32
    %c0_i32_1 = arith.constant 0 : i32
    return %c0_i32, %c0_i32_0 : i32, i32
  }
  func.func @transform_16(%arg0: i32) -> (i32, i32) {
    %c0_i32 = arith.constant 0 : i32
    %c0_i32_0 = arith.constant 0 : i32
    %c0_i32_1 = arith.constant 0 : i32
    return %c0_i32, %c0_i32_0 : i32, i32
  }
  func.func @transform_17(%arg0: i32) -> (i32, i32) {
    %c0_i32 = arith.constant 0 : i32
    %c0_i32_0 = arith.constant 0 : i32
    %c0_i32_1 = arith.constant 0 : i32
    return %c0_i32, %c0_i32_0 : i32, i32
  }
  func.func @transform_18(%arg0: i32) -> (i32, i32) {
    %c0_i32 = arith.constant 0 : i32
    %c0_i32_0 = arith.constant 0 : i32
    %c0_i32_1 = arith.constant 0 : i32
    return %c0_i32, %c0_i32_0 : i32, i32
  }
  func.func @transform_19(%arg0: i32) -> (i32, i32) {
    %c0_i32 = arith.constant 0 : i32
    %c0_i32_0 = arith.constant 0 : i32
    %c0_i32_1 = arith.constant 0 : i32
    return %c0_i32, %c0_i32_0 : i32, i32
  }
  func.func @transform_20(%arg0: i32) -> (i32, i32) {
    %c0_i32 = arith.constant 0 : i32
    %c0_i32_0 = arith.constant 0 : i32
    %c0_i32_1 = arith.constant 0 : i32
    return %c0_i32, %c0_i32_0 : i32, i32
  }
  func.func @transform_21(%arg0: i32) -> (i32, i32) {
    %c0_i32 = arith.constant 0 : i32
    %c0_i32_0 = arith.constant 0 : i32
    %c0_i32_1 = arith.constant 0 : i32
    return %c0_i32, %c0_i32_0 : i32, i32
  }
  func.func @transform_22(%arg0: i32) -> (i32, i32) {
    %c0_i32 = arith.constant 0 : i32
    %c0_i32_0 = arith.constant 0 : i32
    %c0_i32_1 = arith.constant 0 : i32
    return %c0_i32, %c0_i32_0 : i32, i32
  }
  func.func @transform_23(%arg0: i32) -> (i32, i32) {
    %c0_i32 = arith.constant 0 : i32
    %c0_i32_0 = arith.constant 0 : i32
    %c0_i32_1 = arith.constant 0 : i32
    return %c0_i32, %c0_i32_0 : i32, i32
  }
  func.func @transform_24(%arg0: i32) -> (i32, i32) {
    %c0_i32 = arith.constant 0 : i32
    %c0_i32_0 = arith.constant 0 : i32
    %c0_i32_1 = arith.constant 0 : i32
    return %c0_i32, %c0_i32_0 : i32, i32
  }
  func.func @transform_25(%arg0: i32) -> (i32, i32) {
    %c0_i32 = arith.constant 0 : i32
    %c0_i32_0 = arith.constant 0 : i32
    %c0_i32_1 = arith.constant 0 : i32
    return %c0_i32, %c0_i32_0 : i32, i32
  }
  func.func @transform_26(%arg0: i32) -> (i32, i32) {
    %c0_i32 = arith.constant 0 : i32
    %c0_i32_0 = arith.constant 0 : i32
    %c0_i32_1 = arith.constant 0 : i32
    return %c0_i32, %c0_i32_0 : i32, i32
  }
  func.func @transform_27(%arg0: i32) -> (i32, i32) {
    %c0_i32 = arith.constant 0 : i32
    %c0_i32_0 = arith.constant 0 : i32
    %c0_i32_1 = arith.constant 0 : i32
    return %c0_i32, %c0_i32_0 : i32, i32
  }
  func.func @transform_28(%arg0: i32) -> (i32, i32) {
    %c0_i32 = arith.constant 0 : i32
    %c0_i32_0 = arith.constant 0 : i32
    %c0_i32_1 = arith.constant 0 : i32
    return %c0_i32, %c0_i32_0 : i32, i32
  }
  func.func @transform_29(%arg0: i32) -> (i32, i32) {
    %c0_i32 = arith.constant 0 : i32
    %c0_i32_0 = arith.constant 0 : i32
    %c0_i32_1 = arith.constant 0 : i32
    return %c0_i32, %c0_i32_0 : i32, i32
  }
  func.func @transform_30(%arg0: i32) -> (i32, i32) {
    %c0_i32 = arith.constant 0 : i32
    %c0_i32_0 = arith.constant 0 : i32
    %c0_i32_1 = arith.constant 0 : i32
    return %c0_i32, %c0_i32_0 : i32, i32
  }
  func.func @transform_31(%arg0: i32) -> (i32, i32) {
    %c0_i32 = arith.constant 0 : i32
    %c0_i32_0 = arith.constant 0 : i32
    %c0_i32_1 = arith.constant 0 : i32
    return %c0_i32, %c0_i32_0 : i32, i32
  }
  func.func @transform_32(%arg0: i32) -> (i32, i32) {
    %c0_i32 = arith.constant 0 : i32
    %c0_i32_0 = arith.constant 0 : i32
    %c0_i32_1 = arith.constant 0 : i32
    return %c0_i32, %c0_i32_0 : i32, i32
  }
  func.func @transform_33(%arg0: i32) -> (i32, i32) {
    %c0_i32 = arith.constant 0 : i32
    %c0_i32_0 = arith.constant 0 : i32
    %c0_i32_1 = arith.constant 0 : i32
    return %c0_i32, %c0_i32_0 : i32, i32
  }
  func.func @transform_34(%arg0: i32) -> (i32, i32) {
    %c0_i32 = arith.constant 0 : i32
    %c0_i32_0 = arith.constant 0 : i32
    %c0_i32_1 = arith.constant 0 : i32
    return %c0_i32, %c0_i32_0 : i32, i32
  }
  func.func @transform_35(%arg0: i32) -> (i32, i32) {
    %c0_i32 = arith.constant 0 : i32
    %c0_i32_0 = arith.constant 0 : i32
    %c0_i32_1 = arith.constant 0 : i32
    return %c0_i32, %c0_i32_0 : i32, i32
  }
  func.func @transform_36(%arg0: i32) -> (i32, i32) {
    %c0_i32 = arith.constant 0 : i32
    %c0_i32_0 = arith.constant 0 : i32
    %c0_i32_1 = arith.constant 0 : i32
    return %c0_i32, %c0_i32_0 : i32, i32
  }
  func.func @transform_37(%arg0: i32) -> (i32, i32) {
    %c0_i32 = arith.constant 0 : i32
    %c0_i32_0 = arith.constant 0 : i32
    %c0_i32_1 = arith.constant 0 : i32
    return %c0_i32, %c0_i32_0 : i32, i32
  }
  func.func @transform_38(%arg0: i32) -> (i32, i32) {
    %c0_i32 = arith.constant 0 : i32
    %c0_i32_0 = arith.constant 0 : i32
    %c0_i32_1 = arith.constant 0 : i32
    return %c0_i32, %c0_i32_0 : i32, i32
  }
  func.func @transform_39(%arg0: i32) -> (i32, i32) {
    %c0_i32 = arith.constant 0 : i32
    %c0_i32_0 = arith.constant 0 : i32
    %c0_i32_1 = arith.constant 0 : i32
    return %c0_i32, %c0_i32_0 : i32, i32
  }
  func.func @transform_40(%arg0: i32) -> (i32, i32) {
    %c0_i32 = arith.constant 0 : i32
    %c0_i32_0 = arith.constant 0 : i32
    return %arg0, %c0_i32 : i32, i32
  }
}

</mosaic_0001>

<bundles_post_ra>
// kernel: structure_module_forward.4
= control target key start
LH: loop header
LB: loop body
LE: loop exit
PB: predicated region body
PF: predicated region fallthrough
CT: control target
= control target key end

     0   :  { %vm25_vm0 = vcmask 523264   ;;  %v117_v2 = vmov 64.0   ;;  %s200_s0 = inlined_call_operand.vmem [shape: f32[8,64], index: 0, kind: input, shape index: {}]   ;;  %s201_s1 = inlined_call_operand.vmem [shape: f32[1,64], index: 1, kind: input, shape index: {}]   ;;  %s202_s2 = inlined_call_operand.vmem [shape: f32[1,64], index: 2, kind: input, shape index: {}]   ;;  %s203_s4 = inlined_call_operand.vmem [shape: f32[1,64], index: 4, kind: input, shape index: {}]   ;;  %s204_s3 = inlined_call_operand.vmem [shape: f32[64,64], index: 3, kind: input, shape index: {}]   ;;  %s205_s5 = inlined_call_operand.vmem [shape: f32[8,64], index: 5, kind: output, shape index: {0}]   ;;  %s206_s6 = inlined_call_operand.vmem [shape: f32[8,64], index: 6, kind: output, shape index: {1}]  }
   0x1   :  { %v22_v0 = vld [vmem:[%s200_s0] sm:$0xff]  ;;  %113 = vrcp.f32 %v117_v2  ;;  %v71_v14 = vld [vmem:[%s204_s3 + $0x38] sm:$0xff]  ;;  %v70_v15 = vld [vmem:[%s204_s3 + $0x30] sm:$0xff] }
   0x2   :  { %v26_v1 = vsel %vm25_vm0, %v22_v0, 0.0  ;;  %87 = vmatpush.msra.mxu0 %v71_v14  ;;  %v69_v16 = vld [vmem:[%s204_s3 + $0x28] sm:$0xff]  ;;  %v68_v17 = vld [vmem:[%s204_s3 + $0x20] sm:$0xff]  ;;  %v67_v18 = vld [vmem:[%s204_s3 + $0x18] sm:$0xff] }
   0x3   :  { %27 = vadd.xlane.f32.xlu0 %v26_v1  ;;  %v66_v19 = vld [vmem:[%s204_s3 + $0x10] sm:$0xff]  ;;  %v65_v20 = vld [vmem:[%s204_s3 + $0x8] sm:$0xff]  ;;  %v64_v21 = vld [vmem:[%s204_s3] sm:$0xff] }
   0x4   :  { %88 = vmatpush.msra.mxu0 %v70_v15  ;;  %v110_v31 = vld [vmem:[%s201_s1] ss:$0 sm:$0xff] }
   0x5   :  { %v111_v34 = vld [vmem:[%s202_s2] ss:$0 sm:$0xff] }
   0x6   :  { %89 = vmatpush.msra.mxu0 %v69_v16  ;;  %v112_v37 = vld [vmem:[%s203_s4] ss:$0 sm:$0xff] }
   0x7   :  { %v114_v3 = vpop.eup %113 }
   0x8   :  { %v30_v4 = vmul.f32 64.0, %v114_v3  ;;  %vm34_vm1 = vweird.f32 %v114_v3  ;;  %90 = vmatpush.msra.mxu0 %v68_v17 }
   0xa   :  { %v31_v5 = vsub.f32 1.0, %v30_v4  ;;  %91 = vmatpush.msra.mxu0 %v67_v18 }
   0xc   :  { %v32_v6 = vmul.f32 %v114_v3, %v31_v5  ;;  %92 = vmatpush.msra.mxu0 %v66_v19 }
   0xe   :  { %v33_v7 = vadd.f32 %v114_v3, %v32_v6  ;;  %93 = vmatpush.msra.mxu0 %v65_v20 }
  0x10   :  { %v35_v8 = vsel %vm34_vm1, %v114_v3, %v33_v7  ;;  %94 = vmatpush.msra.mxu0 %v64_v21 }
  0x76   :  { %v28_v9 = vpop.xlane.xlu0 %27 }
  0x77   :  { %v36_v10 = vmul.f32 %v35_v8, %v28_v9 }
  0x79   :  { %v37_v11 = vsub.f32 %v22_v0, %v36_v10 }
  0x7b   :  { %v38_v12 = vmul.f32 %v37_v11, %v37_v11 }
  0x7d   :  { %v39_v13 = vsel %vm25_vm0, %v38_v12, 0.0 }
  0x7e   :  { %40 = vadd.xlane.f32.xlu0 %v39_v13 }
  0xf1   :  { %v41_v22 = vpop.xlane.xlu0 %40 }
  0xf2   :  { %v42_v23 = vmul.f32 %v41_v22, %v35_v8 }
  0xf4   :  { %v43_v24 = vadd.f32 1e-05, %v42_v23 }
  0xf6   :  { %115 = vrsqrt.f32 %v43_v24  ;;  %vm50_vm3 = vweird.f32 %v43_v24 }
  0xfc   :  { %v116_v25 = vpop.eup %115 }
  0xfd   :  { %v45_v26 = vmul.f32 %v116_v25, %v43_v24  ;;  %vm51_vm2 = vweird.f32 %v116_v25 }
  0xfe   :  { %vm52_vm4 = vmor %vm50_vm3, %vm51_vm2 }
  0xff   :  { %v46_v27 = vmul.f32 %v116_v25, %v45_v26 }
 0x101   :  { %v47_v28 = vmul.f32 0.5, %v46_v27 }
 0x103   :  { %v48_v29 = vsub.f32 1.5, %v47_v28 }
 0x105   :  { %v49_v30 = vmul.f32 %v116_v25, %v48_v29 }
 0x107   :  { %v53_v32 = vsel %vm52_vm4, %v116_v25, %v49_v30 }
 0x108   :  { %v54_v33 = vmul.f32 %v53_v32, %v37_v11 }
 0x10a   :  { %v58_v35 = vmul.f32 %v110_v31, %v54_v33 }
 0x10c   :  { %v62_v36 = vadd.f32 %v111_v34, %v58_v35 }
 0x10e   :  { %63 = vst.msk [vmem:[%s205_s5] sm:$0xff] %vm25_vm0, %v62_v36  ;;  %108 = vmatmul.msk.f32.vlgmr.msra.gmra.mxu0 %vm25_vm0, %v62_v36 }
 0x18b   :  { %v96_v38 = vpop.f32.mrf.mxu0 }
 0x18c   :  { %v97_v39 = vadd.f32 %v112_v37, %v96_v38 }
 0x18e   :  { %99 = vst.msk [vmem:[%s206_s6] sm:$0xff] %vm25_vm0, %v97_v39 }

// kernel: structure_module_forward.5
= control target key start
LH: loop header
LB: loop body
LE: loop exit
PB: predicated region body
PF: predicated region fallthrough
CT: control target
= control target key end

     0   :  { %12 = vsyncpa [#allocation3], 0  ;;  %s424_s24 = smov [#allocation2]   ;;  %s425_s26 = smov 128   ;;  %s704_s0 = inlined_call_operand.hbm [shape: f32[64,32], index: 0, kind: input, shape index: {}]   ;;  %s705_s1 = inlined_call_operand.vmem [shape: f32[1,32], index: 1, kind: input, shape index: {}]   ;;  %s706_s2 = inlined_call_operand.vmem [shape: f32[1,32], index: 2, kind: input, shape index: {}]   ;;  %s707_s3 = inlined_call_operand.vmem [shape: f32[32,4], index: 3, kind: input, shape index: {}]   ;;  %s708_s4 = inlined_call_operand.vmem [shape: f32[1,4], index: 4, kind: input, shape index: {}]   ;;  %s709_s5 = inlined_call_operand.vmem [shape: f32[64,32], index: 5, kind: output, shape index: {0}]   ;;  %s710_s6 = inlined_call_operand.vmem [shape: f32[64,4], index: 6, kind: output, shape index: {1}]  }
   0x1   :  { %s17_s23 = sshll.u32 %s704_s0, 4  ;;  %s19_s25 = sshll.u32 %s424_s24, 4  ;;  %s18_s23 = int_to_ptr.hbm [resolvable:$true] %s17_s23  ;;  %s20_s25 = int_to_ptr.vmem [resolvable:$true] %s19_s25 }
   0x2   :  { %s426_s27 = smov 8  }
   0x3   :  { %25 = dma.hbm_to_vmem [thread:$0]  %s18_s23, 1024, %s20_s25, [#allocation3], %s425_s26, %s425_s26, %s426_s27  }
   0x4   :  { %422 = dma.done.wait [#allocation3], 1024  }
   0x5   :  { %423 = vsyncadd [#allocation3], 4294966272  ;;  %vm48_vm0 = vcmask 261120   ;;  %v43_v0 = vld [vmem:[#allocation2 + $0x28] sm:$0xff]  ;;  %v42_v1 = vld [vmem:[#allocation2 + $0x20] sm:$0xff]  ;;  %v427_v16 = vmov 32.0  }
   0x6   :  { %v38_v2 = vld [vmem:[#allocation2] sm:$0xff]  ;;  %v64_v3 = vsel %vm48_vm0, %v43_v0, 0.0  ;;  %v61_v4 = vsel %vm48_vm0, %v42_v1, 0.0  ;;  %v45_v6 = vld [vmem:[#allocation2 + $0x38] sm:$0xff]  ;;  %v44_v7 = vld [vmem:[#allocation2 + $0x30] sm:$0xff]  ;;  %380 = vrcp.f32 %v427_v16 }
   0x7   :  { %v49_v5 = vsel %vm48_vm0, %v38_v2, 0.0  ;;  %65 = vadd.xlane.f32.xlu2 %v64_v3  ;;  %62 = vadd.xlane.f32.xlu0 %v61_v4  ;;  %v40_v8 = vld [vmem:[#allocation2 + $0x10] sm:$0xff]  ;;  %v70_v9 = vsel %vm48_vm0, %v45_v6, 0.0  ;;  %v67_v10 = vsel %vm48_vm0, %v44_v7, 0.0  ;;  %v39_v12 = vld [vmem:[#allocation2 + $0x8] sm:$0xff]  ;;  %v41_v13 = vld [vmem:[#allocation2 + $0x18] sm:$0xff] }
   0x8   :  { %50 = vadd.xlane.f32.xlu1 %v49_v5  ;;  %v55_v11 = vsel %vm48_vm0, %v40_v8, 0.0  ;;  %v52_v14 = vsel %vm48_vm0, %v39_v12, 0.0  ;;  %v58_v15 = vsel %vm48_vm0, %v41_v13, 0.0  ;;  %v265_v63 = vld [vmem:[%s707_s3 + $0x18] sm:$0xff] }
   0x9   :  { %306 = vmatpush.msra.mxu0 %v265_v63  ;;  %362 = vmatpush.msra.mxu2 %v265_v63 }
   0xa   :  { %361 = vmatpush.msra.mxu1 %v265_v63  ;;  %363 = vmatpush.msra.mxu3 %v265_v63  ;;  %v584_v63 = vld [vmem:[%s706_s2] ss:$0 sm:$0xff] }
   0xc   :  { %v381_v17 = vpop.eup %380 }
   0xd   :  { %v74_v18 = vmul.f32 32.0, %v381_v17  ;;  %vm78_vm1 = vweird.f32 %v381_v17 }
   0xf   :  { %71 = vadd.xlane.f32.xlu2 %v70_v9  ;;  %68 = vadd.xlane.f32.xlu0 %v67_v10  ;;  %v75_v19 = vsub.f32 1.0, %v74_v18 }
  0x10   :  { %56 = vadd.xlane.f32.xlu1 %v55_v11 }
  0x11   :  { %v76_v20 = vmul.f32 %v381_v17, %v75_v19 }
  0x13   :  { %v77_v21 = vadd.f32 %v381_v17, %v76_v20 }
  0x15   :  { %v474_v22 = vsel %vm78_vm1, %v381_v17, %v77_v21 }
  0x17   :  { %53 = vadd.xlane.f32.xlu0 %v52_v14 }
  0x18   :  { %59 = vadd.xlane.f32.xlu1 %v58_v15 }
  0x7a   :  { %v66_v23 = vpop.xlane.xlu2 %65  ;;  %v63_v24 = vpop.xlane.xlu0 %62 }
  0x7b   :  { %v84_v25 = vmul.f32 %v474_v22, %v63_v24  ;;  %v51_v26 = vpop.xlane.xlu1 %50  ;;  %v85_v40 = vmul.f32 %v474_v22, %v66_v23 }
  0x7c   :  { %v80_v27 = vmul.f32 %v474_v22, %v51_v26 }
  0x7d   :  { %v478_v28 = vsub.f32 %v42_v1, %v84_v25  ;;  %v504_v47 = vsub.f32 %v43_v0, %v85_v40  ;;  %v264_v0 = vld [vmem:[%s707_s3 + $0x10] sm:$0xff]  ;;  %v263_v1 = vld [vmem:[%s707_s3 + $0x8] sm:$0xff] }
  0x7e   :  { %v480_v29 = vsub.f32 %v38_v2, %v80_v27  ;;  %307 = vmatpush.msra.mxu0 %v264_v0  ;;  %365 = vmatpush.msra.mxu2 %v264_v0  ;;  %v262_v2 = vld [vmem:[%s707_s3] sm:$0xff] }
  0x7f   :  { %v100_v30 = vmul.f32 %v478_v28, %v478_v28  ;;  %v101_v56 = vmul.f32 %v504_v47, %v504_v47  ;;  %364 = vmatpush.msra.mxu1 %v264_v0  ;;  %366 = vmatpush.msra.mxu3 %v264_v0 }
  0x80   :  { %v96_v31 = vmul.f32 %v480_v29, %v480_v29  ;;  %308 = vmatpush.msra.mxu0 %v263_v1  ;;  %368 = vmatpush.msra.mxu2 %v263_v1 }
  0x81   :  { %v116_v32 = vsel %vm48_vm0, %v100_v30, 0.0  ;;  %v119_v59 = vsel %vm48_vm0, %v101_v56, 0.0  ;;  %367 = vmatpush.msra.mxu1 %v263_v1  ;;  %369 = vmatpush.msra.mxu3 %v263_v1 }
  0x82   :  { %v72_v33 = vpop.xlane.xlu2 %71  ;;  %117 = vadd.xlane.f32.xlu2 %v116_v32  ;;  %v69_v34 = vpop.xlane.xlu0 %68  ;;  %v104_v35 = vsel %vm48_vm0, %v96_v31, 0.0  ;;  %309 = vmatpush.msra.mxu0 %v262_v2 }
  0x83   :  { %v87_v36 = vmul.f32 %v474_v22, %v72_v33  ;;  %v86_v37 = vmul.f32 %v474_v22, %v69_v34  ;;  %105 = vadd.xlane.f32.xlu1 %v104_v35  ;;  %v57_v38 = vpop.xlane.xlu1 %56  ;;  %371 = vmatpush.msra.mxu2 %v262_v2 }
  0x84   :  { %v82_v39 = vmul.f32 %v474_v22, %v57_v38  ;;  %370 = vmatpush.msra.mxu1 %v262_v2  ;;  %372 = vmatpush.msra.mxu3 %v262_v2 }
  0x85   :  { %v492_v41 = vsub.f32 %v45_v6, %v87_v36  ;;  %v494_v42 = vsub.f32 %v44_v7, %v86_v37 }
  0x86   :  { %v496_v43 = vsub.f32 %v40_v8, %v82_v39 }
  0x87   :  { %v102_v44 = vmul.f32 %v494_v42, %v494_v42  ;;  %v103_v45 = vmul.f32 %v492_v41, %v492_v41 }
  0x88   :  { %v98_v46 = vmul.f32 %v496_v43, %v496_v43 }
  0x89   :  { %v122_v48 = vsel %vm48_vm0, %v102_v44, 0.0  ;;  %v125_v49 = vsel %vm48_vm0, %v103_v45, 0.0 }
  0x8a   :  { %123 = vadd.xlane.f32.xlu0 %v122_v48  ;;  %v54_v50 = vpop.xlane.xlu0 %53  ;;  %v110_v51 = vsel %vm48_vm0, %v98_v46, 0.0 }
  0x8b   :  { %v81_v52 = vmul.f32 %v474_v22, %v54_v50  ;;  %126 = vadd.xlane.f32.xlu1 %v125_v49  ;;  %111 = vadd.xlane.f32.xlu2 %v110_v51  ;;  %v60_v53 = vpop.xlane.xlu1 %59 }
  0x8c   :  { %v83_v54 = vmul.f32 %v474_v22, %v60_v53 }
  0x8d   :  { %v511_v55 = vsub.f32 %v39_v12, %v81_v52  ;;  %v573_v52 = vld [vmem:[%s705_s1] ss:$0 sm:$0xff] }
  0x8e   :  { %v517_v58 = vsub.f32 %v41_v13, %v83_v54 }
  0x8f   :  { %v97_v57 = vmul.f32 %v511_v55, %v511_v55 }
  0x90   :  { %v99_v61 = vmul.f32 %v517_v58, %v517_v58 }
  0x91   :  { %v107_v60 = vsel %vm48_vm0, %v97_v57, 0.0 }
  0x92   :  { %120 = vadd.xlane.f32.xlu0 %v119_v59  ;;  %v113_v62 = vsel %vm48_vm0, %v99_v61, 0.0 }
  0x93   :  { %108 = vadd.xlane.f32.xlu2 %v107_v60 }
  0x9a   :  { %114 = vadd.xlane.f32.xlu0 %v113_v62 }
  0xf5   :  { %v118_v3 = vpop.xlane.xlu2 %117 }
  0xf6   :  { %v132_v4 = vmul.f32 %v118_v3, %v474_v22  ;;  %v106_v5 = vpop.xlane.xlu1 %105 }
  0xf7   :  { %v128_v6 = vmul.f32 %v106_v5, %v474_v22 }
  0xf8   :  { %v140_v7 = vadd.f32 1e-05, %v132_v4 }
  0xf9   :  { %v136_v8 = vadd.f32 1e-05, %v128_v6 }
  0xfa   :  { %382 = vrsqrt.f32 %v140_v7  ;;  %vm190_vm5 = vweird.f32 %v140_v7 }
  0xfb   :  { %384 = vrsqrt.f32 %v136_v8  ;;  %vm150_vm3 = vweird.f32 %v136_v8 }
  0xfd   :  { %v124_v9 = vpop.xlane.xlu0 %123 }
  0xfe   :  { %v134_v10 = vmul.f32 %v124_v9, %v474_v22  ;;  %v112_v11 = vpop.xlane.xlu2 %111  ;;  %v127_v12 = vpop.xlane.xlu1 %126 }
  0xff   :  { %v130_v13 = vmul.f32 %v112_v11, %v474_v22  ;;  %v135_v14 = vmul.f32 %v127_v12, %v474_v22 }
 0x100   :  { %v383_v15 = vpop.eup %382  ;;  %v541_v16 = vadd.f32 1e-05, %v134_v10 }
 0x101   :  { %v385_v17 = vpop.eup %384  ;;  %v185_v18 = vmul.f32 %v383_v15, %v140_v7  ;;  %v543_v19 = vadd.f32 1e-05, %v130_v13  ;;  %v545_v20 = vadd.f32 1e-05, %v135_v14  ;;  %vm191_vm2 = vweird.f32 %v383_v15 }
 0x102   :  { %v145_v21 = vmul.f32 %v385_v17, %v136_v8  ;;  %386 = vrsqrt.f32 %v541_v16  ;;  %vm151_vm4 = vweird.f32 %v385_v17  ;;  %vm560_vm6 = vmor %vm190_vm5, %vm191_vm2  ;;  %vm210_vm8 = vweird.f32 %v541_v16 }
 0x103   :  { %v186_v23 = vmul.f32 %v383_v15, %v185_v18  ;;  %388 = vrsqrt.f32 %v543_v19  ;;  %vm152_vm7 = vmor %vm150_vm3, %vm151_vm4  ;;  %vm170_vm9 = vweird.f32 %v543_v19  ;;  %vm220_vm10 = vweird.f32 %v545_v20 }
 0x104   :  { %v146_v24 = vmul.f32 %v385_v17, %v145_v21  ;;  %390 = vrsqrt.f32 %v545_v20 }
 0x105   :  { %v187_v25 = vmul.f32 0.5, %v186_v23  ;;  %v121_v26 = vpop.xlane.xlu0 %120 }
 0x106   :  { %v147_v27 = vmul.f32 0.5, %v146_v24  ;;  %v133_v30 = vmul.f32 %v121_v26, %v474_v22  ;;  %v109_v31 = vpop.xlane.xlu2 %108 }
 0x107   :  { %v188_v32 = vsub.f32 1.5, %v187_v25  ;;  %v129_v33 = vmul.f32 %v109_v31, %v474_v22 }
 0x108   :  { %v552_v34 = vpop.eup %386  ;;  %v148_v35 = vsub.f32 1.5, %v147_v27  ;;  %v554_v36 = vadd.f32 1e-05, %v133_v30 }
 0x109   :  { %v389_v37 = vpop.eup %388  ;;  %v189_v38 = vmul.f32 %v383_v15, %v188_v32  ;;  %v205_v39 = vmul.f32 %v552_v34, %v541_v16  ;;  %v558_v40 = vadd.f32 1e-05, %v129_v33  ;;  %vm211_vm11 = vweird.f32 %v552_v34 }
 0x10a   :  { %v391_v44 = vpop.eup %390  ;;  %v149_v46 = vmul.f32 %v385_v17, %v148_v35  ;;  %v165_v48 = vmul.f32 %v389_v37, %v543_v19  ;;  %392 = vrsqrt.f32 %v554_v36  ;;  %vm171_vm12 = vweird.f32 %v389_v37  ;;  %vm212_vm14 = vmor %vm210_vm8, %vm211_vm11 }
 0x10b   :  { %v193_v49 = vsel %vm560_vm6, %v383_v15, %v189_v38  ;;  %v206_v50 = vmul.f32 %v552_v34, %v205_v39  ;;  %v215_v51 = vmul.f32 %v391_v44, %v545_v20  ;;  %394 = vrsqrt.f32 %v558_v40  ;;  %vm172_vm15 = vmor %vm170_vm9, %vm171_vm12 }
 0x10c   :  { %v153_v53 = vsel %vm152_vm7, %v385_v17, %v149_v46  ;;  %v166_v54 = vmul.f32 %v389_v37, %v165_v48  ;;  %v228_v0 = vmul.f32 %v193_v49, %v478_v28  ;;  %vm221_vm13 = vweird.f32 %v391_v44 }
 0x10d   :  { %v207_v56 = vmul.f32 0.5, %v206_v50  ;;  %v216_v57 = vmul.f32 %v391_v44, %v215_v51  ;;  %v115_v59 = vpop.xlane.xlu0 %114  ;;  %v224_v60 = vmul.f32 %v153_v53, %v480_v29  ;;  %vm222_vm1 = vmor %vm220_vm10, %vm221_vm13  ;;  %vm200_vm3 = vweird.f32 %v554_v36 }
 0x10e   :  { %v167_v61 = vmul.f32 0.5, %v166_v54  ;;  %v131_v62 = vmul.f32 %v115_v59, %v474_v22  ;;  %v239_v22 = vmul.f32 %v573_v52, %v228_v0  ;;  %vm160_vm4 = vweird.f32 %v558_v40 }
 0x10f   :  { %v208_v1 = vsub.f32 1.5, %v207_v56  ;;  %v217_v2 = vmul.f32 0.5, %v216_v57  ;;  %v235_v3 = vmul.f32 %v573_v52, %v224_v60  ;;  %v379_v56 = vld [vmem:[%s708_s4] ss:$0 sm:$0xff]  ;;  %vm335_vm11 = vcmask 31744  }
 0x110   :  { %v393_v4 = vpop.eup %392  ;;  %v168_v29 = vsub.f32 1.5, %v167_v61  ;;  %v589_v5 = vadd.f32 1e-05, %v131_v62  ;;  %v250_v16 = vadd.f32 %v584_v63, %v239_v22 }
 0x111   :  { %v209_v6 = vmul.f32 %v552_v34, %v208_v1  ;;  %v218_v7 = vsub.f32 1.5, %v217_v2  ;;  %v195_v8 = vmul.f32 %v393_v4, %v554_v36  ;;  %v395_v28 = vpop.eup %394  ;;  %v246_v10 = vadd.f32 %v584_v63, %v235_v3 }
 0x112   :  { %v169_v9 = vmul.f32 %v389_v37, %v168_v29  ;;  %396 = vrsqrt.f32 %v589_v5  ;;  %v155_v14 = vmul.f32 %v395_v28, %v558_v40  ;;  %258 = vst.msk [vmem:[%s709_s5 + $0x20] sm:$0xff] %vm48_vm0, %v250_v16  ;;  %357 = vmatmul.msk.f32.vlgmr.msra.gmra.mxu2 %vm48_vm0, %v250_v16  ;;  %vm201_vm2 = vweird.f32 %v393_v4 }
 0x113   :  { %v213_v11 = vsel %vm212_vm14, %v552_v34, %v209_v6  ;;  %v219_v12 = vmul.f32 %v391_v44, %v218_v7  ;;  %v196_v13 = vmul.f32 %v393_v4, %v195_v8  ;;  %254 = vst.msk [vmem:[%s709_s5] sm:$0xff] %vm48_vm0, %v246_v10  ;;  %353 = vmatmul.msk.f32.vlgmr.msra.gmra.mxu0 %vm48_vm0, %v246_v10  ;;  %vm161_vm5 = vweird.f32 %v395_v28  ;;  %vm202_vm6 = vmor %vm200_vm3, %vm201_vm2 }
 0x114   :  { %v173_v15 = vsel %vm172_vm15, %v389_v37, %v169_v9  ;;  %v230_v17 = vmul.f32 %v213_v11, %v494_v42  ;;  %v156_v21 = vmul.f32 %v395_v28, %v155_v14  ;;  %vm162_vm7 = vmor %vm160_vm4, %vm161_vm5  ;;  %vm180_vm9 = vweird.f32 %v589_v5 }
 0x115   :  { %v223_v18 = vsel %vm222_vm1, %v391_v44, %v219_v12  ;;  %v197_v19 = vmul.f32 0.5, %v196_v13  ;;  %v226_v23 = vmul.f32 %v173_v15, %v496_v43 }
 0x116   :  { %v241_v20 = vmul.f32 %v573_v52, %v230_v17  ;;  %v231_v24 = vmul.f32 %v223_v18, %v492_v41  ;;  %v157_v26 = vmul.f32 0.5, %v156_v21 }
 0x117   :  { %v198_v25 = vsub.f32 1.5, %v197_v19  ;;  %v237_v42 = vmul.f32 %v573_v52, %v226_v23 }
 0x118   :  { %v397_v27 = vpop.eup %396  ;;  %v252_v43 = vadd.f32 %v584_v63, %v241_v20  ;;  %v242_v30 = vmul.f32 %v573_v52, %v231_v24  ;;  %v158_v32 = vsub.f32 1.5, %v157_v26 }
 0x119   :  { %v199_v31 = vmul.f32 %v393_v4, %v198_v25  ;;  %v175_v33 = vmul.f32 %v397_v27, %v589_v5  ;;  %v248_v41 = vadd.f32 %v584_v63, %v237_v42  ;;  %vm181_vm8 = vweird.f32 %v397_v27 }
 0x11a   :  { %260 = vst.msk [vmem:[%s709_s5 + $0x30] sm:$0xff] %vm48_vm0, %v252_v43  ;;  %359 = vmatmul.msk.f32.vlgmr.msra.gmra.mxu3 %vm48_vm0, %v252_v43  ;;  %v253_v34 = vadd.f32 %v584_v63, %v242_v30  ;;  %v159_v36 = vmul.f32 %v395_v28, %v158_v32  ;;  %vm182_vm10 = vmor %vm180_vm9, %vm181_vm8 }
 0x11b   :  { %v203_v35 = vsel %vm202_vm6, %v393_v4, %v199_v31  ;;  %v176_v37 = vmul.f32 %v397_v27, %v175_v33  ;;  %256 = vst.msk [vmem:[%s709_s5 + $0x10] sm:$0xff] %vm48_vm0, %v248_v41  ;;  %355 = vmatmul.msk.f32.vlgmr.msra.gmra.mxu1 %vm48_vm0, %v248_v41 }
 0x11c   :  { %v229_v38 = vmul.f32 %v203_v35, %v504_v47  ;;  %v163_v39 = vsel %vm162_vm7, %v395_v28, %v159_v36  ;;  %261 = vst.msk [vmem:[%s709_s5 + $0x38] sm:$0xff] %vm48_vm0, %v253_v34 }
 0x11d   :  { %v177_v44 = vmul.f32 0.5, %v176_v37  ;;  %v225_v45 = vmul.f32 %v163_v39, %v511_v55 }
 0x11e   :  { %v240_v40 = vmul.f32 %v573_v52, %v229_v38 }
 0x11f   :  { %v178_v46 = vsub.f32 1.5, %v177_v44  ;;  %v236_v48 = vmul.f32 %v573_v52, %v225_v45 }
 0x120   :  { %v251_v49 = vadd.f32 %v584_v63, %v240_v40 }
 0x121   :  { %v179_v50 = vmul.f32 %v397_v27, %v178_v46  ;;  %v247_v47 = vadd.f32 %v584_v63, %v236_v48 }
 0x122   :  { %259 = vst.msk [vmem:[%s709_s5 + $0x28] sm:$0xff] %vm48_vm0, %v251_v49  ;;  %358 = vmatmul.msk.f32.gmra.mxu2 %vm48_vm0, %v251_v49  ;;  %360 = vmatmul.msk.f32.gmra.mxu3 %vm48_vm0, %v253_v34 }
 0x123   :  { %v183_v55 = vsel %vm182_vm10, %v397_v27, %v179_v50  ;;  %255 = vst.msk [vmem:[%s709_s5 + $0x8] sm:$0xff] %vm48_vm0, %v247_v47  ;;  %354 = vmatmul.msk.f32.gmra.mxu0 %vm48_vm0, %v247_v47 }
 0x124   :  { %v227_v51 = vmul.f32 %v183_v55, %v517_v58 }
 0x126   :  { %v238_v53 = vmul.f32 %v573_v52, %v227_v51 }
 0x128   :  { %v249_v54 = vadd.f32 %v584_v63, %v238_v53 }
 0x12a   :  { %257 = vst.msk [vmem:[%s709_s5 + $0x18] sm:$0xff] %vm48_vm0, %v249_v54  ;;  %356 = vmatmul.msk.f32.gmra.mxu1 %vm48_vm0, %v249_v54 }
 0x190   :  { %v311_v57 = vpop.f32.mrf.mxu0 }
 0x191   :  { %v312_v59 = vadd.f32 %v379_v56, %v311_v57 }
 0x193   :  { %336 = vst.msk [vmem:[%s710_s6] sm:$0xff] %vm335_vm11, %v312_v59 }
 0x195   :  { %v323_v58 = vpop.f32.mrf.mxu2 }
 0x196   :  { %v324_v60 = vadd.f32 %v379_v56, %v323_v58 }
 0x198   :  { %v317_v52 = vpop.f32.mrf.mxu1  ;;  %340 = vst.msk [vmem:[%s710_s6 + $0x20] sm:$0xff] %vm335_vm11, %v324_v60 }
 0x199   :  { %v318_v61 = vadd.f32 %v379_v56, %v317_v52 }
 0x19b   :  { %338 = vst.msk [vmem:[%s710_s6 + $0x10] sm:$0xff] %vm335_vm11, %v318_v61 }
 0x19d   :  { %v329_v62 = vpop.f32.mrf.mxu3 }
 0x19e   :  { %v330_v63 = vadd.f32 %v379_v56, %v329_v62 }
 0x1a0   :  { %342 = vst.msk [vmem:[%s710_s6 + $0x30] sm:$0xff] %vm335_vm11, %v330_v63  ;;  %v314_v0 = vpop.f32.mrf.mxu0 }
 0x1a1   :  { %v315_v1 = vadd.f32 %v379_v56, %v314_v0 }
 0x1a3   :  { %337 = vst.msk [vmem:[%s710_s6 + $0x8] sm:$0xff] %vm335_vm11, %v315_v1 }
 0x1a5   :  { %v326_v2 = vpop.f32.mrf.mxu2  ;;  %v332_v3 = vpop.f32.mrf.mxu3 }
 0x1a6   :  { %v327_v4 = vadd.f32 %v379_v56, %v326_v2  ;;  %v333_v29 = vadd.f32 %v379_v56, %v332_v3 }
 0x1a7   :  { %v320_v5 = vpop.f32.mrf.mxu1 }
 0x1a8   :  { %341 = vst.msk [vmem:[%s710_s6 + $0x28] sm:$0xff] %vm335_vm11, %v327_v4  ;;  %v321_v22 = vadd.f32 %v379_v56, %v320_v5 }
 0x1a9   :  { %343 = vst.msk [vmem:[%s710_s6 + $0x38] sm:$0xff] %vm335_vm11, %v333_v29 }
 0x1aa   :  { %339 = vst.msk [vmem:[%s710_s6 + $0x18] sm:$0xff] %vm335_vm11, %v321_v22 }
 0x1ab   :  { %352 = vsyncpa [#allocation3], 1 }

// kernel: structure_module_forward.6
= control target key start
LH: loop header
LB: loop body
LE: loop exit
PB: predicated region body
PF: predicated region fallthrough
CT: control target
= control target key end

     0   :  { %s2251_s3 = smov 8   ;;  %v2252_v0 = vmov 7   ;;  %v2253_v1 = vmov 1   ;;  %s2254_s7 = smov 4   ;;  %v2255_v9 = vmov 5   ;;  %v2256_v18 = vmov 2   ;;  %s3146_s0 = inlined_call_operand.smem [shape: u32[41], index: -1, kind: input, shape index: {}] }
   0x1   :  { %s2332_s6 = sld [smem:[%s3146_s0 + %s2251_s3]]   ;;  %2180 = vset.pattern.permute.xlu1 %v2252_v0  ;;  %2178 = vset.pattern.permute.xlu0 %v2253_v1  ;;  %v2257_v21 = vmov 4   ;;  %vm207_vm0 = vcmask 523264   ;;  %v2258_v23 = vmov 8   ;;  %s2259_s14 = smov 13   ;;  %v2260_v24 = vmov 0  }
   0x2   :  { %s2031_s10 = sld [smem:[%s3146_s0 + %s2254_s7]]   ;;  %2182 = vset.pattern.permute.xlu2 %v2255_v9  ;;  %v2261_v25 = vmov 3   ;;  %v2262_v26 = vmov 6   ;;  %s2263_s18 = smov 6   ;;  %vm389_vm1 = vcmask 654336   ;;  %vm496_vm2 = vcmask 31744  }
   0x3   :  { %s2355_s13 = sld [smem:[%s3146_s0]]   ;;  %s2264_s22 = smov 9   ;;  %vm512_vm3 = vcmask 64512   ;;  %vm514_vm4 = vcmask 97280   ;;  %vm516_vm5 = vcmask 130048   ;;  %vm518_vm6 = vcmask 162816  }
   0x4   :  { %s2378_s17 = sld [smem:[%s3146_s0 + %s2259_s14]]   ;;  %s2265_s26 = smov 7   ;;  %vm545_vm7 = vcmask 171008   ;;  %vm595_vm8 = vcmask 195584   ;;  %vm1055_vm9 = vcmask 1040384   ;;  %vm1064_vm10 = vcmask 1041408  }
   0x5   :  { %s2033_s21 = sld [smem:[%s3146_s0 + %s2263_s18]]   ;;  %s2266_s30 = smov 80   ;;  %vm1073_vm11 = vcmask 1042432   ;;  %vm1275_vm12 = vcmask 1047556   ;;  %vm1343_vm13 = vcmask 261120   ;;  %vm1346_vm14 = vcmask 785408  }
   0x6   :  { %s2036_s25 = sld [smem:[%s3146_s0 + %s2264_s22]]   ;;  %s2267_s1 = smov 5  }
   0x7   :  { %v199_v2 = vld [vmem:[%s2332_s6 + $0x70] sm:$0xff]  ;;  %v200_v3 = vld [vmem:[%s2332_s6 + $0x78] sm:$0xff]  ;;  %v197_v4 = vld [vmem:[%s2332_s6 + $0x60] sm:$0xff]  ;;  %s2399_s29 = sld [smem:[%s3146_s0 + %s2265_s26]]   ;;  %s2269_s7 = smov 10  }
   0x8   :  { %247 = vmatpush.msra.mxu1 %v199_v2  ;;  %267 = vmatpush.msra.mxu2 %v200_v3  ;;  %v198_v5 = vld [vmem:[%s2332_s6 + $0x68] sm:$0xff]  ;;  %v195_v6 = vld [vmem:[%s2332_s6 + $0x50] sm:$0xff]  ;;  %v196_v7 = vld [vmem:[%s2332_s6 + $0x58] sm:$0xff]  ;;  %s2032_s5 = sld [smem:[%s3146_s0 + %s2267_s1]]   ;;  %s2270_s11 = smov 112  }
   0x9   :  { %v2345_v8 = vld [vmem:[%s2031_s10] sm:$0xff]  ;;  %v194_v11 = vld [vmem:[%s2332_s6 + $0x48] sm:$0xff]  ;;  %v191_v12 = vld [vmem:[%s2332_s6 + $0x30] sm:$0xff]  ;;  %s2436_s10 = sld [smem:[%s3146_s0 + %s2269_s7]]   ;;  %s2271_s12 = smov 96  }
   0xa   :  { %248 = vmatpush.msra.mxu1 %v197_v4  ;;  %268 = vmatpush.msra.mxu2 %v198_v5  ;;  %v193_v10 = vld [vmem:[%s2332_s6 + $0x40] sm:$0xff]  ;;  %v192_v13 = vld [vmem:[%s2332_s6 + $0x38] sm:$0xff]  ;;  %v190_v15 = vld [vmem:[%s2332_s6 + $0x28] sm:$0xff]  ;;  %s2272_s14 = smov 64   ;;  %s2273_s15 = smov 72  }
   0xb   :  { %450 = vperm.xlu1 %2180, %v2345_v8   ;;  %378 = vperm.xlu0 %2178, %v2345_v8   ;;  %v189_v14 = vld [vmem:[%s2332_s6 + $0x20] sm:$0xff]  ;;  %v187_v16 = vld [vmem:[%s2332_s6 + $0x10] sm:$0xff]  ;;  %v188_v17 = vld [vmem:[%s2332_s6 + $0x18] sm:$0xff]  ;;  %s2274_s16 = smov 76   ;;  %s2275_s18 = smov 11  }
   0xc   :  { %249 = vmatpush.msra.mxu1 %v195_v6  ;;  %269 = vmatpush.msra.mxu2 %v196_v7  ;;  %v185_v19 = vld [vmem:[%s2332_s6] sm:$0xff]  ;;  %v186_v20 = vld [vmem:[%s2332_s6 + $0x8] sm:$0xff]  ;;  %v183_v27 = vld [vmem:[%s2033_s21 + $0x38] sm:$0xff]  ;;  %s2268_s6 = smov 32   ;;  %s2276_s22 = smov 40  }
   0xd   :  { %430 = vperm.xlu2 %2182, %v2345_v8   ;;  %v167_v22 = vld [vmem:[%s2355_s13] sm:$0xff]  ;;  %v182_v28 = vld [vmem:[%s2033_s21 + $0x30] sm:$0xff]  ;;  %219 = vmatpush.msra.mxu0 %v183_v27  ;;  %v181_v29 = vld [vmem:[%s2033_s21 + $0x28] sm:$0xff]  ;;  %s2277_s23 = smov 104   ;;  %s2278_s24 = smov 108  }
   0xe   :  { %250 = vmatpush.msra.mxu1 %v193_v10  ;;  %270 = vmatpush.msra.mxu2 %v194_v11  ;;  %v180_v30 = vld [vmem:[%s2033_s21 + $0x20] sm:$0xff]  ;;  %v179_v31 = vld [vmem:[%s2033_s21 + $0x18] sm:$0xff]  ;;  %v178_v32 = vld [vmem:[%s2033_s21 + $0x10] sm:$0xff]  ;;  %s2280_s26 = smov 68   ;;  %s2281_s27 = smov 120  }
   0xf   :  { %220 = vmatpush.msra.mxu0 %v182_v28  ;;  %v177_v33 = vld [vmem:[%s2033_s21 + $0x8] sm:$0xff]  ;;  %v176_v34 = vld [vmem:[%s2033_s21] sm:$0xff]  ;;  %s2514_s21 = sld [smem:[%s3146_s0 + %s2275_s18]]   ;;  %s2282_s28 = smov 36  }
  0x10   :  { %251 = vmatpush.msra.mxu1 %v191_v12  ;;  %271 = vmatpush.msra.mxu2 %v192_v13  ;;  %v201_v36 = vld [vmem:[%s2036_s25] sm:$0x3]  ;;  %s2279_s25 = smov 52   ;;  %s2284_s1 = smov 100  }
  0x11   :  { %221 = vmatpush.msra.mxu0 %v181_v29  ;;  %v232_v37 = vperm.slane %v201_v36, 0  ;;  %v233_v43 = vperm.slane %v201_v36, 1  ;;  %v2414_v51 = vld [vmem:[%s2032_s5] sm:$0xff]  ;;  %s2285_s2 = smov 28   ;;  %s2286_s4 = smov 19  }
  0x12   :  { %252 = vmatpush.msra.mxu1 %v189_v14  ;;  %272 = vmatpush.msra.mxu2 %v190_v15  ;;  %v2208_v6 = vld [vmem:[%s2399_s29] ss:$0 sm:$0xff]  ;;  %s2283_s29 = smov 20   ;;  %s2585_s8 = sld [smem:[%s3146_s0 + %s2286_s4]]  }
  0x13   :  { %2181 = vset.pattern.permute.xlu1 %v2256_v18  ;;  %2179 = vset.pattern.permute.xlu0 %v2257_v21  ;;  %s2287_s9 = smov 60   ;;  %s2289_s20 = smov 44  }
  0x14   :  { %253 = vmatpush.msra.mxu1 %v187_v16  ;;  %273 = vmatpush.msra.mxu2 %v188_v17  ;;  %s2291_s5 = smov 84   ;;  %s2292_s7 = smov 56  }
  0x15   :  { %394 = vperm.xlu1 %2181, %v2345_v8   ;;  %415 = vperm.xlu0 %2179, %v2345_v8  }
  0x16   :  { %254 = vmatpush.msra.mxu1 %v185_v19  ;;  %274 = vmatpush.msra.mxu2 %v186_v20 }
  0x17   :  { %2069 = vmatmul.msk.f32.vlgmr.msra.gmra.mxu1 %vm207_vm0, %v167_v22  ;;  %2070 = vmatmul.msk.f32.vlgmr.msra.gmra.mxu2 %vm207_vm0, %v167_v22 }
  0x18   :  { %2183 = vset.pattern.permute.xlu2 %v2258_v23  ;;  %222 = vmatpush.msra.mxu0 %v180_v30 }
  0x19   :  { %465 = vperm.xlu2 %2183, %v2345_v8  }
  0x1a   :  { %223 = vmatpush.msra.mxu0 %v179_v31 }
  0x1c   :  { %224 = vmatpush.msra.mxu0 %v178_v32 }
  0x1d   :  { %2184 = vset.pattern.permute.xlu1 %v2260_v24  ;;  %2187 = vset.pattern.permute.xlu0 %v2260_v24 }
  0x1e   :  { %373 = vperm.xlu1 %2184, %v2345_v8   ;;  %225 = vmatpush.msra.mxu0 %v177_v33 }
  0x20   :  { %226 = vmatpush.msra.mxu0 %v176_v34 }
  0x21   :  { %2185 = vset.pattern.permute.xlu2 %v2261_v25  ;;  %2068 = vmatmul.msk.f32.vlgmr.msra.gmra.mxu0 %vm207_vm0, %v167_v22 }
  0x22   :  { %410 = vperm.xlu2 %2185, %v2345_v8  }
  0x26   :  { %2186 = vset.pattern.permute.xlu1 %v2262_v26 }
  0x27   :  { %445 = vperm.xlu1 %2186, %v2345_v8  }
  0x2a   :  { %2190 = vset.pattern.permute.xlu2 %v2253_v1 }
  0x2f   :  { %2188 = vset.pattern.permute.xlu1 %v2253_v1 }
  0x67   :  { %v431_v50 = vpop.permute.xlu2 %430 }
  0x73   :  { %v466_v56 = vpop.permute.xlu2 %465 }
  0x7c   :  { %v411_v58 = vpop.permute.xlu2 %410 }
  0x7d   :  { %v379_v35 = vpop.permute.xlu0 %378  ;;  %v451_v47 = vpop.permute.xlu1 %450 }
  0x87   :  { %v416_v39 = vpop.permute.xlu0 %415  ;;  %v395_v54 = vpop.permute.xlu1 %394 }
  0x90   :  { %v374_v61 = vpop.permute.xlu1 %373 }
  0x94   :  { %v256_v38 = vpop.f32.mrf.mxu1 }
  0x95   :  { %v2401_v40 = vadd.f32 %v256_v38, %v232_v37 }
  0x97   :  { %v418_v41 = vmul.f32 %v416_v39, %v2401_v40  ;;  %v381_v42 = vmul.f32 %v379_v35, %v2401_v40  ;;  %v453_v48 = vmul.f32 %v451_v47, %v2401_v40  ;;  %v413_v11 = vmul.f32 %v411_v58, %v2401_v40 }
  0x98   :  { %v376_v16 = vmul.f32 %v374_v61, %v2401_v40 }
  0x99   :  { %422 = vrot.lane.b32.xlu2 %v418_v41, %s2266_s30  ;;  %385 = vrot.lane.b32.xlu0 %v381_v42, %s2266_s30  ;;  %v446_v63 = vpop.permute.xlu1 %445 }
  0x9a   :  { %v276_v44 = vpop.f32.mrf.mxu2 }
  0x9b   :  { %v277_v45 = vadd.f32 %v276_v44, %v233_v43 }
  0x9d   :  { %v382_v46 = vmul.f32 %v379_v35, %v277_v45  ;;  %v419_v49 = vmul.f32 %v416_v39, %v277_v45  ;;  %v433_v52 = vmul.f32 %v431_v50, %v277_v45  ;;  %v454_v53 = vmul.f32 %v451_v47, %v277_v45 }
  0x9e   :  { %v397_v55 = vmul.f32 %v395_v54, %v277_v45  ;;  %v468_v57 = vmul.f32 %v466_v56, %v277_v45  ;;  %v228_v7 = vpop.f32.mrf.mxu0 }
  0x9f   :  { %387 = vrot.lane.b32.xlu1 %v382_v46, %s2266_s30  ;;  %v2450_v10 = vadd.f32 %v2208_v6, %v228_v7  ;;  %v2209_v46 = vld [vmem:[%s2436_s10] ss:$0 sm:$0xff]  ;;  %s2288_s10 = smov 17  }
  0xa0   :  { %s2606_s19 = sld [smem:[%s3146_s0 + %s2288_s10]]  }
  0xa1   :  { %457 = vrot.lane.b32.xlu2 %v453_v48, %s2266_s30  ;;  %424 = vrot.lane.b32.xlu0 %v419_v49, %s2266_s30 }
  0xa7   :  { %440 = vperm.xlu1 %2188, %v2414_v51  }
  0xa9   :  { %435 = vrot.lane.b32.xlu2 %v433_v52, %s2268_s6  ;;  %459 = vrot.lane.b32.xlu0 %v454_v53, %s2266_s30 }
  0xaf   :  { %399 = vrot.lane.b32.xlu1 %v397_v55, %s2268_s6 }
  0xb0   :  { %2189 = vset.pattern.permute.xlu1 %v2256_v18 }
  0xb1   :  { %470 = vrot.lane.b32.xlu2 %v468_v57, %s2268_s6  ;;  %405 = vperm.xlu0 %2187, %v2414_v51  }
  0xb7   :  { %475 = vperm.xlu1 %2189, %v2414_v51  }
  0xb9   :  { %286 = vperm.xlu2 %2190, %v2345_v8   ;;  %2191 = vset.pattern.permute.xlu0 %v2257_v21  ;;  %v448_v21 = vmul.f32 %v446_v63, %v2401_v40 }
  0xba   :  { %317 = vperm.xlu0 %2191, %v2345_v8  }
  0xbf   :  { %296 = vperm.xlu1 %2189, %v2345_v8  }
  0xc1   :  { %2192 = vset.pattern.permute.xlu2 %v2252_v0 }
  0xc2   :  { %347 = vperm.xlu2 %2192, %v2345_v8   ;;  %2198 = vset.pattern.permute.xlu0 %v2260_v24 }
  0xc7   :  { %2193 = vset.pattern.permute.xlu1 %v2255_v9 }
  0xc8   :  { %327 = vperm.xlu1 %2193, %v2345_v8  }
  0xca   :  { %2194 = vset.pattern.permute.xlu2 %v2258_v23 }
  0xcb   :  { %357 = vperm.xlu2 %2194, %v2345_v8  }
  0xd0   :  { %2195 = vset.pattern.permute.xlu1 %v2260_v24 }
  0xd1   :  { %281 = vperm.xlu1 %2195, %v2345_v8  }
  0xd3   :  { %2196 = vset.pattern.permute.xlu2 %v2261_v25 }
  0xd4   :  { %312 = vperm.xlu2 %2196, %v2345_v8  }
  0xd9   :  { %2197 = vset.pattern.permute.xlu1 %v2262_v26 }
  0xda   :  { %342 = vperm.xlu1 %2197, %v2345_v8  }
  0xdc   :  { %2199 = vset.pattern.permute.xlu2 %v2253_v1 }
  0xf3   :  { %v423_v59 = vpop.permute.xlu2 %422 }
  0xfb   :  { %v458_v60 = vpop.permute.xlu2 %457 }
 0x103   :  { %v436_v62 = vpop.permute.xlu2 %435 }
 0x10b   :  { %v471_v0 = vpop.permute.xlu2 %470  ;;  %v386_v2 = vpop.permute.xlu0 %385 }
 0x111   :  { %v388_v3 = vpop.permute.xlu1 %387 }
 0x112   :  { %v390_v13 = vsel %vm389_vm1, %v386_v2, %v388_v3 }
 0x113   :  { %v425_v4 = vpop.permute.xlu0 %424  ;;  %v2447_v5 = vpop.permute.xlu2 %286  ;;  %v392_v17 = vadd.f32 %v390_v13, %v376_v16 }
 0x114   :  { %v426_v8 = vsel %vm389_vm1, %v423_v59, %v425_v4  ;;  %v289_v42 = vmul.f32 %v2447_v5, %v2450_v10 }
 0x115   :  { %v428_v15 = vadd.f32 %v426_v8, %v413_v11  ;;  %v2562_v8 = vld [vmem:[%s2514_s21] ss:$0 sm:$0xff]  ;;  %s2290_s21 = smov 48  }
 0x117   :  { %v438_v22 = vadd.f32 %v436_v62, %v428_v15 }
 0x119   :  { %v441_v9 = vpop.permute.xlu1 %440 }
 0x11a   :  { %v2464_v28 = vadd.f32 %v441_v9, %v438_v22 }
 0x11b   :  { %v460_v1 = vpop.permute.xlu0 %459 }
 0x11c   :  { %v2453_v12 = vpop.permute.xlu2 %347  ;;  %v461_v19 = vsel %vm389_vm1, %v458_v60, %v460_v1  ;;  %v488_v34 = vmul.f32 %v2464_v28, %v2464_v28 }
 0x11d   :  { %v350_v14 = vmul.f32 %v2453_v12, %v2450_v10  ;;  %v463_v25 = vadd.f32 %v461_v19, %v448_v21 }
 0x11f   :  { %352 = vrot.lane.b32.xlu1 %v350_v14, %s2270_s11  ;;  %v473_v30 = vadd.f32 %v471_v0, %v463_v25 }
 0x121   :  { %v400_v20 = vpop.permute.xlu1 %399 }
 0x122   :  { %v402_v23 = vadd.f32 %v400_v20, %v392_v17 }
 0x123   :  { %v406_v24 = vpop.permute.xlu0 %405 }
 0x124   :  { %v2460_v26 = vadd.f32 %v406_v24, %v402_v23 }
 0x125   :  { %v2462_v27 = vpop.permute.xlu2 %357 }
 0x126   :  { %v360_v29 = vmul.f32 %v2462_v27, %v2450_v10  ;;  %v487_v31 = vmul.f32 %v2460_v26, %v2460_v26 }
 0x128   :  { %362 = vrot.lane.b32.xlu1 %v360_v29, %s2271_s12  ;;  %v489_v36 = vadd.f32 %v488_v34, %v487_v31 }
 0x129   :  { %v476_v32 = vpop.permute.xlu1 %475 }
 0x12a   :  { %v2471_v33 = vadd.f32 %v476_v32, %v473_v30 }
 0x12c   :  { %v2475_v35 = vpop.permute.xlu0 %317  ;;  %v490_v37 = vmul.f32 %v2471_v33, %v2471_v33 }
 0x12d   :  { %v320_v38 = vmul.f32 %v2475_v35, %v2450_v10 }
 0x12e   :  { %v2481_v39 = vadd.f32 %v490_v37, %v489_v36  ;;  %v2517_v49 = vpop.permute.xlu2 %312 }
 0x12f   :  { %322 = vrot.lane.b32.xlu2 %v320_v38, %s2270_s11  ;;  %v315_v60 = vmul.f32 %v2517_v49, %v2450_v10 }
 0x130   :  { %493 = vrot.lane.b32.xlu0 %v2481_v39, %s2272_s14 }
 0x131   :  { %v2486_v41 = vpop.permute.xlu1 %296 }
 0x132   :  { %v299_v45 = vmul.f32 %v2486_v41, %v2450_v10 }
 0x138   :  { %291 = vrot.lane.b32.xlu0 %v289_v42, %s2270_s11 }
 0x13a   :  { %v2491_v43 = vpop.permute.xlu1 %327 }
 0x13b   :  { %v330_v44 = vmul.f32 %v2491_v43, %v2450_v10 }
 0x13d   :  { %332 = vrot.lane.b32.xlu2 %v330_v44, %s2271_s12 }
 0x140   :  { %301 = vrot.lane.b32.xlu0 %v299_v45, %s2271_s12 }
 0x143   :  { %v2519_v52 = vpop.permute.xlu1 %281 }
 0x144   :  { %v284_v54 = vmul.f32 %v2519_v52, %v2450_v10 }
 0x145   :  { %337 = vperm.xlu2 %2199, %v2414_v51  }
 0x148   :  { %307 = vperm.xlu0 %2198, %v2414_v51  }
 0x14c   :  { %v2551_v4 = vpop.permute.xlu1 %342 }
 0x14d   :  { %2200 = vset.pattern.permute.xlu2 %v2256_v18  ;;  %v345_v9 = vmul.f32 %v2551_v4, %v2450_v10 }
 0x14e   :  { %367 = vperm.xlu2 %2200, %v2414_v51  }
 0x150   :  { %481 = vrot.lane.b32.xlu0 %v2209_v46, %s2268_s6 }
 0x151   :  { %2206 = vset.pattern.permute.xlu0 %v2256_v18 }
 0x156   :  { %525 = vrot.lane.b32.xlu2 %v2460_v26, %s2273_s15 }
 0x158   :  { %529 = vrot.lane.b32.xlu0 %v2464_v28, %s2274_s16 }
 0x15e   :  { %533 = vrot.lane.b32.xlu2 %v2471_v33, %s2266_s30 }
 0x189   :  { %v323_v51 = vpop.permute.xlu2 %322 }
 0x18a   :  { %v325_v62 = vadd.f32 %v323_v51, %v315_v60 }
 0x191   :  { %v353_v6 = vpop.permute.xlu1 %352 }
 0x192   :  { %v355_v1 = vadd.f32 %v353_v6, %v345_v9 }
 0x197   :  { %v333_v55 = vpop.permute.xlu2 %332 }
 0x198   :  { %v335_v0 = vadd.f32 %v333_v55, %v325_v62 }
 0x19a   :  { %v363_v7 = vpop.permute.xlu1 %362 }
 0x19b   :  { %v365_v13 = vadd.f32 %v363_v7, %v355_v1 }
 0x19f   :  { %v2534_v63 = vpop.permute.xlu2 %337 }
 0x1a0   :  { %v340_v2 = vadd.f32 %v2534_v63, %v335_v0 }
 0x1a2   :  { %v494_v47 = vpop.permute.xlu0 %493 }
 0x1a3   :  { %v497_v18 = vsel %vm496_vm2, %v494_v47, 0.0 }
 0x1a4   :  { %498 = vadd.xlane.f32.xlu1 %v497_v18 }
 0x1a8   :  { %v2566_v11 = vpop.permute.xlu2 %367 }
 0x1a9   :  { %v370_v16 = vadd.f32 %v2566_v11, %v365_v13 }
 0x1aa   :  { %v292_v48 = vpop.permute.xlu0 %291 }
 0x1ab   :  { %v294_v56 = vadd.f32 %v292_v48, %v284_v54 }
 0x1b0   :  { %v526_v29 = vpop.permute.xlu2 %525 }
 0x1b1   :  { %v540_v31 = vsel %vm512_vm3, %v2401_v40, %v526_v29 }
 0x1b2   :  { %v302_v50 = vpop.permute.xlu0 %301 }
 0x1b3   :  { %v304_v57 = vadd.f32 %v302_v50, %v294_v56 }
 0x1b8   :  { %v534_v30 = vpop.permute.xlu2 %533 }
 0x1ba   :  { %v2521_v53 = vpop.permute.xlu0 %307 }
 0x1bb   :  { %v310_v58 = vadd.f32 %v2521_v53, %v304_v57 }
 0x1bd   :  { %738 = vrot.lane.b32.xlu1 %v2481_v39, %s2276_s22 }
 0x1c2   :  { %v482_v59 = vpop.permute.xlu0 %481 }
 0x1c3   :  { %v2530_v61 = vmul.f32 %v482_v59, %v310_v58  ;;  %v2537_v3 = vmul.f32 %v482_v59, %v340_v2  ;;  %v2571_v17 = vmul.f32 %v482_v59, %v370_v16 }
 0x1c5   :  { %501 = vrot.lane.b32.xlu0 %v2530_v61, %s2277_s23 }
 0x1ca   :  { %v2579_v19 = vpop.permute.xlu0 %529 }
 0x1cb   :  { %v541_v32 = vsel %vm514_vm4, %v540_v31, %v2579_v19 }
 0x1cc   :  { %v542_v36 = vsel %vm516_vm5, %v541_v32, %v534_v30 }
 0x1cd   :  { %505 = vrot.lane.b32.xlu0 %v2537_v3, %s2278_s24 }
 0x1d5   :  { %620 = vrot.lane.b32.xlu0 %v2481_v39, %s2279_s25 }
 0x1dd   :  { %587 = vrot.lane.b32.xlu0 %v2460_v26, %s2280_s26 }
 0x1e5   :  { %644 = vrot.lane.b32.xlu0 %v2401_v40, %s2270_s11 }
 0x1ed   :  { %650 = vrot.lane.b32.xlu0 %v2464_v28, %s2272_s14 }
 0x1f5   :  { %627 = vrot.lane.b32.xlu0 %v2450_v10, %s2281_s27 }
 0x1fd   :  { %633 = vrot.lane.b32.xlu0 %v2537_v3, %s2277_s23 }
 0x205   :  { %881 = vrot.lane.b32.xlu0 %v2460_v26, %s2282_s28 }
 0x20d   :  { %861 = vrot.lane.b32.xlu0 %v2450_v10, %s2277_s23 }
 0x215   :  { %867 = vrot.lane.b32.xlu0 %v2537_v3, %s2271_s12 }
 0x217   :  { %v499_v14 = vpop.xlane.xlu1 %498 }
 0x218   :  { %v523_v15 = vmul.f32 %v2562_v8, %v499_v14 }
 0x21a   :  { %537 = vrot.lane.b32.xlu2 %v523_v15, %s2283_s29 }
 0x21d   :  { %870 = vrot.lane.b32.xlu0 %v2571_v17, %s2284_s1 }
 0x222   :  { %509 = vrot.lane.b32.xlu2 %v2571_v17, %s2270_s11 }
 0x22a   :  { %855 = vrot.lane.b32.xlu2 %v2481_v39, %s2285_s2 }
 0x22f   :  { %v739_v24 = vpop.permute.xlu1 %738 }
 0x230   :  { %v741_v25 = vsel %vm496_vm2, %v739_v24, 0.0 }
 0x237   :  { %v502_v20 = vpop.permute.xlu0 %501 }
 0x238   :  { %v513_v38 = vsel %vm512_vm3, %v2450_v10, %v502_v20 }
 0x23f   :  { %v506_v21 = vpop.permute.xlu0 %505 }
 0x240   :  { %v515_v39 = vsel %vm514_vm4, %v513_v38, %v506_v21 }
 0x247   :  { %v621_v22 = vpop.permute.xlu0 %620 }
 0x248   :  { %v623_v23 = vsel %vm496_vm2, %v621_v22, 0.0 }
 0x24f   :  { %v588_v56 = vpop.permute.xlu0 %587 }
 0x253   :  { %624 = vadd.xlane.f32.xlu2 %v623_v23 }
 0x257   :  { %v645_v59 = vpop.permute.xlu0 %644 }
 0x25b   :  { %742 = vadd.xlane.f32.xlu2 %v741_v25 }
 0x25f   :  { %v2652_v7 = vpop.permute.xlu0 %650 }
 0x267   :  { %v628_v15 = vpop.permute.xlu0 %627 }
 0x26f   :  { %v634_v20 = vpop.permute.xlu0 %633 }
 0x273   :  { %584 = vrot.lane.b32.xlu2 %v2401_v40, %s2281_s27 }
 0x274   :  { %v538_v34 = vpop.permute.xlu2 %537 }
 0x275   :  { %v543_v37 = vsel %vm518_vm6, %v542_v36, %v538_v34 }
 0x276   :  { %2071 = vmatpush.xpose.msk.msra.mxu3 %vm545_vm7, %v543_v37 }
 0x27b   :  { %647 = vrot.lane.b32.xlu2 %v2460_v26, %s2287_s9 }
 0x27c   :  { %v510_v42 = vpop.permute.xlu2 %509 }
 0x27d   :  { %v517_v44 = vsel %vm516_vm5, %v515_v39, %v510_v42 }
 0x27e   :  { %v519_v45 = vsel %vm518_vm6, %v517_v44, 1.0 }
 0x27f   :  { %2072 = vmatmul.msk.f32.vlgmr.msra.gmra.mxu3 %vm545_vm7, %v519_v45 }
 0x283   :  { %653 = vrot.lane.b32.xlu2 %v2471_v33, %s2280_s26 }
 0x284   :  { %v856_v46 = vpop.permute.xlu2 %855 }
 0x285   :  { %v858_v47 = vsel %vm496_vm2, %v856_v46, 0.0 }
 0x286   :  { %859 = vadd.xlane.f32.xlu1 %v858_v47 }
 0x28b   :  { %878 = vrot.lane.b32.xlu2 %v2401_v40, %s2266_s30  ;;  %s2293_s30 = smov 92  }
 0x293   :  { %887 = vrot.lane.b32.xlu2 %v2471_v33, %s2289_s20 }
 0x29b   :  { %764 = vrot.lane.b32.xlu2 %v2460_v26, %s2290_s21 }
 0x29f   :  { %590 = vrot.lane.b32.xlu1 %v2471_v33, %s2291_s5 }
 0x2a3   :  { %770 = vrot.lane.b32.xlu2 %v2471_v33, %s2292_s7 }
 0x2a7   :  { %630 = vrot.lane.b32.xlu1 %v2530_v61, %s2284_s1 }
 0x2af   :  { %636 = vrot.lane.b32.xlu1 %v2571_v17, %s2278_s24  ;;  %s2294_s24 = smov 3  }
 0x2b0   :  { %s2644_s18 = sld [smem:[%s3146_s0 + %s2294_s24]]   ;;  %s2320_s24 = smov 39  }
 0x2b6   :  { %v544_v60 = vld [vmem:[%s2644_s18] sm:$0xff] }
 0x2b7   :  { %884 = vrot.lane.b32.xlu1 %v2464_v28, %s2276_s22 }
 0x2bf   :  { %864 = vrot.lane.b32.xlu1 %v2530_v61, %s2293_s30 }
 0x2c6   :  { %v625_v18 = vpop.xlane.xlu2 %624 }
 0x2c7   :  { %v643_v48 = vmul.f32 %v2562_v8, %v625_v18  ;;  %761 = vrot.lane.b32.xlu1 %v2401_v40, %s2271_s12 }
 0x2c9   :  { %657 = vrot.lane.b32.xlu2 %v643_v48, %s2286_s4 }
 0x2ce   :  { %v743_v50 = vpop.xlane.xlu2 %742 }
 0x2cf   :  { %767 = vrot.lane.b32.xlu1 %v2464_v28, %s2279_s25  ;;  %s2295_s25 = smov 18  }
 0x2d6   :  { %v585_v51 = vpop.permute.xlu2 %584 }
 0x2d7   :  { %747 = vrot.lane.b32.xlu1 %v2530_v61, %s2271_s12  ;;  %v760_v61 = vmul.f32 %v2562_v8, %v743_v50  ;;  %v593_v9 = vsel %vm512_vm3, %v585_v51, %v588_v56 }
 0x2de   :  { %v648_v54 = vpop.permute.xlu2 %647 }
 0x2df   :  { %753 = vrot.lane.b32.xlu1 %v2571_v17, %s2277_s23  ;;  %v660_v22 = vsel %vm512_vm3, %v645_v59, %v648_v54 }
 0x2e6   :  { %v654_v55 = vpop.permute.xlu2 %653 }
 0x2ee   :  { %v879_v58 = vpop.permute.xlu2 %878 }
 0x2f6   :  { %v888_v6 = vpop.permute.xlu2 %887 }
 0x2f9   :  { %v860_v57 = vpop.xlane.xlu1 %859 }
 0x2fa   :  { %v877_v28 = vmul.f32 %v2562_v8, %v860_v57  ;;  %v594_v8 = vsel %vm516_vm5, %v593_v9, %v2579_v19  ;;  %v661_v19 = vsel %vm514_vm4, %v660_v22, %v2652_v7  ;;  %v2078_v22 = vld [vmem:[%s2644_s18 + $0x10] sm:$0xff] }
 0x2fb   :  { %v662_v29 = vsel %vm516_vm5, %v661_v19, %v654_v55 }
 0x2fc   :  { %891 = vrot.lane.b32.xlu2 %v877_v28, %s2288_s10  ;;  %s2993_s10 = sld [smem:[%s3146_s0 + %s2295_s25]]  }
 0x2fe   :  { %v765_v1 = vpop.permute.xlu2 %764 }
 0x302   :  { %v569_v62 = vpop.f32.mrf.mxu3 }
 0x303   :  { %v570_v0 = vadd.f32 %v569_v62, %v544_v60 }
 0x304   :  { %774 = vrot.lane.b32.xlu2 %v760_v61, %s2295_s25 }
 0x305   :  { %v572_v2 = vsel %vm512_vm3, %v570_v0, -inf }
 0x306   :  { %573 = vmax.xlane.f32.xlu0 %v572_v2  ;;  %v771_v17 = vpop.permute.xlu2 %770 }
 0x30c   :  { %703 = vrot.lane.b32.xlu2 %v2401_v40, %s2277_s23 }
 0x311   :  { %v591_v13 = vpop.permute.xlu1 %590 }
 0x312   :  { %v596_v14 = vsel %vm595_vm8, %v594_v8, %v591_v13 }
 0x313   :  { %615 = vmatpush.msrb.mxu3 %v596_v14 }
 0x319   :  { %v631_v16 = vpop.permute.xlu1 %630 }
 0x31a   :  { %744 = vrot.lane.b32.xlu0 %v2450_v10, %s2270_s11  ;;  %v639_v21 = vsel %vm512_vm3, %v628_v15, %v631_v16  ;;  %v882_v10 = vpop.permute.xlu0 %881 }
 0x31b   :  { %v640_v24 = vsel %vm514_vm4, %v639_v21, %v634_v20  ;;  %v894_v32 = vsel %vm512_vm3, %v879_v58, %v882_v10  ;;  %v2082_v10 = vld [vmem:[%s2644_s18 + $0x18] sm:$0xff] }
 0x321   :  { %v637_v23 = vpop.permute.xlu1 %636 }
 0x322   :  { %v641_v25 = vsel %vm516_vm5, %v640_v24, %v637_v23  ;;  %v862_v48 = vpop.permute.xlu0 %861  ;;  %v2074_v23 = vld [vmem:[%s2644_s18 + $0x8] sm:$0xff] }
 0x323   :  { %v658_v30 = vpop.permute.xlu2 %657  ;;  %v642_v9 = vsel %vm518_vm6, %v641_v25, 1.0 }
 0x324   :  { %v663_v31 = vsel %vm518_vm6, %v662_v29, %v658_v30 }
 0x325   :  { %2075 = vmatpush.xpose.msk.msra.mxu3 %vm545_vm7, %v663_v31 }
 0x329   :  { %v2672_v34 = vpop.permute.xlu1 %884 }
 0x32a   :  { %v895_v36 = vsel %vm514_vm4, %v894_v32, %v2672_v34  ;;  %v868_v54 = vpop.permute.xlu0 %867 }
 0x32b   :  { %v896_v37 = vsel %vm516_vm5, %v895_v36, %v888_v6 }
 0x331   :  { %v865_v38 = vpop.permute.xlu1 %864 }
 0x332   :  { %v871_v55 = vpop.permute.xlu0 %870 }
 0x339   :  { %v762_v39 = vpop.permute.xlu1 %761 }
 0x33a   :  { %v777_v42 = vsel %vm512_vm3, %v762_v39, %v765_v1 }
 0x341   :  { %v2678_v44 = vpop.permute.xlu1 %767 }
 0x342   :  { %v778_v45 = vsel %vm514_vm4, %v777_v42, %v2678_v44 }
 0x343   :  { %v779_v46 = vsel %vm516_vm5, %v778_v45, %v771_v17 }
 0x349   :  { %v748_v6 = vpop.permute.xlu1 %747 }
 0x351   :  { %v754_v8 = vpop.permute.xlu1 %753 }
 0x356   :  { %v892_v47 = vpop.permute.xlu2 %891 }
 0x357   :  { %v897_v18 = vsel %vm518_vm6, %v896_v37, %v892_v47 }
 0x35e   :  { %v775_v50 = vpop.permute.xlu2 %774 }
 0x35f   :  { %v780_v51 = vsel %vm518_vm6, %v779_v46, %v775_v50 }
 0x360   :  { %2079 = vmatpush.xpose.msk.msrb.mxu1 %vm545_vm7, %v780_v51 }
 0x366   :  { %v2718_v39 = vpop.permute.xlu2 %703 }
 0x379   :  { %v574_v56 = vpop.xlane.xlu0 %573 }
 0x37a   :  { %v575_v57 = vsub.f32 %v570_v0, %v574_v56  ;;  %v873_v0 = vsel %vm512_vm3, %v862_v48, %v865_v38  ;;  %v2201_v38 = vpack.i.bf16 %v2401_v40, %v2471_v33 }
 0x37c   :  { %v576_v28 = vmul.f32 1.442695, %v575_v57 }
 0x37e   :  { %2226 = vpow2.f32 %v576_v28 }
 0x384   :  { %v2227_v58 = vpop.eup %2226 }
 0x385   :  { %v578_v59 = vsel %vm512_vm3, %v2227_v58, 0.0 }
 0x386   :  { %579 = vadd.xlane.f32.xlu0 %v578_v59 }
 0x38c   :  { %v745_v60 = vpop.permute.xlu0 %744 }
 0x38d   :  { %v756_v1 = vsel %vm512_vm3, %v745_v60, %v748_v6 }
 0x39a   :  { %750 = vrot.lane.b32.xlu0 %v2537_v3, %s2284_s1  ;;  %v874_v3 = vsel %vm514_vm4, %v873_v0, %v868_v54  ;;  %s2296_s1 = smov 88  }
 0x39b   :  { %v875_v16 = vsel %vm516_vm5, %v874_v3, %v871_v55 }
 0x39c   :  { %v876_v20 = vsel %vm518_vm6, %v875_v16, 1.0 }
 0x3f9   :  { %v580_v61 = vpop.xlane.xlu0 %579 }
 0x3fa   :  { %2228 = vrcp.f32 %v580_v61 }
 0x400   :  { %v2229_v62 = vpop.eup %2228 }
 0x401   :  { %v2689_v2 = vmul.f32 %v2229_v62, %v2227_v58 }
 0x403   :  { %2073 = vmatmul.msk.f32.vlgmr.msrb.gmra.mxu3 %vm512_vm3, %v2689_v2 }
 0x404   :  { %2083 = vmatpush.xpose.msk.msrb.mxu3 %vm545_vm7, %v897_v18 }
 0x40b   :  { %2076 = vmatmul.msk.f32.vlgmr.msra.gmra.mxu3 %vm545_vm7, %v642_v9 }
 0x40c   :  { %v751_v13 = vpop.permute.xlu0 %750 }
 0x40d   :  { %v757_v14 = vsel %vm514_vm4, %v756_v1, %v751_v13 }
 0x40e   :  { %v758_v15 = vsel %vm516_vm5, %v757_v14, %v754_v8 }
 0x40f   :  { %v759_v17 = vsel %vm518_vm6, %v758_v15, 1.0 }
 0x410   :  { %2080 = vmatmul.msk.f32.vlgmr.msrb.gmra.mxu1 %vm545_vm7, %v759_v17 }
 0x413   :  { %2084 = vmatmul.msk.f32.vlgmr.msrb.gmra.mxu3 %vm545_vm7, %v876_v20 }
 0x486   :  { %v2706_v21 = vpop.f32.mrf.mxu3 }
 0x48d   :  { %v806_v24 = vpop.f32.mrf.mxu1 }
 0x48e   :  { %v807_v19 = vadd.f32 %v2078_v22, %v806_v24  ;;  %v689_v25 = vpop.f32.mrf.mxu3 }
 0x48f   :  { %v690_v29 = vadd.f32 %v2074_v23, %v689_v25 }
 0x490   :  { %v809_v30 = vsel %vm512_vm3, %v807_v19, -inf }
 0x491   :  { %810 = vmax.xlane.f32.xlu0 %v809_v30  ;;  %v692_v31 = vsel %vm512_vm3, %v690_v29, -inf }
 0x492   :  { %693 = vmax.xlane.f32.xlu2 %v692_v31 }
 0x496   :  { %v923_v32 = vpop.f32.mrf.mxu3 }
 0x497   :  { %v924_v36 = vadd.f32 %v2082_v10, %v923_v32 }
 0x499   :  { %v926_v37 = vsel %vm512_vm3, %v924_v36, -inf }
 0x49a   :  { %927 = vmax.xlane.f32.xlu1 %v926_v37 }
 0x4aa   :  { %820 = vrot.lane.b32.xlu2 %v2401_v40, %s2296_s1 }
 0x4b3   :  { %2202 = vrot.lane.b32.xlu1 %v2201_v38, %s2273_s15  ;;  %s2297_s15 = smov 2  }
 0x4b4   :  { %s2740_s5 = sld [smem:[%s3146_s0 + %s2297_s15]]  }
 0x4b5   :  { %s3044_s15 = sld [smem:[%s3146_s0 + %s2285_s2]]  }
 0x4ba   :  { %v1084_v59 = vld [vmem:[%s2740_s5 + $0x10] sm:$0xff] }
 0x4bb   :  { %1154 = vmatpush.msra.mxu3 %v1084_v59  ;;  %v1088_v61 = vld [vmem:[%s2740_s5 + $0x30] sm:$0xff] }
 0x4bd   :  { %1246 = vmatpush.msrb.mxu3 %v1088_v61 }
 0x504   :  { %v811_v42 = vpop.xlane.xlu0 %810 }
 0x505   :  { %v812_v45 = vsub.f32 %v807_v19, %v811_v42  ;;  %v694_v46 = vpop.xlane.xlu2 %693  ;;  %v973_v19 = vrot.slane %v2689_v2, 2 }
 0x506   :  { %v695_v47 = vsub.f32 %v690_v29, %v694_v46 }
 0x507   :  { %v813_v18 = vmul.f32 1.442695, %v812_v45 }
 0x508   :  { %v696_v48 = vmul.f32 1.442695, %v695_v47 }
 0x509   :  { %2230 = vpow2.f32 %v813_v18 }
 0x50a   :  { %2232 = vpow2.f32 %v696_v48 }
 0x50d   :  { %v928_v50 = vpop.xlane.xlu1 %927  ;;  %v2744_v60 = vpop.permute.xlu2 %820 }
 0x50e   :  { %v929_v51 = vsub.f32 %v924_v36, %v928_v50 }
 0x50f   :  { %v2231_v54 = vpop.eup %2230 }
 0x510   :  { %v2233_v55 = vpop.eup %2232  ;;  %v930_v56 = vmul.f32 1.442695, %v929_v51  ;;  %v815_v57 = vsel %vm512_vm3, %v2231_v54, 0.0 }
 0x511   :  { %816 = vadd.xlane.f32.xlu0 %v815_v57  ;;  %v698_v40 = vsel %vm512_vm3, %v2233_v55, 0.0 }
 0x512   :  { %2234 = vpow2.f32 %v930_v56  ;;  %699 = vadd.xlane.f32.xlu2 %v698_v40 }
 0x518   :  { %v2235_v28 = vpop.eup %2234 }
 0x519   :  { %v932_v58 = vsel %vm512_vm3, %v2235_v28, 0.0 }
 0x51a   :  { %933 = vadd.xlane.f32.xlu1 %v932_v58  ;;  %v977_v58 = vrot.slane %v2689_v2, 6 }
 0x525   :  { %706 = vrot.lane.b32.xlu0 %v2460_v26, %s2292_s7  ;;  %v2748_v6 = vpop.permute.xlu1 %2202  ;;  %s2063_s7 = sld [smem:[%s3146_s0 + %s2282_s28]]  }
 0x526   :  { %v2204_v25 = vunpack.i.l.bf16 %v2748_v6 }
 0x52a   :  { %940 = vrot.lane.b32.xlu2 %v2460_v26, %s2268_s6 }
 0x52d   :  { %823 = vrot.lane.b32.xlu0 %v2460_v26, %s2289_s20  ;;  %v1082_v26 = vld [vmem:[%s2740_s5] sm:$0xff] }
 0x52e   :  { %1108 = vmatpush.msra.mxu1 %v1082_v26 }
 0x532   :  { %1376 = vrot.lane.b32.xlu2 %v2706_v21, %s2270_s11 }
 0x533   :  { %826 = vrot.lane.b32.xlu1 %v2471_v33, %s2287_s9  ;;  %s2298_s9 = smov 16  }
 0x534   :  { %s2043_s1 = sld [smem:[%s3146_s0 + %s2298_s9]]  }
 0x535   :  { %943 = vrot.lane.b32.xlu0 %v2471_v33, %s2290_s21  ;;  %v1086_v33 = vld [vmem:[%s2740_s5 + $0x20] sm:$0xff] }
 0x536   :  { %1200 = vmatpush.msrb.mxu1 %v1086_v33 }
 0x53b   :  { %1364 = vrot.lane.b32.xlu1 %v2706_v21, %s2281_s27 }
 0x584   :  { %v817_v62 = vpop.xlane.xlu0 %816 }
 0x585   :  { %v700_v0 = vpop.xlane.xlu2 %699 }
 0x586   :  { %2236 = vrcp.f32 %v700_v0 }
 0x587   :  { %2238 = vrcp.f32 %v817_v62 }
 0x58c   :  { %v2237_v9 = vpop.eup %2236 }
 0x58d   :  { %v2239_v3 = vpop.eup %2238  ;;  %v2750_v1 = vmul.f32 %v2237_v9, %v2233_v55  ;;  %v934_v13 = vpop.xlane.xlu1 %933  ;;  %v975_v55 = vrot.slane %v2689_v2, 4 }
 0x58e   :  { %2240 = vrcp.f32 %v934_v13  ;;  %v2753_v14 = vmul.f32 %v2239_v3, %v2231_v54  ;;  %v941_v9 = vpop.permute.xlu2 %940  ;;  %v2205_v13 = vunpack.i.h.bf16 %v2748_v6 }
 0x58f   :  { %v987_v8 = vrot.slane %v2750_v1, 2  ;;  %v1007_v15 = vperm.slane %v2750_v1, 0  ;;  %v989_v22 = vrot.slane %v2750_v1, 4  ;;  %v991_v36 = vrot.slane %v2750_v1, 6 }
 0x590   :  { %v994_v20 = vrot.slane %v2753_v14, 2  ;;  %v1023_v29 = vperm.slane %v2753_v14, 0 }
 0x591   :  { %v1009_v16 = vperm.slane %v987_v8, 0  ;;  %v1056_v24 = vsel %vm1055_vm9, %v2689_v2, %v1007_v15  ;;  %v1011_v45 = vperm.slane %v989_v22, 0  ;;  %v1013_v57 = vperm.slane %v991_v36, 0  ;;  %v1085_v36 = vld [vmem:[%s2740_s5 + $0x18] sm:$0xff] }
 0x592   :  { %v1065_v38 = vsel %vm1064_vm10, %v1056_v24, %v1023_v29  ;;  %v1025_v42 = vperm.slane %v994_v20, 0  ;;  %v946_v20 = vsel %vm512_vm3, %v2205_v13, %v941_v9  ;;  %v978_v9 = vrot.slane %v2689_v2, 7 }
 0x593   :  { %v1058_v32 = vsel %vm1055_vm9, %v973_v19, %v1009_v16  ;;  %v1062_v61 = vsel %vm1055_vm9, %v977_v58, %v1013_v57  ;;  %v1083_v19 = vld [vmem:[%s2740_s5 + $0x8] sm:$0xff]  ;;  %v997_v58 = vrot.slane %v2753_v14, 5 }
 0x594   :  { %v2241_v17 = vpop.eup %2240  ;;  %v1067_v51 = vsel %vm1064_vm10, %v1058_v32, %v1025_v42  ;;  %v1089_v42 = vld [vmem:[%s2740_s5 + $0x38] sm:$0xff] }
 0x595   :  { %v2758_v23 = vmul.f32 %v2241_v17, %v2235_v28  ;;  %v1060_v28 = vsel %vm1055_vm9, %v975_v55, %v1011_v45  ;;  %v986_v17 = vrot.slane %v2750_v1, 1  ;;  %v995_v45 = vrot.slane %v2753_v14, 3 }
 0x597   :  { %v707_v30 = vpop.permute.xlu0 %706  ;;  %v1039_v31 = vperm.slane %v2758_v23, 0  ;;  %v1001_v10 = vrot.slane %v2758_v23, 2  ;;  %v1003_v48 = vrot.slane %v2758_v23, 4  ;;  %v1005_v56 = vrot.slane %v2758_v23, 6 }
 0x598   :  { %v712_v37 = vsel %vm512_vm3, %v2718_v39, %v707_v30  ;;  %v996_v39 = vrot.slane %v2753_v14, 4  ;;  %v1000_v30 = vrot.slane %v2758_v23, 1 }
 0x599   :  { %v1074_v46 = vsel %vm1073_vm11, %v1065_v38, %v1039_v31  ;;  %v713_v47 = vsel %vm516_vm5, %v712_v37, %v2652_v7  ;;  %v1041_v18 = vperm.slane %v1001_v10, 0  ;;  %v998_v7 = vrot.slane %v2753_v14, 6  ;;  %v1087_v10 = vld [vmem:[%s2740_s5 + $0x28] sm:$0xff]  ;;  %s2310_s5 = smov 26  }
 0x59a   :  { %2086 = vmatmul.msk.f32.vlgmr.msra.gmra.mxu1 %vm512_vm3, %v1074_v46  ;;  %v714_v50 = vsel %vm595_vm8, %v713_v47, %v2204_v25  ;;  %v1043_v40 = vperm.slane %v1003_v48, 0  ;;  %v1027_v26 = vperm.slane %v996_v39, 0  ;;  %v1045_v33 = vperm.slane %v1005_v56, 0  ;;  %s3055_s2 = sld [smem:[%s3146_s0 + %s2310_s5]]   ;;  %s2322_s5 = smov 70  }
 0x59b   :  { %733 = vmatpush.msrb.mxu0 %v714_v50  ;;  %v1076_v54 = vsel %vm1073_vm11, %v1067_v51, %v1041_v18  ;;  %v1029_v0 = vperm.slane %v998_v7, 0  ;;  %v947_v25 = vsel %vm516_vm5, %v946_v20, %v2672_v34  ;;  %v1008_v31 = vperm.slane %v986_v17, 0 }
 0x59c   :  { %2077 = vmatmul.msk.f32.vlgmr.msrb.gmra.mxu0 %vm512_vm3, %v2750_v1  ;;  %2088 = vmatmul.msk.f32.vlgmr.msra.gmra.mxu3 %vm512_vm3, %v1076_v54  ;;  %v1069_v62 = vsel %vm1064_vm10, %v1060_v28, %v1027_v26  ;;  %v972_v37 = vrot.slane %v2689_v2, 1  ;;  %v1002_v38 = vrot.slane %v2758_v23, 3  ;;  %v1040_v46 = vperm.slane %v1000_v30, 0 }
 0x59d   :  { %v1078_v3 = vsel %vm1073_vm11, %v1069_v62, %v1043_v40  ;;  %v1071_v15 = vsel %vm1064_vm10, %v1062_v61, %v1029_v0  ;;  %v974_v18 = vrot.slane %v2689_v2, 3  ;;  %v990_v48 = vrot.slane %v2750_v1, 5 }
 0x59e   :  { %v1080_v16 = vsel %vm1073_vm11, %v1071_v15, %v1045_v33  ;;  %v1057_v47 = vsel %vm1055_vm9, %v972_v37, %v1008_v31  ;;  %v1042_v51 = vperm.slane %v1002_v38, 0  ;;  %v992_v54 = vrot.slane %v2750_v1, 7 }
 0x59f   :  { %v824_v59 = vpop.permute.xlu0 %823  ;;  %v1026_v56 = vperm.slane %v995_v45, 0  ;;  %v1004_v7 = vrot.slane %v2758_v23, 5  ;;  %v1012_v40 = vperm.slane %v990_v48, 0  ;;  %v999_v61 = vrot.slane %v2753_v14, 7 }
 0x5a0   :  { %v829_v8 = vsel %vm512_vm3, %v2744_v60, %v824_v59  ;;  %v988_v60 = vrot.slane %v2750_v1, 3  ;;  %v976_v59 = vrot.slane %v2689_v2, 5  ;;  %v1006_v1 = vrot.slane %v2758_v23, 7 }
 0x5a1   :  { %v830_v6 = vsel %vm516_vm5, %v829_v8, %v2678_v44  ;;  %v993_v44 = vrot.slane %v2753_v14, 1  ;;  %v1014_v33 = vperm.slane %v992_v54, 0  ;;  %v1044_v62 = vperm.slane %v1004_v7, 0 }
 0x5a2   :  { %2090 = vmatmul.msk.f32.vlgmr.msrb.gmra.mxu1 %vm512_vm3, %v1078_v3  ;;  %v1010_v34 = vperm.slane %v988_v60, 0  ;;  %v1061_v0 = vsel %vm1055_vm9, %v976_v59, %v1012_v40  ;;  %v1028_v3 = vperm.slane %v997_v58, 0  ;;  %v1046_v13 = vperm.slane %v1006_v1, 0 }
 0x5a3   :  { %v1024_v50 = vperm.slane %v993_v44, 0  ;;  %v1063_v8 = vsel %vm1055_vm9, %v978_v9, %v1014_v33  ;;  %v2299_v60 = vmov 1983009808  }
 0x5a4   :  { %2092 = vmatmul.msk.f32.vlgmr.msrb.gmra.mxu3 %vm512_vm3, %v1080_v16  ;;  %v1059_v39 = vsel %vm1055_vm9, %v974_v18, %v1010_v34  ;;  %v1070_v15 = vsel %vm1064_vm10, %v1061_v0, %v1028_v3  ;;  %v1030_v16 = vperm.slane %v999_v61, 0  ;;  %v2300_v34 = vmov 1934713408  }
 0x5a5   :  { %v827_v22 = vpop.permute.xlu1 %826  ;;  %v1066_v55 = vsel %vm1064_vm10, %v1057_v47, %v1024_v50  ;;  %v1068_v28 = vsel %vm1064_vm10, %v1059_v39, %v1026_v56  ;;  %v1079_v17 = vsel %vm1073_vm11, %v1070_v15, %v1044_v62  ;;  %vm2019_vm9 = vcmask 572416  }
 0x5a6   :  { %v831_v24 = vsel %vm595_vm8, %v830_v6, %v827_v22  ;;  %v1075_v57 = vsel %vm1073_vm11, %v1066_v55, %v1040_v46  ;;  %v1077_v26 = vsel %vm1073_vm11, %v1068_v28, %v1042_v51 }
 0x5a7   :  { %850 = vmatpush.msrb.mxu2 %v831_v24  ;;  %v944_v29 = vpop.permute.xlu0 %943  ;;  %v1278_v24 = vunpack.c.l.s4 %v2299_v60 }
 0x5a8   :  { %v948_v32 = vsel %vm595_vm8, %v947_v25, %v944_v29  ;;  %2081 = vmatmul.msk.f32.vlgmr.msrb.gmra.mxu2 %vm512_vm3, %v2753_v14 }
 0x5a9   :  { %967 = vmatpush.msra.mxu0 %v948_v32  ;;  %1131 = vmatpush.msra.mxu2 %v1083_v19  ;;  %v1279_v29 = vunpack.c.0.s8 %v1278_v24 }
 0x5aa   :  { %2085 = vmatmul.msk.f32.vlgmr.msra.gmra.mxu0 %vm512_vm3, %v2758_v23  ;;  %v1072_v23 = vsel %vm1064_vm10, %v1063_v8, %v1030_v16  ;;  %vm2021_vm10 = vcmask 687104  }
 0x5ab   :  { %1223 = vmatpush.msrb.mxu2 %v1087_v10  ;;  %1177 = vmatpush.msrb.mxu0 %v1085_v36  ;;  %v1081_v14 = vsel %vm1073_vm11, %v1072_v23, %v1046_v13 }
 0x5ad   :  { %1269 = vmatpush.msra.mxu0 %v1089_v42  ;;  %v1304_v42 = vunpack.c.l.s4 %v2300_v34  ;;  %v1365_v23 = vpop.permute.xlu1 %1364 }
 0x5af   :  { %v1305_v51 = vunpack.c.0.s8 %v1304_v42 }
 0x5b0   :  { %2087 = vmatmul.msk.f32.vlgmr.msra.gmra.mxu2 %vm512_vm3, %v1075_v57 }
 0x5b2   :  { %2089 = vmatmul.msk.f32.vlgmr.msrb.gmra.mxu0 %vm512_vm3, %v1077_v26 }
 0x5b8   :  { %2091 = vmatmul.msk.f32.vlgmr.msrb.gmra.mxu2 %vm512_vm3, %v1079_v17 }
 0x5ba   :  { %2093 = vmatmul.msk.f32.vlgmr.msra.gmra.mxu0 %vm512_vm3, %v1081_v14  ;;  %v1377_v14 = vpop.permute.xlu2 %1376 }
 0x617   :  { %v1110_v6 = vpop.f32.mrf.mxu1 }
 0x619   :  { %v2846_v20 = vpop.f32.mrf.mxu0 }
 0x61a   :  { %1391 = vrot.lane.b32.xlu2 %v2846_v20, %s2270_s11  ;;  %s2301_s11 = smov 24  }
 0x61b   :  { %s3050_s25 = sld [smem:[%s3146_s0 + %s2301_s11]]  }
 0x61f   :  { %v1156_v2 = vpop.f32.mrf.mxu3  ;;  %v1202_v45 = vpop.f32.mrf.mxu1 }
 0x620   :  { %v1274_v25 = vrot.slane %v1156_v2, 4 }
 0x622   :  { %v1276_v10 = vsel %vm1275_vm12, %v1274_v25, %v1110_v6 }
 0x623   :  { %v1280_v36 = vperm.slane %v1276_v10, %v1279_v29 }
 0x625   :  { %v1301_v18 = vrot.slane %v1280_v36, 4 }
 0x627   :  { %v2850_v22 = vpop.f32.mrf.mxu0  ;;  %v1248_v30 = vpop.f32.mrf.mxu3 }
 0x628   :  { %1370 = vrot.lane.b32.xlu2 %v2850_v22, %s2298_s9  ;;  %v1287_v32 = vrot.slane %v1248_v30, 4 }
 0x62a   :  { %v1288_v47 = vsel %vm1275_vm12, %v1287_v32, %v1202_v45 }
 0x62b   :  { %v2854_v19 = vpop.f32.mrf.mxu2  ;;  %v1292_v39 = vperm.slane %v1288_v47, %v1279_v29 }
 0x62c   :  { %1394 = vrot.lane.b32.xlu0 %v2854_v19, %s2281_s27  ;;  %1367 = vrot.lane.b32.xlu1 %v2854_v19, %s2251_s3 }
 0x62d   :  { %v1313_v28 = vrot.slane %v1292_v39, 4 }
 0x62f   :  { %v1179_v31 = vpop.f32.mrf.mxu0 }
 0x630   :  { %v1281_v44 = vrot.slane %v1179_v31, 4 }
 0x633   :  { %v1133_v37 = vpop.f32.mrf.mxu2 }
 0x634   :  { %v1282_v38 = vsel %vm1275_vm12, %v1281_v44, %v1133_v37  ;;  %1379 = vrot.lane.b32.xlu0 %v2846_v20, %s2281_s27  ;;  %1388 = vrot.lane.b32.xlu1 %v2706_v21, %s2277_s23  ;;  %s2302_s23 = smov 12  }
 0x635   :  { %v1286_v46 = vperm.slane %v1282_v38, %v1279_v29  ;;  %s2890_s21 = sld [smem:[%s3146_s0 + %s2302_s23]]  }
 0x637   :  { %v1299_v48 = vrot.slane %v1286_v46, 4  ;;  %v1271_v50 = vpop.f32.mrf.mxu0  ;;  %v1302_v54 = vsel %vm1275_vm12, %v1286_v46, %v1301_v18 }
 0x638   :  { %v1293_v55 = vrot.slane %v1271_v50, 4  ;;  %v1310_v40 = vperm.slane %v1302_v54, %v1305_v51 }
 0x639   :  { %v1300_v57 = vsel %vm1275_vm12, %v1299_v48, %v1280_v36 }
 0x63a   :  { %v1306_v26 = vperm.slane %v1300_v57, %v1305_v51  ;;  %v1329_v61 = vrot.slane %v1310_v40, 4 }
 0x63b   :  { %v1225_v56 = vpop.f32.mrf.mxu2  ;;  %v1487_v24 = vld [vmem:[%s2890_s21 + $0xf8] sm:$0xff]  ;;  %v1486_v25 = vld [vmem:[%s2890_s21 + $0xf0] sm:$0xff] }
 0x63c   :  { %v1294_v7 = vsel %vm1275_vm12, %v1293_v55, %v1225_v56  ;;  %1382 = vrot.lane.b32.xlu0 %v2850_v22, %s2251_s3  ;;  %v1325_v13 = vrot.slane %v1306_v26, 4  ;;  %1519 = vmatpush.msra.mxu2 %v1487_v24  ;;  %v1463_v24 = vld [vmem:[%s2890_s21 + $0x38] sm:$0xff] }
 0x63d   :  { %v1298_v58 = vperm.slane %v1294_v7, %v1279_v29  ;;  %v1373_v29 = vsel %vm512_vm3, %v1365_v23, %v2846_v20  ;;  %v1479_v23 = vld [vmem:[%s2890_s21 + $0xb8] sm:$0xff] }
 0x63e   :  { %1520 = vmatpush.msra.mxu2 %v1486_v25  ;;  %v1476_v25 = vld [vmem:[%s2890_s21 + $0xa0] sm:$0xff] }
 0x63f   :  { %v1311_v59 = vrot.slane %v1298_v58, 4  ;;  %v1314_v1 = vsel %vm1275_vm12, %v1298_v58, %v1313_v28 }
 0x640   :  { %v1322_v33 = vperm.slane %v1314_v1, %v1305_v51  ;;  %v1471_v1 = vld [vmem:[%s2890_s21 + $0x78] sm:$0xff] }
 0x641   :  { %v1312_v62 = vsel %vm1275_vm12, %v1311_v59, %v1292_v39  ;;  %v1484_v59 = vld [vmem:[%s2890_s21 + $0xe0] sm:$0xff]  ;;  %1499 = vmatpush.msra.mxu1 %v1471_v1 }
 0x642   :  { %v1330_v0 = vsel %vm1275_vm12, %v1322_v33, %v1329_v61  ;;  %v1327_v9 = vrot.slane %v1322_v33, 4  ;;  %v1318_v3 = vperm.slane %v1312_v62, %v1305_v51  ;;  %v1470_v33 = vld [vmem:[%s2890_s21 + $0x70] sm:$0xff]  ;;  %v1483_v61 = vld [vmem:[%s2890_s21 + $0xd8] sm:$0xff]  ;;  %v1469_v62 = vld [vmem:[%s2890_s21 + $0x68] sm:$0xff] }
 0x643   :  { %1500 = vmatpush.msra.mxu1 %v1470_v33 }
 0x644   :  { %1340 = vrot.lane.b32.xlu0 %v1330_v0, %s2271_s12  ;;  %v1328_v8 = vsel %vm1275_vm12, %v1327_v9, %v1310_v40  ;;  %v1326_v15 = vsel %vm1275_vm12, %v1318_v3, %v1325_v13  ;;  %v1323_v16 = vrot.slane %v1318_v3, 4  ;;  %v1482_v0 = vld [vmem:[%s2890_s21 + $0xd0] sm:$0xff]  ;;  %v1468_v9 = vld [vmem:[%s2890_s21 + $0x60] sm:$0xff]  ;;  %v1481_v3 = vld [vmem:[%s2890_s21 + $0xc8] sm:$0xff] }
 0x645   :  { %1336 = vrot.lane.b32.xlu2 %v1328_v8, %s2272_s14  ;;  %1332 = vrot.lane.b32.xlu1 %v1326_v15, %s2268_s6  ;;  %v1467_v13 = vld [vmem:[%s2890_s21 + $0x58] sm:$0xff]  ;;  %v1490_v15 = vld [vmem:[%s2890_s21 + $0x110] sm:$0xff] }
 0x646   :  { %v1324_v17 = vsel %vm1275_vm12, %v1323_v16, %v1306_v26  ;;  %v1485_v26 = vld [vmem:[%s2890_s21 + $0xe8] sm:$0xff]  ;;  %1501 = vmatpush.msra.mxu1 %v1469_v62  ;;  %v1491_v8 = vld [vmem:[%s2890_s21 + $0x118] sm:$0xff]  ;;  %v1480_v16 = vld [vmem:[%s2890_s21 + $0xc0] sm:$0xff]  ;;  %v2304_v62 = vmov 64.0  }
 0x647   :  { %1521 = vmatpush.msra.mxu2 %v1485_v26  ;;  %1551 = vmatpush.msra.mxu3 %v1491_v8 }
 0x648   :  { %1502 = vmatpush.msra.mxu1 %v1468_v9 }
 0x649   :  { %1522 = vmatpush.msra.mxu2 %v1484_v59  ;;  %1552 = vmatpush.msra.mxu3 %v1490_v15 }
 0x64a   :  { %1503 = vmatpush.msra.mxu1 %v1467_v13 }
 0x64b   :  { %1523 = vmatpush.msra.mxu2 %v1483_v61 }
 0x64c   :  { %1353 = vrot.lane.b32.xlu0 %v2854_v19, %s2298_s9  ;;  %s2047_s9 = sld [smem:[%s3146_s0 + %s2283_s29]]   ;;  %s2306_s29 = smov 21  }
 0x64d   :  { %1349 = vrot.lane.b32.xlu2 %v2846_v20, %s2251_s3  ;;  %1357 = vrot.lane.b32.xlu1 %v2850_v22, %s2301_s11  ;;  %s2303_s3 = smov 14   ;;  %s2048_s20 = sld [smem:[%s3146_s0 + %s2306_s29]]  }
 0x64e   :  { %1524 = vmatpush.msra.mxu2 %v1482_v0  ;;  %s2973_s30 = sld [smem:[%s3146_s0 + %s2303_s3]]   ;;  %s2311_s11 = smov 1  }
 0x650   :  { %1525 = vmatpush.msra.mxu2 %v1481_v3 }
 0x652   :  { %1526 = vmatpush.msra.mxu2 %v1480_v16 }
 0x654   :  { %1527 = vmatpush.msra.mxu2 %v1479_v23 }
 0x674   :  { %v1392_v60 = vpop.permute.xlu2 %1391 }
 0x682   :  { %v1371_v44 = vpop.permute.xlu2 %1370 }
 0x69e   :  { %v1368_v2 = vpop.permute.xlu1 %1367  ;;  %v1395_v6 = vpop.permute.xlu0 %1394 }
 0x69f   :  { %v1374_v10 = vsel %vm516_vm5, %v1373_v29, %v1368_v2  ;;  %v1478_v2 = vld [vmem:[%s2890_s21 + $0xb0] sm:$0xff] }
 0x6a0   :  { %v1375_v37 = vsel %vm595_vm8, %v1374_v10, %v1371_v44  ;;  %1528 = vmatpush.msra.mxu2 %v1478_v2  ;;  %v1462_v29 = vld [vmem:[%s2890_s21 + $0x30] sm:$0xff]  ;;  %v1461_v44 = vld [vmem:[%s2890_s21 + $0x28] sm:$0xff] }
 0x6a1   :  { %v1400_v42 = vsub.f32 %v1375_v37, %v2521_v53  ;;  %v1474_v10 = vld [vmem:[%s2890_s21 + $0x90] sm:$0xff]  ;;  %v1488_v37 = vld [vmem:[%s2890_s21 + $0x100] sm:$0xff] }
 0x6a3   :  { %v1408_v48 = vmul.f32 %v1400_v42, %v2447_v5  ;;  %v1403_v50 = vmul.f32 %v1400_v42, %v2519_v52  ;;  %v1413_v39 = vmul.f32 %v1400_v42, %v2486_v41 }
 0x6a6   :  { %v1389_v30 = vpop.permute.xlu1 %1388  ;;  %v1380_v31 = vpop.permute.xlu0 %1379 }
 0x6a7   :  { %v1397_v32 = vsel %vm512_vm3, %v1389_v30, %v1392_v60  ;;  %v1385_v38 = vsel %vm512_vm3, %v1377_v14, %v1380_v31  ;;  %v1465_v14 = vld [vmem:[%s2890_s21 + $0x48] sm:$0xff]  ;;  %v1475_v31 = vld [vmem:[%s2890_s21 + $0x98] sm:$0xff] }
 0x6a8   :  { %v1398_v36 = vsel %vm516_vm5, %v1397_v32, %v1395_v6  ;;  %v1386_v20 = vsel %vm516_vm5, %v1385_v38, %v2854_v19  ;;  %v1464_v6 = vld [vmem:[%s2890_s21 + $0x40] sm:$0xff]  ;;  %v1477_v60 = vld [vmem:[%s2890_s21 + $0xa8] sm:$0xff] }
 0x6a9   :  { %v1399_v34 = vsel %vm595_vm8, %v1398_v36, %v2850_v22  ;;  %1529 = vmatpush.msra.mxu2 %v1477_v60  ;;  %v1489_v32 = vld [vmem:[%s2890_s21 + $0x108] sm:$0xff]  ;;  %v1460_v38 = vld [vmem:[%s2890_s21 + $0x20] sm:$0xff]  ;;  %v1605_v60 = vld [vmem:[%s2043_s1 + $0x30] sm:$0xff] }
 0x6aa   :  { %v1402_v46 = vsub.f32 %v1399_v34, %v2566_v11  ;;  %v1473_v36 = vld [vmem:[%s2890_s21 + $0x88] sm:$0xff]  ;;  %1553 = vmatpush.msra.mxu3 %v1489_v32  ;;  %v1472_v34 = vld [vmem:[%s2890_s21 + $0x80] sm:$0xff] }
 0x6ab   :  { %1530 = vmatpush.msra.mxu2 %v1476_v25  ;;  %v1603_v25 = vld [vmem:[%s2043_s1 + $0x20] sm:$0xff] }
 0x6ac   :  { %v1411_v19 = vmul.f32 %v1402_v46, %v2453_v12  ;;  %v1406_v11 = vmul.f32 %v1402_v46, %v2551_v4  ;;  %1554 = vmatpush.msra.mxu3 %v1488_v37  ;;  %v1638_v37 = vld [vmem:[%s2993_s10 + $0x20] sm:$0xff] }
 0x6ad   :  { %1531 = vmatpush.msra.mxu2 %v1475_v31  ;;  %v1602_v31 = vld [vmem:[%s2043_s1 + $0x18] sm:$0xff] }
 0x6ae   :  { %v1383_v45 = vpop.permute.xlu0 %1382 }
 0x6af   :  { %v1387_v47 = vsel %vm595_vm8, %v1386_v20, %v1383_v45  ;;  %1532 = vmatpush.msra.mxu2 %v1474_v10  ;;  %v1459_v20 = vld [vmem:[%s2890_s21 + $0x18] sm:$0xff]  ;;  %v1458_v45 = vld [vmem:[%s2890_s21 + $0x10] sm:$0xff]  ;;  %v1639_v10 = vld [vmem:[%s2993_s10 + $0x28] sm:$0xff] }
 0x6b0   :  { %v1401_v18 = vsub.f32 %v1387_v47, %v2534_v63  ;;  %v1416_v63 = vmul.f32 %v1402_v46, %v2462_v27  ;;  %v1457_v47 = vld [vmem:[%s2890_s21 + $0x8] sm:$0xff] }
 0x6b1   :  { %1533 = vmatpush.msra.mxu2 %v1473_v36  ;;  %v1601_v36 = vld [vmem:[%s2043_s1 + $0x10] sm:$0xff] }
 0x6b2   :  { %v1404_v51 = vmul.f32 %v1401_v18, %v2517_v49  ;;  %v1409_v22 = vmul.f32 %v1401_v18, %v2475_v35  ;;  %v1414_v53 = vmul.f32 %v1401_v18, %v2491_v43  ;;  %v1337_v35 = vpop.permute.xlu2 %1336 }
 0x6b3   :  { %1534 = vmatpush.msra.mxu2 %v1472_v34  ;;  %v1600_v34 = vld [vmem:[%s2043_s1 + $0x8] sm:$0xff] }
 0x6b4   :  { %v1410_v54 = vadd.f32 %v1409_v22, %v1408_v48  ;;  %v1405_v55 = vadd.f32 %v1404_v51, %v1403_v50  ;;  %v1415_v56 = vadd.f32 %v1414_v53, %v1413_v39  ;;  %v1456_v48 = vld [vmem:[%s2890_s21] sm:$0xff] }
 0x6b6   :  { %v1412_v5 = vadd.f32 %v1411_v19, %v1410_v54  ;;  %v1407_v52 = vadd.f32 %v1406_v11, %v1405_v55  ;;  %v1417_v57 = vadd.f32 %v1416_v63, %v1415_v56  ;;  %v1341_v43 = vpop.permute.xlu0 %1340 }
 0x6b7   :  { %v1333_v49 = vpop.permute.xlu1 %1332 }
 0x6b8   :  { %v1344_v41 = vsel %vm1343_vm13, %v1324_v17, %v1333_v49  ;;  %1441 = vrot.lane.b32.xlu0 %v1412_v5, %s2272_s14  ;;  %v1419_v12 = vmul.f32 %v1412_v5, %v1412_v5  ;;  %1437 = vrot.lane.b32.xlu2 %v1407_v52, %s2268_s6  ;;  %v1418_v27 = vmul.f32 %v1407_v52, %v1407_v52  ;;  %v1466_v17 = vld [vmem:[%s2890_s21 + $0x50] sm:$0xff] }
 0x6b9   :  { %v1345_v4 = vsel %vm207_vm0, %v1344_v41, %v1337_v35  ;;  %v1421_v28 = vmul.f32 %v1417_v57, %v1417_v57  ;;  %1504 = vmatpush.msra.mxu1 %v1466_v17 }
 0x6ba   :  { %v1420_v7 = vadd.f32 %v1419_v12, %v1418_v27  ;;  %v1347_v40 = vsel %vm1346_vm14, %v1345_v4, %v1341_v43  ;;  %v1350_v19 = vpop.permute.xlu2 %1349 }
 0x6bb   :  { %1449 = vrot.lane.b32.xlu1 %v1347_v40, %s2268_s6  ;;  %1505 = vmatpush.msra.mxu1 %v1465_v14  ;;  %v1360_v52 = vsel %vm512_vm3, %v2706_v21, %v1350_v19 }
 0x6bc   :  { %v1422_v58 = vadd.f32 %v1421_v28, %v1420_v7  ;;  %v2207_v7 = vld [vmem:[%s2378_s17] ss:$0 sm:$0xff]  ;;  %s2309_s17 = smov 25  }
 0x6bd   :  { %1506 = vmatpush.msra.mxu1 %v1464_v6  ;;  %v1606_v6 = vld [vmem:[%s2043_s1 + $0x38] sm:$0xff]  ;;  %s3038_s16 = sld [smem:[%s3146_s0 + %s2309_s17]]   ;;  %s2314_s17 = smov 30  }
 0x6be   :  { %v1423_v30 = vadd.f32 1e-12, %v1422_v58  ;;  %v1354_v11 = vpop.permute.xlu0 %1353  ;;  %v2250_v58 = vld [vmem:[%s2355_s13] sm:$0xff]  ;;  %s2305_s13 = smov 15   ;;  %1622 = vmatpush.msrb.mxu0 %v1606_v6  ;;  %v1782_v6 = vld [vmem:[%s3055_s2 + $0x38] sm:$0xff]  ;;  %s2057_s18 = sld [smem:[%s3146_s0 + %s2314_s17]]  }
 0x6bf   :  { %1507 = vmatpush.msra.mxu1 %v1463_v24  ;;  %v1358_v53 = vpop.permute.xlu1 %1357  ;;  %v1496_v21 = vadd.f32 %v2250_v58, %v2207_v7  ;;  %s2983_s26 = sld [smem:[%s3146_s0 + %s2305_s13]]   ;;  %v1604_v24 = vld [vmem:[%s2043_s1 + $0x28] sm:$0xff]  ;;  %v1670_v7 = vld [vmem:[%s2047_s9] sm:$0xff] }
 0x6c0   :  { %2242 = vrsqrt.f32 %v1423_v30  ;;  %vm1431_vm15 = vcmp.eq.f32.partialorder %v1423_v30, inf  ;;  %v1434_v55 = vand.u32 2147483648, %v1423_v30  ;;  %vm1433_vm1 = vcmp.eq.f32.partialorder %v1423_v30, 0.0  ;;  %1623 = vmatpush.msrb.mxu0 %v1605_v60  ;;  %v1781_v60 = vld [vmem:[%s3055_s2 + $0x30] sm:$0xff] }
 0x6c1   :  { %1508 = vmatpush.msra.mxu1 %v1462_v29  ;;  %2244 = vrcp.f32 %v2304_v62  ;;  %v1641_v29 = vld [vmem:[%s2993_s10 + $0x38] sm:$0xff] }
 0x6c2   :  { %1624 = vmatpush.msrb.mxu0 %v1604_v24  ;;  %1658 = vmatpush.msrb.mxu3 %v1641_v29  ;;  %v1743_v24 = vld [vmem:[%s3050_s25 + $0x20] sm:$0xff]  ;;  %v1780_v29 = vld [vmem:[%s3055_s2 + $0x28] sm:$0xff] }
 0x6c3   :  { %1445 = vrot.lane.b32.xlu1 %v1417_v57, %s2271_s12  ;;  %1509 = vmatpush.msra.mxu1 %v1461_v44  ;;  %v1361_v57 = vsel %vm516_vm5, %v1360_v52, %v1354_v11  ;;  %v1675_v52 = vld [vmem:[%s2047_s9 + $0x28] sm:$0xff] }
 0x6c4   :  { %v1362_v41 = vsel %vm595_vm8, %v1361_v57, %v1358_v53  ;;  %1625 = vmatpush.msrb.mxu0 %v1603_v25  ;;  %v1674_v57 = vld [vmem:[%s2047_s9 + $0x20] sm:$0xff] }
 0x6c5   :  { %1510 = vmatpush.msra.mxu1 %v1460_v38  ;;  %v1815_v25 = vld [vmem:[%s3044_s15 + $0x20] sm:$0xff] }
 0x6c6   :  { %v2243_v42 = vpop.eup %2242  ;;  %1626 = vmatpush.msrb.mxu0 %v1602_v31  ;;  %v1814_v31 = vld [vmem:[%s3044_s15 + $0x18] sm:$0xff] }
 0x6c7   :  { %1511 = vmatpush.msra.mxu1 %v1459_v20  ;;  %v1425_v46 = vmul.f32 %v2243_v42, %v1423_v30  ;;  %v2245_v0 = vpop.eup %2244  ;;  %v1599_v20 = vld [vmem:[%s2043_s1] sm:$0xff]  ;;  %s2315_s1 = smov 31  }
 0x6c8   :  { %v1566_v9 = vmul.f32 64.0, %v2245_v0  ;;  %vm1570_vm2 = vweird.f32 %v2245_v0  ;;  %1627 = vmatpush.msrb.mxu0 %v1601_v36  ;;  %v1741_v36 = vld [vmem:[%s3050_s25 + $0x10] sm:$0xff] }
 0x6c9   :  { %1512 = vmatpush.msra.mxu1 %v1458_v45  ;;  %v1426_v18 = vmul.f32 %v2243_v42, %v1425_v46 }
 0x6ca   :  { %v1567_v3 = vsub.f32 1.0, %v1566_v9  ;;  %1628 = vmatpush.msrb.mxu0 %v1600_v34 }
 0x6cb   :  { %1513 = vmatpush.msra.mxu1 %v1457_v47  ;;  %v1427_v50 = vmul.f32 0.5, %v1426_v18 }
 0x6cc   :  { %v1568_v13 = vmul.f32 %v2245_v0, %v1567_v3  ;;  %1629 = vmatpush.msrb.mxu0 %v1599_v20  ;;  %v1812_v20 = vld [vmem:[%s3044_s15 + $0x8] sm:$0xff] }
 0x6cd   :  { %1514 = vmatpush.msra.mxu1 %v1456_v48  ;;  %v1428_v51 = vsub.f32 1.5, %v1427_v50 }
 0x6ce   :  { %v1569_v8 = vadd.f32 %v2245_v0, %v1568_v13 }
 0x6cf   :  { %v1429_v22 = vmul.f32 %v2243_v42, %v1428_v51  ;;  %v1637_v42 = vld [vmem:[%s2993_s10 + $0x18] sm:$0xff]  ;;  %v2211_v51 = vld [vmem:[%s2973_s30] ss:$0 sm:$0xff]  ;;  %1799 = vmatpush.msrb.mxu1 %v1782_v6  ;;  %s2319_s30 = smov 37  }
 0x6d0   :  { %v2976_v15 = vsel %vm1570_vm2, %v2245_v0, %v1569_v8  ;;  %v1746_v8 = vld [vmem:[%s3050_s25 + $0x38] sm:$0xff]  ;;  %s2064_s17 = sld [smem:[%s3146_s0 + %s2319_s30]]  }
 0x6d1   :  { %v1430_v39 = vmul.f32 %v1429_v22, %v1423_v30  ;;  %1800 = vmatpush.msrb.mxu1 %v1781_v60 }
 0x6d3   :  { %v1432_v54 = vsel %vm1431_vm15, %v1423_v30, %v1430_v39  ;;  %v1640_v30 = vld [vmem:[%s2993_s10 + $0x30] sm:$0xff]  ;;  %v2212_v39 = vld [vmem:[%s2983_s26] ss:$0 sm:$0xff]  ;;  %1801 = vmatpush.msrb.mxu1 %v1780_v29 }
 0x6d4   :  { %v1435_v56 = vsel %vm1433_vm1, %v1434_v55, %v1432_v54  ;;  %1659 = vmatpush.msrb.mxu3 %v1640_v30  ;;  %v1636_v54 = vld [vmem:[%s2993_s10 + $0x10] sm:$0xff]  ;;  %v1635_v55 = vld [vmem:[%s2993_s10 + $0x8] sm:$0xff]  ;;  %v1742_v30 = vld [vmem:[%s3050_s25 + $0x18] sm:$0xff] }
 0x6d6   :  { %1660 = vmatpush.msrb.mxu3 %v1639_v10 }
 0x6d8   :  { %1661 = vmatpush.msrb.mxu3 %v1638_v37  ;;  %v1813_v37 = vld [vmem:[%s3044_s15 + $0x10] sm:$0xff] }
 0x6da   :  { %1662 = vmatpush.msrb.mxu3 %v1637_v42  ;;  %v1740_v42 = vld [vmem:[%s3050_s25 + $0x8] sm:$0xff] }
 0x6dc   :  { %1663 = vmatpush.msrb.mxu3 %v1636_v54 }
 0x6de   :  { %1664 = vmatpush.msrb.mxu3 %v1635_v55 }
 0x712   :  { %v1438_v49 = vpop.permute.xlu2 %1437 }
 0x713   :  { %v1452_v12 = vsel %vm1343_vm13, %v1362_v41, %v1438_v49  ;;  %v1673_v49 = vld [vmem:[%s2047_s9 + $0x18] sm:$0xff] }
 0x72a   :  { %v1442_v35 = vpop.permute.xlu0 %1441 }
 0x72b   :  { %v1453_v27 = vsel %vm207_vm0, %v1452_v12, %v1442_v35  ;;  %v2213_v35 = vld [vmem:[%s2606_s19] ss:$0 sm:$0xff]  ;;  %s2307_s19 = smov 22  }
 0x72c   :  { %s3021_s12 = sld [smem:[%s3146_s0 + %s2307_s19]]   ;;  %s2312_s19 = smov 27  }
 0x72d   :  { %v1450_v63 = vpop.permute.xlu1 %1449 }
 0x72e   :  { %v1455_v5 = vsel %vm1343_vm13, %v1435_v56, %v1450_v63  ;;  %2094 = vmatmul.msk.f32.vlgmr.msra.gmra.mxu3 %vm1343_vm13, %v1450_v63  ;;  %v1634_v56 = vld [vmem:[%s2993_s10] sm:$0xff]  ;;  %v1677_v63 = vld [vmem:[%s2047_s9 + $0x38] sm:$0xff]  ;;  %s2058_s10 = sld [smem:[%s3146_s0 + %s2315_s1]]  }
 0x72f   :  { %1535 = vmatmul.f32.vlgmr.msra.gmra.mxu2 %v1455_v5  ;;  %v1676_v5 = vld [vmem:[%s2047_s9 + $0x30] sm:$0xff]  ;;  %1694 = vmatpush.msra.mxu0 %v1677_v63  ;;  %s2066_s1 = sld [smem:[%s3146_s0 + %s2320_s24]]  }
 0x730   :  { %1665 = vmatpush.msrb.mxu3 %v1634_v56 }
 0x731   :  { %1695 = vmatpush.msra.mxu0 %v1676_v5 }
 0x732   :  { %1762 = vmatpush.msra.mxu3 %v1746_v8  ;;  %v2216_v54 = vld [vmem:[%s3021_s12] ss:$0 sm:$0xff]  ;;  %s2054_s12 = sld [smem:[%s3146_s0 + %s2312_s19]]  }
 0x733   :  { %1696 = vmatpush.msra.mxu0 %v1675_v52 }
 0x735   :  { %v1446_v43 = vpop.permute.xlu1 %1445  ;;  %1697 = vmatpush.msra.mxu0 %v1674_v57 }
 0x736   :  { %v1454_v4 = vsel %vm1346_vm14, %v1453_v27, %v1446_v43  ;;  %v1672_v43 = vld [vmem:[%s2047_s9 + $0x10] sm:$0xff] }
 0x737   :  { %1515 = vmatmul.f32.vlgmr.msra.gmra.mxu1 %v1454_v4  ;;  %1698 = vmatpush.msra.mxu0 %v1673_v49  ;;  %v1671_v4 = vld [vmem:[%s2047_s9 + $0x8] sm:$0xff]  ;;  %v1851_v49 = vld [vmem:[%s2057_s18 + $0x18] sm:$0xff] }
 0x739   :  { %1699 = vmatpush.msra.mxu0 %v1672_v43  ;;  %v2219_v43 = vld [vmem:[%s2054_s12] ss:$0 sm:$0xff] }
 0x73b   :  { %1700 = vmatpush.msra.mxu0 %v1671_v4 }
 0x73d   :  { %1701 = vmatpush.msra.mxu0 %v1670_v7 }
 0x7b1   :  { %v1556_v59 = vpop.f32.mrf.mxu3 }
 0x7b2   :  { %v1536_v40 = vpop.f32.mrf.mxu2 }
 0x7b4   :  { %v1516_v28 = vpop.f32.mrf.mxu1 }
 0x7b5   :  { %v1537_v26 = vadd.f32 %v1536_v40, %v1516_v28  ;;  %v2214_v40 = vld [vmem:[%s2585_s8] ss:$0 sm:$0xff]  ;;  %s2308_s8 = smov 23  }
 0x7b6   :  { %s3033_s13 = sld [smem:[%s3146_s0 + %s2308_s8]]   ;;  %s2313_s8 = smov 29  }
 0x7b7   :  { %v1557_v1 = vadd.f32 %v1556_v59, %v1537_v26  ;;  %v2215_v26 = vld [vmem:[%s2048_s20] ss:$0 sm:$0xff]  ;;  %s2028_s20 = sld [smem:[%s3146_s0 + %s2311_s11]]  }
 0x7b8   :  { %s2059_s11 = sld [smem:[%s3146_s0 + %s2268_s6]]   ;;  %s2318_s6 = smov 34  }
 0x7b9   :  { %v1559_v33 = vadd.f32 %v1557_v1, %v1496_v21  ;;  %s2061_s3 = sld [smem:[%s3146_s0 + %s2318_s6]]  }
 0x7bb   :  { %v1562_v61 = vsel %vm207_vm0, %v1559_v33, 0.0 }
 0x7bc   :  { %1563 = vadd.xlane.f32.xlu2 %v1562_v61  ;;  %v2217_v63 = vld [vmem:[%s3033_s13] ss:$0 sm:$0xff]  ;;  %s2056_s13 = sld [smem:[%s3146_s0 + %s2313_s8]]  }
 0x7c2   :  { %v2220_v7 = vld [vmem:[%s2056_s13] ss:$0 sm:$0xff] }
 0x82f   :  { %v1564_v16 = vpop.xlane.xlu2 %1563 }
 0x830   :  { %v1572_v17 = vmul.f32 %v2976_v15, %v1564_v16  ;;  %v1745_v16 = vld [vmem:[%s3050_s25 + $0x30] sm:$0xff] }
 0x831   :  { %1763 = vmatpush.msra.mxu3 %v1745_v16  ;;  %v1916_v16 = vld [vmem:[%s2061_s3 + $0x18] sm:$0xff] }
 0x832   :  { %v1573_v23 = vsub.f32 %v1559_v33, %v1572_v17  ;;  %v1818_v17 = vld [vmem:[%s3044_s15 + $0x38] sm:$0xff] }
 0x833   :  { %1835 = vmatpush.msrb.mxu2 %v1818_v17  ;;  %v1915_v17 = vld [vmem:[%s2061_s3 + $0x10] sm:$0xff] }
 0x834   :  { %v1574_v14 = vmul.f32 %v1573_v23, %v1573_v23 }
 0x836   :  { %v1575_v2 = vsel %vm207_vm0, %v1574_v14, 0.0  ;;  %v1744_v14 = vld [vmem:[%s3050_s25 + $0x28] sm:$0xff] }
 0x837   :  { %1576 = vadd.xlane.f32.xlu0 %v1575_v2  ;;  %v1816_v2 = vld [vmem:[%s3044_s15 + $0x28] sm:$0xff]  ;;  %1764 = vmatpush.msra.mxu3 %v1744_v14  ;;  %v1948_v14 = vld [vmem:[%s2063_s7 + $0x18] sm:$0xff] }
 0x839   :  { %1765 = vmatpush.msra.mxu3 %v1743_v24 }
 0x83b   :  { %1766 = vmatpush.msra.mxu3 %v1742_v30  ;;  %v1947_v30 = vld [vmem:[%s2063_s7 + $0x10] sm:$0xff] }
 0x83d   :  { %1767 = vmatpush.msra.mxu3 %v1741_v36 }
 0x83f   :  { %1768 = vmatpush.msra.mxu3 %v1740_v42 }
 0x8aa   :  { %v1577_v32 = vpop.xlane.xlu0 %1576 }
 0x8ab   :  { %v1578_v44 = vmul.f32 %v1577_v32, %v2976_v15  ;;  %v1779_v32 = vld [vmem:[%s3055_s2 + $0x20] sm:$0xff] }
 0x8ac   :  { %1802 = vmatpush.msrb.mxu1 %v1779_v32 }
 0x8ad   :  { %v1579_v38 = vadd.f32 1e-05, %v1578_v44 }
 0x8af   :  { %2246 = vrsqrt.f32 %v1579_v38  ;;  %vm1586_vm4 = vweird.f32 %v1579_v38 }
 0x8b5   :  { %v2247_v45 = vpop.eup %2246 }
 0x8b6   :  { %v1581_v46 = vmul.f32 %v2247_v45, %v1579_v38  ;;  %vm1587_vm3 = vweird.f32 %v2247_v45  ;;  %v1778_v38 = vld [vmem:[%s3055_s2 + $0x18] sm:$0xff] }
 0x8b7   :  { %vm1588_vm5 = vmor %vm1586_vm4, %vm1587_vm3  ;;  %1803 = vmatpush.msrb.mxu1 %v1778_v38 }
 0x8b8   :  { %v1582_v47 = vmul.f32 %v2247_v45, %v1581_v46  ;;  %v1739_v46 = vld [vmem:[%s3050_s25] sm:$0xff]  ;;  %s2316_s25 = smov 33  }
 0x8b9   :  { %1769 = vmatpush.msra.mxu3 %v1739_v46  ;;  %s2060_s29 = sld [smem:[%s3146_s0 + %s2316_s25]]  }
 0x8ba   :  { %v1583_v18 = vmul.f32 0.5, %v1582_v47  ;;  %v1774_v47 = vld [vmem:[%s2028_s20] sm:$0xff] }
 0x8bc   :  { %v1584_v48 = vsub.f32 1.5, %v1583_v18  ;;  %v1776_v18 = vld [vmem:[%s3055_s2 + $0x8] sm:$0xff] }
 0x8be   :  { %v1585_v50 = vmul.f32 %v2247_v45, %v1584_v48  ;;  %v1775_v48 = vld [vmem:[%s3055_s2] sm:$0xff] }
 0x8bf   :  { %v2222_v6 = vld [vmem:[%s2060_s29] ss:$0 sm:$0xff] }
 0x8c0   :  { %v1589_v22 = vsel %vm1588_vm5, %v2247_v45, %v1585_v50  ;;  %v1777_v45 = vld [vmem:[%s3055_s2 + $0x10] sm:$0xff]  ;;  %v1784_v50 = vmax.f32 %v1774_v47, 0.0 }
 0x8c1   :  { %v1590_v53 = vmul.f32 %v1589_v22, %v1573_v23  ;;  %v1817_v23 = vld [vmem:[%s3044_s15 + $0x30] sm:$0xff]  ;;  %1804 = vmatpush.msrb.mxu1 %v1777_v45  ;;  %v2224_v45 = vld [vmem:[%s2064_s17] ss:$0 sm:$0xff] }
 0x8c2   :  { %1836 = vmatpush.msrb.mxu2 %v1817_v23  ;;  %v1914_v23 = vld [vmem:[%s2061_s3 + $0x8] sm:$0xff] }
 0x8c3   :  { %v1594_v19 = vmul.f32 %v2211_v51, %v1590_v53  ;;  %1805 = vmatpush.msrb.mxu1 %v1776_v18 }
 0x8c4   :  { %1837 = vmatpush.msrb.mxu2 %v1816_v2  ;;  %v1913_v2 = vld [vmem:[%s2061_s3] sm:$0xff] }
 0x8c5   :  { %v1598_v11 = vadd.f32 %v2212_v39, %v1594_v19  ;;  %1806 = vmatpush.msrb.mxu1 %v1775_v48  ;;  %v2225_v48 = vld [vmem:[%s2066_s1] ss:$0 sm:$0xff] }
 0x8c6   :  { %1838 = vmatpush.msrb.mxu2 %v1815_v25  ;;  %2099 = vmatmul.msk.f32.vlgmr.msrb.gmra.mxu1 %vm207_vm0, %v1784_v50 }
 0x8c7   :  { %2095 = vmatmul.msk.f32.vlgmr.msrb.gmra.mxu0 %vm207_vm0, %v1598_v11  ;;  %1969 = vmatpush.msra.mxu1 %v1948_v14 }
 0x8c8   :  { %1839 = vmatpush.msrb.mxu2 %v1814_v31  ;;  %1872 = vmatpush.msrb.mxu0 %v1851_v49  ;;  %v1946_v31 = vld [vmem:[%s2063_s7 + $0x8] sm:$0xff] }
 0x8c9   :  { %1970 = vmatpush.msra.mxu1 %v1947_v30 }
 0x8ca   :  { %1840 = vmatpush.msrb.mxu2 %v1813_v37 }
 0x8cb   :  { %1971 = vmatpush.msra.mxu1 %v1946_v31 }
 0x8cc   :  { %1841 = vmatpush.msrb.mxu2 %v1812_v20 }
 0x943   :  { %v1808_v4 = vpop.f32.mrf.mxu1 }
 0x944   :  { %v1631_v41 = vpop.f32.mrf.mxu0 }
 0x945   :  { %v1632_v12 = vadd.f32 %v2213_v35, %v1631_v41  ;;  %v1850_v35 = vld [vmem:[%s2057_s18 + $0x10] sm:$0xff]  ;;  %v1849_v41 = vld [vmem:[%s2057_s18 + $0x8] sm:$0xff] }
 0x946   :  { %1873 = vmatpush.msrb.mxu0 %v1850_v35 }
 0x947   :  { %v1643_v27 = vmax.f32 %v1632_v12, 0.0  ;;  %v1848_v12 = vld [vmem:[%s2057_s18] sm:$0xff] }
 0x948   :  { %1874 = vmatpush.msrb.mxu0 %v1849_v41 }
 0x949   :  { %2096 = vmatmul.msk.f32.vlgmr.msrb.gmra.mxu3 %vm207_vm0, %v1643_v27  ;;  %v2218_v27 = vld [vmem:[%s3038_s16] ss:$0 sm:$0xff]  ;;  %s2067_s16 = sld [smem:[%s3146_s0 + %s2276_s22]]  }
 0x94a   :  { %1875 = vmatpush.msrb.mxu0 %v1848_v12 }
 0x9cc   :  { %v1667_v28 = vpop.f32.mrf.mxu3 }
 0x9cd   :  { %v1668_v58 = vadd.f32 %v2214_v40, %v1667_v28 }
 0x9cf   :  { %v1679_v21 = vmax.f32 %v1668_v58, 0.0  ;;  %v1809_v58 = vadd.f32 %v2219_v43, %v1808_v4 }
 0x9d1   :  { %2097 = vmatmul.msk.f32.vlgmr.msra.gmra.mxu0 %vm207_vm0, %v1679_v21 }
 0x9d2   :  { %1937 = vmatpush.msra.mxu0 %v1916_v16 }
 0x9d4   :  { %1938 = vmatpush.msra.mxu0 %v1915_v17 }
 0x9d6   :  { %1939 = vmatpush.msra.mxu0 %v1914_v23 }
 0x9d8   :  { %1940 = vmatpush.msra.mxu0 %v1913_v2 }
 0xa4e   :  { %v1703_v59 = vpop.f32.mrf.mxu0 }
 0xa4f   :  { %v1704_v1 = vadd.f32 %v2215_v26, %v1703_v59 }
 0xa51   :  { %v1706_v33 = vadd.f32 %v1704_v1, %v1598_v11 }
 0xa53   :  { %v1709_v61 = vsel %vm207_vm0, %v1706_v33, 0.0 }
 0xa54   :  { %1710 = vadd.xlane.f32.xlu1 %v1709_v61  ;;  %v1882_v61 = vld [vmem:[%s2059_s11 + $0x10] sm:$0xff] }
 0xac7   :  { %v1711_v62 = vpop.xlane.xlu1 %1710 }
 0xac8   :  { %v1712_v0 = vmul.f32 %v1711_v62, %v2976_v15  ;;  %v1881_v62 = vld [vmem:[%s2059_s11 + $0x8] sm:$0xff] }
 0xaca   :  { %v3025_v9 = vsub.f32 %v1706_v33, %v1712_v0  ;;  %v1883_v33 = vld [vmem:[%s2059_s11 + $0x18] sm:$0xff]  ;;  %v1880_v0 = vld [vmem:[%s2059_s11] sm:$0xff] }
 0xacb   :  { %1904 = vmatpush.msrb.mxu3 %v1883_v33 }
 0xacc   :  { %v1714_v3 = vmul.f32 %v3025_v9, %v3025_v9 }
 0xacd   :  { %1905 = vmatpush.msrb.mxu3 %v1882_v61 }
 0xace   :  { %v1715_v13 = vsel %vm207_vm0, %v1714_v3, 0.0 }
 0xacf   :  { %1716 = vadd.xlane.f32.xlu2 %v1715_v13  ;;  %1906 = vmatpush.msrb.mxu3 %v1881_v62 }
 0xad1   :  { %1907 = vmatpush.msrb.mxu3 %v1880_v0 }
 0xb42   :  { %v1717_v10 = vpop.xlane.xlu2 %1716 }
 0xb43   :  { %v1718_v44 = vmul.f32 %v1717_v10, %v2976_v15  ;;  %v1811_v15 = vld [vmem:[%s3044_s15] sm:$0xff]  ;;  %s2321_s15 = smov 38  }
 0xb44   :  { %1842 = vmatpush.msrb.mxu2 %v1811_v15  ;;  %v1945_v10 = vld [vmem:[%s2063_s7] sm:$0xff]  ;;  %s2065_s25 = sld [smem:[%s3146_s0 + %s2321_s15]]  }
 0xb45   :  { %v1719_v34 = vadd.f32 1e-05, %v1718_v44  ;;  %1972 = vmatpush.msra.mxu1 %v1945_v10 }
 0xb47   :  { %2248 = vrsqrt.f32 %v1719_v34  ;;  %vm1726_vm7 = vweird.f32 %v1719_v34 }
 0xb4a   :  { %v1981_v38 = vld [vmem:[%s2065_s25 + $0x18] sm:$0xff]  ;;  %v1979_v42 = vld [vmem:[%s2065_s25 + $0x8] sm:$0xff]  ;;  %v1978_v20 = vld [vmem:[%s2065_s25] sm:$0xff] }
 0xb4b   :  { %2002 = vmatpush.msra.mxu2 %v1981_v38 }
 0xb4d   :  { %v2249_v51 = vpop.eup %2248 }
 0xb4e   :  { %v1721_v22 = vmul.f32 %v2249_v51, %v1719_v34  ;;  %vm1727_vm6 = vweird.f32 %v2249_v51  ;;  %v1980_v34 = vld [vmem:[%s2065_s25 + $0x10] sm:$0xff] }
 0xb4f   :  { %vm1728_vm8 = vmor %vm1726_vm7, %vm1727_vm6  ;;  %2003 = vmatpush.msra.mxu2 %v1980_v34 }
 0xb50   :  { %v1722_v53 = vmul.f32 %v2249_v51, %v1721_v22 }
 0xb51   :  { %2004 = vmatpush.msra.mxu2 %v1979_v42 }
 0xb52   :  { %v1723_v39 = vmul.f32 0.5, %v1722_v53 }
 0xb53   :  { %2005 = vmatpush.msra.mxu2 %v1978_v20 }
 0xb54   :  { %v1724_v19 = vsub.f32 1.5, %v1723_v39 }
 0xb56   :  { %v1725_v11 = vmul.f32 %v2249_v51, %v1724_v19 }
 0xb58   :  { %v1729_v55 = vsel %vm1728_vm8, %v2249_v51, %v1725_v11 }
 0xb59   :  { %v1730_v56 = vmul.f32 %v1729_v55, %v3025_v9  ;;  %v2221_v9 = vld [vmem:[%s2058_s10] ss:$0 sm:$0xff] }
 0xb5b   :  { %v1734_v5 = vmul.f32 %v2216_v54, %v1730_v56 }
 0xb5d   :  { %v3089_v52 = vadd.f32 %v2217_v63, %v1734_v5 }
 0xb5f   :  { %2098 = vmatmul.msk.f32.vlgmr.msra.gmra.mxu3 %vm207_vm0, %v3089_v52  ;;  %v1820_v57 = vmax.f32 %v3089_v52, 0.0 }
 0xb61   :  { %2100 = vmatmul.msk.f32.vlgmr.msrb.gmra.mxu2 %vm207_vm0, %v1820_v57 }
 0xbe2   :  { %v1771_v40 = vpop.f32.mrf.mxu3 }
 0xbe3   :  { %v1772_v28 = vadd.f32 %v2218_v27, %v1771_v40 }
 0xbe4   :  { %v1844_v21 = vpop.f32.mrf.mxu2 }
 0xbe5   :  { %v1845_v26 = vadd.f32 %v2220_v7, %v1844_v21  ;;  %2011 = vrot.lane.b32.xlu0 %v1772_v28, %s2272_s14  ;;  %s2317_s14 = smov 35  }
 0xbe6   :  { %s2062_s20 = sld [smem:[%s3146_s0 + %s2317_s14]]  }
 0xbe7   :  { %v1847_v59 = vadd.f32 %v1845_v26, %v1809_v58 }
 0xbe9   :  { %v1853_v1 = vmax.f32 %v1847_v59, 0.0 }
 0xbeb   :  { %2101 = vmatmul.msk.f32.vlgmr.msrb.gmra.mxu0 %vm1343_vm13, %v1853_v1 }
 0xbec   :  { %v2223_v32 = vld [vmem:[%s2062_s20] ss:$0 sm:$0xff] }
 0xc57   :  { %v2012_v22 = vpop.permute.xlu0 %2011 }
 0xc58   :  { %v2018_v53 = vsel %vm207_vm0, %v3089_v52, %v2012_v22 }
 0xc68   :  { %v1877_v3 = vpop.f32.mrf.mxu0 }
 0xc69   :  { %v1878_v13 = vadd.f32 %v2221_v9, %v1877_v3 }
 0xc6b   :  { %v1885_v8 = vmax.f32 %v1878_v13, 0.0 }
 0xc6d   :  { %2102 = vmatmul.msk.f32.vlgmr.msrb.gmra.mxu3 %vm1343_vm13, %v1885_v8 }
 0xcf0   :  { %v1909_v60 = vpop.f32.mrf.mxu3 }
 0xcf1   :  { %v1910_v24 = vadd.f32 %v2222_v6, %v1909_v60 }
 0xcf3   :  { %v1912_v25 = vadd.f32 %v1910_v24, %v1847_v59 }
 0xcf5   :  { %v1918_v29 = vmax.f32 %v1912_v25, 0.0 }
 0xcf7   :  { %2103 = vmatmul.msk.f32.vlgmr.msra.gmra.mxu0 %vm1343_vm13, %v1918_v29 }
 0xd74   :  { %v1942_v44 = vpop.f32.mrf.mxu0 }
 0xd75   :  { %v1943_v36 = vadd.f32 %v2223_v32, %v1942_v44 }
 0xd77   :  { %v1950_v37 = vmax.f32 %v1943_v36, 0.0 }
 0xd79   :  { %2104 = vmatmul.msk.f32.vlgmr.msra.gmra.mxu1 %vm1343_vm13, %v1950_v37 }
 0xdf6   :  { %v1974_v46 = vpop.f32.mrf.mxu1 }
 0xdf7   :  { %v1975_v15 = vadd.f32 %v2224_v45, %v1974_v46 }
 0xdf9   :  { %v1977_v47 = vadd.f32 %v1975_v15, %v1912_v25 }
 0xdfb   :  { %v1983_v18 = vmax.f32 %v1977_v47, 0.0 }
 0xdfd   :  { %2105 = vmatmul.msk.f32.vlgmr.msra.gmra.mxu2 %vm1343_vm13, %v1983_v18 }
 0xe80   :  { %v2007_v50 = vpop.f32.mrf.mxu2 }
 0xe81   :  { %v2008_v51 = vadd.f32 %v2225_v48, %v2007_v50 }
 0xe83   :  { %2015 = vrot.lane.b32.xlu1 %v2008_v51, %s2322_s5 }
 0xef5   :  { %v2016_v39 = vpop.permute.xlu1 %2015 }
 0xef6   :  { %v2020_v19 = vsel %vm2019_vm9, %v2018_v53, %v2016_v39 }
 0xef7   :  { %v2022_v11 = vsel %vm2021_vm10, %v2020_v19, 0.0 }
 0xef8   :  { %2023 = vst [vmem:[%s2067_s16] sm:$0xff] %v2022_v11 }

</bundles_post_ra>
